<compile_context>
chip_gen: v7x
topology: tpu7x:2x2x1
jax: 0.10.0
libtpu: 0.0.40
codegen_flags: <defaults>
</compile_context>

<pallas_src>
import jax
import jax.numpy as jnp
from jax import lax
from jax.experimental import pallas as pl


# ----------------------------------------------------------------------------
# Kernels
# ----------------------------------------------------------------------------
def _normalize_and_score(z, wknt_ref, o_ref):
    # Row-wise L2 normalize (dim=1 in the PyTorch code).  torch.norm has no
    # eps; the 1e-24 clamp only guards an all-zero row against inf/NaN and is a
    # no-op otherwise.  f32 math (v5e has no bf16 VPU/EUP).
    ss = jnp.maximum(jnp.sum(z * z, axis=-1, keepdims=True), 1e-24)
    zn = (z * lax.rsqrt(ss)).astype(wknt_ref.dtype)
    # (B,H) @ (H,C) in MXU-preferred (M,K)@(K,N) layout.  Prototypes are
    # pre-normalized and already carry the tau factor.
    o_ref[...] = jnp.dot(
        zn, wknt_ref[...], preferred_element_type=jnp.float32
    ).astype(o_ref.dtype)


def cossim_kernel_bf16(x_ref, wlin_t_ref, blin_ref, wknt_ref, o_ref):
    # x_ref:      (B, H) f32 pooled_output
    # wlin_t_ref: (H, H) bf16 pre-transposed projection weight
    # blin_ref:   (1, H) f32 bias
    # wknt_ref:   (H, C) bf16 row-normalized prototypes * tau
    # In-kernel cast to bf16 (no wrapper-side cast op); bf16 x bf16 MXU, f32 acc.
    z = jnp.dot(
        x_ref[...].astype(jnp.bfloat16), wlin_t_ref[...],
        preferred_element_type=jnp.float32,
    ) + blin_ref[...]
    _normalize_and_score(z, wknt_ref, o_ref)


def cossim_kernel_int8(x_ref, qw_ref, sw_ref, blin_ref, wknt_ref, o_ref):
    # x_ref:   (B, H) f32 pooled_output
    # qw_ref:  (H, H) int8 quantized pre-transposed projection weight
    # sw_ref:  (1, H) f32 per-output-column weight scales
    # Per-row symmetric activation quantization on the VPU (free: kernel is
    # DMA-bound), int8 x int8 on the MXU with i32 accumulation, dequant applied
    # before the bias add (bias is in the original scale).
    x = x_ref[...]
    sx = jnp.maximum(
        jnp.max(jnp.abs(x), axis=-1, keepdims=True), 1e-30
    ) * (1.0 / 127.0)                                        # (B, 1)
    qx = jnp.round(x / sx).astype(jnp.int8)                  # (B, H) in [-127, 127]
    acc = jnp.dot(qx, qw_ref[...], preferred_element_type=jnp.int32)
    z = acc.astype(jnp.float32) * sx * sw_ref[...] + blin_ref[...]
    _normalize_and_score(z, wknt_ref, o_ref)


# ----------------------------------------------------------------------------
# One-time (weight-load-time) parameter preprocessing — not per-call work.
# ----------------------------------------------------------------------------
def _mxu_supports_int8():
    """v5/v6 MXUs have an int8 path; v7x (bf16/fp8 only) and unknown chips -> bf16."""
    try:
        kind = jax.devices()[0].device_kind.lower()
    except Exception:
        return False
    return any(tag in kind for tag in ("v5", "v6"))


def prepare_params(w_lin, b_lin, w_k, tau, mode):
    """w_lin: (768,768) [out,in]; b_lin: (768,); w_k: (C,768); tau scalar."""
    blin2d = jnp.asarray(b_lin, jnp.float32).reshape(1, -1)

    # Row-normalized class prototypes, transposed to (H, C), tau folded in, bf16.
    wk = jnp.asarray(w_k, jnp.float32)
    wkn_t = (
        (wk / jnp.linalg.norm(wk, axis=1, keepdims=True)).T * jnp.float32(tau)
    ).astype(jnp.bfloat16)

    wlin_t = jnp.asarray(w_lin, jnp.float32).T               # (H_in, H_out)
    if mode == "int8":
        sw = jnp.maximum(
            jnp.max(jnp.abs(wlin_t), axis=0, keepdims=True), 1e-30
        ) / 127.0                                             # (1, H_out)
        qw = jnp.round(wlin_t / sw).astype(jnp.int8)
        return dict(mode="int8", w=qw, sw=sw, b=blin2d, wkn_t=wkn_t)
    return dict(mode="bf16", w=wlin_t.astype(jnp.bfloat16), b=blin2d, wkn_t=wkn_t)


# ----------------------------------------------------------------------------
# Forward
# ----------------------------------------------------------------------------
def cossim_forward(pooled_output, params):
    """pooled_output: (B, 768) f32. Returns (B, C) f32 cosine scores * tau."""
    B, H = pooled_output.shape
    C = params["wkn_t"].shape[1]

    def full(shape):
        return pl.BlockSpec(shape, lambda: (0,) * len(shape))

    if params["mode"] == "int8":
        kernel = cossim_kernel_int8
        operands = (pooled_output, params["w"], params["sw"],
                    params["b"], params["wkn_t"])
        in_specs = [full((B, H)), full((H, H)), full((1, H)),
                    full((1, H)), full((H, C))]
        w_bytes = H * H * 1 + H * 4            # int8 weight + f32 scales
    else:
        kernel = cossim_kernel_bf16
        operands = (pooled_output, params["w"], params["b"], params["wkn_t"])
        in_specs = [full((B, H)), full((H, H)), full((1, H)), full((H, C))]
        w_bytes = H * H * 2                    # bf16 weight

    cost = pl.CostEstimate(
        flops=2 * B * H * H + 2 * B * H * C,
        transcendentals=B,                     # one rsqrt per row
        bytes_accessed=(w_bytes
                        + B * H * 4            # f32 activations
                        + H * 4                # f32 bias
                        + H * C * 2            # bf16 prototypes (tau folded)
                        + B * C * 4),          # f32 output
    )

    return pl.pallas_call(
        kernel,
        out_shape=jax.ShapeDtypeStruct((B, C), jnp.float32),
        in_specs=in_specs,
        out_specs=full((B, C)),
        cost_estimate=cost,
    )(*operands)


def reference_forward(pooled_output, w_lin, b_lin, w_k, tau):
    z = pooled_output @ w_lin.T + b_lin
    zn = z / jnp.linalg.norm(z, axis=1, keepdims=True)
    wkn = w_k / jnp.linalg.norm(w_k, axis=1, keepdims=True)
    return (zn @ wkn.T) * tau


if __name__ == "__main__":
    key = jax.random.PRNGKey(0)
    B, H, C = 32, 768, 16   # batch, hidden (fixed at 768 by the module), num_of_class

    k_x, k_w, k_b, k_wk = jax.random.split(key, 4)
    bound = 1.0 / jnp.sqrt(jnp.float32(H))
    pooled_output = jax.random.normal(k_x, (B, H), dtype=jnp.float32)
    w_lin = jax.random.uniform(k_w, (H, H), jnp.float32, -bound, bound)
    b_lin = jax.random.uniform(k_b, (H,), jnp.float32, -bound, bound)
    w_k = jax.random.uniform(k_wk, (C, H), jnp.float32, -bound, bound)
    tau = jnp.float32(10.0)

    mode = "int8" if _mxu_supports_int8() else "bf16"
    params = prepare_params(w_lin, b_lin, w_k, tau, mode=mode)

    try:
        out = jax.block_until_ready(cossim_forward(pooled_output, params))
    except Exception:
        # Insurance: if this chip/toolchain rejects the int8 MXU path, fall back
        # to the always-available bf16 path (same semantics, 2x weight bytes).
        params = prepare_params(w_lin, b_lin, w_k, tau, mode="bf16")
        out = jax.block_until_ready(cossim_forward(pooled_output, params))

    ref = reference_forward(pooled_output, w_lin, b_lin, w_k, tau)
    assert out.shape == (B, C)
    # Tolerance accounts for bf16/int8 inputs to the projection matmul (f32/i32
    # accumulation); cosine normalization cancels most of the scale error.
    assert jnp.allclose(out, ref, atol=5e-2, rtol=5e-2), (
        f"max err {jnp.max(jnp.abs(out - ref))}")

    print("KERNEL_OK")
</pallas_src>

<mosaic_0001>
module attributes {stable_mosaic.version = 11 : i64} {
  func.func @cossim_kernel_bf16(%arg0: memref<32x768xf32, #tpu.memory_space<vmem>>, %arg1: memref<768x768xbf16, #tpu.memory_space<vmem>>, %arg2: memref<1x768xf32, #tpu.memory_space<vmem>>, %arg3: memref<768x16xbf16, #tpu.memory_space<vmem>>, %arg4: memref<32x16xf32, #tpu.memory_space<vmem>>) attributes {dimension_semantics = [], scalar_prefetch = 0 : i64, scratch_operands = 0 : i64, tpu.core_type = #tpu.core_type<tc>} {
    %c0 = arith.constant 0 : index
    %c0_0 = arith.constant 0 : index
    %0 = vector.load %arg0[%c0, %c0_0] : memref<32x768xf32, #tpu.memory_space<vmem>>, vector<32x768xf32>
    %1 = arith.truncf %0 : vector<32x768xf32> to vector<32x768xbf16>
    %c0_1 = arith.constant 0 : index
    %c0_2 = arith.constant 0 : index
    %2 = vector.load %arg1[%c0_1, %c0_2] : memref<768x768xbf16, #tpu.memory_space<vmem>>, vector<768x768xbf16>
    %cst = arith.constant dense<0.000000e+00> : vector<32x768xf32>
    %3 = tpu.matmul %1, %2, %cst {dimension_numbers = #tpu.dot_dimension_numbers<[1], [0], [0], [1], [0, 0, 1, 1], [], []>} : vector<32x768xbf16>, vector<768x768xbf16>, vector<32x768xf32> -> vector<32x768xf32>
    %c0_3 = arith.constant 0 : index
    %c0_4 = arith.constant 0 : index
    %4 = vector.load %arg2[%c0_3, %c0_4] : memref<1x768xf32, #tpu.memory_space<vmem>>, vector<1x768xf32>
    %5 = vector.broadcast %4 : vector<1x768xf32> to vector<32x768xf32>
    %6 = arith.addf %3, %5 : vector<32x768xf32>
    %7 = arith.mulf %6, %6 : vector<32x768xf32>
    %cst_5 = arith.constant dense<0.000000e+00> : vector<32xf32>
    %8 = vector.multi_reduction <add>, %7, %cst_5 [1] : vector<32x768xf32> to vector<32xf32>
    %9 = vector.shape_cast %8 : vector<32xf32> to vector<32x1xf32>
    %cst_6 = arith.constant 1.000000e-24 : f32
    %10 = vector.broadcast %cst_6 : f32 to vector<32x1xf32>
    %11 = arith.maximumf %9, %10 : vector<32x1xf32>
    %12 = math.rsqrt %11 : vector<32x1xf32>
    %13 = vector.broadcast %12 : vector<32x1xf32> to vector<32x768xf32>
    %14 = arith.mulf %6, %13 : vector<32x768xf32>
    %15 = arith.truncf %14 : vector<32x768xf32> to vector<32x768xbf16>
    %c0_7 = arith.constant 0 : index
    %c0_8 = arith.constant 0 : index
    %16 = vector.load %arg3[%c0_7, %c0_8] : memref<768x16xbf16, #tpu.memory_space<vmem>>, vector<768x16xbf16>
    %cst_9 = arith.constant dense<0.000000e+00> : vector<32x16xf32>
    %17 = tpu.matmul %15, %16, %cst_9 {dimension_numbers = #tpu.dot_dimension_numbers<[1], [0], [0], [1], [0, 0, 1, 1], [], []>} : vector<32x768xbf16>, vector<768x16xbf16>, vector<32x16xf32> -> vector<32x16xf32>
    %c0_10 = arith.constant 0 : index
    %c0_11 = arith.constant 0 : index
    %18 = vector.load %arg4[%c0_10, %c0_11] : memref<32x16xf32, #tpu.memory_space<vmem>>, vector<32x16xf32>
    tpu.vector_store %arg4[%c0_10, %c0_11], %17 {strides = array<i32>} : memref<32x16xf32, #tpu.memory_space<vmem>>, vector<32x16xf32>,
    return
  }
}

module attributes {stable_mosaic.version = 11 : i64} {
  func.func @cossim_kernel_bf16(%arg0: memref<32x768xf32, #tpu.memory_space<vmem>>, %arg1: memref<768x768xbf16, #tpu.memory_space<vmem>>, %arg2: memref<1x768xf32, #tpu.memory_space<vmem>>, %arg3: memref<768x16xbf16, #tpu.memory_space<vmem>>, %arg4: memref<32x16xf32, #tpu.memory_space<vmem>>) attributes {dimension_semantics = [], scalar_prefetch = 0 : i64, scratch_operands = 0 : i64, tpu.core_type = #tpu.core_type<tc>} {
    %c0 = arith.constant 0 : index
    %c0_0 = arith.constant 0 : index
    %0 = vector.load %arg0[%c0, %c0_0] : memref<32x768xf32, #tpu.memory_space<vmem>>, vector<32x768xf32>
    %1 = arith.truncf %0 : vector<32x768xf32> to vector<32x768xbf16>
    %c0_1 = arith.constant 0 : index
    %c0_2 = arith.constant 0 : index
    %2 = vector.load %arg1[%c0_1, %c0_2] : memref<768x768xbf16, #tpu.memory_space<vmem>>, vector<768x768xbf16>
    %cst = arith.constant dense<0.000000e+00> : vector<32x768xf32>
    %3 = tpu.matmul %1, %2, %cst {dimension_numbers = #tpu.dot_dimension_numbers<[1], [0], [0], [1], [0, 0, 1, 1], [], []>} : vector<32x768xbf16>, vector<768x768xbf16>, vector<32x768xf32> -> vector<32x768xf32>
    %c0_3 = arith.constant 0 : index
    %c0_4 = arith.constant 0 : index
    %4 = vector.load %arg2[%c0_3, %c0_4] : memref<1x768xf32, #tpu.memory_space<vmem>>, vector<1x768xf32>
    %5 = vector.broadcast %4 : vector<1x768xf32> to vector<32x768xf32>
    %6 = arith.addf %3, %5 : vector<32x768xf32>
    %7 = arith.mulf %6, %6 : vector<32x768xf32>
    %cst_5 = arith.constant dense<0.000000e+00> : vector<32xf32>
    %8 = vector.multi_reduction <add>, %7, %cst_5 [1] : vector<32x768xf32> to vector<32xf32>
    %9 = vector.shape_cast %8 : vector<32xf32> to vector<32x1xf32>
    %cst_6 = arith.constant 1.000000e-24 : f32
    %10 = vector.broadcast %cst_6 : f32 to vector<32x1xf32>
    %11 = arith.maximumf %9, %10 : vector<32x1xf32>
    %12 = math.rsqrt %11 : vector<32x1xf32>
    %13 = vector.broadcast %12 : vector<32x1xf32> to vector<32x768xf32>
    %14 = arith.mulf %6, %13 : vector<32x768xf32>
    %15 = arith.truncf %14 : vector<32x768xf32> to vector<32x768xbf16>
    %c0_7 = arith.constant 0 : index
    %c0_8 = arith.constant 0 : index
    %16 = vector.load %arg3[%c0_7, %c0_8] : memref<768x16xbf16, #tpu.memory_space<vmem>>, vector<768x16xbf16>
    %cst_9 = arith.constant dense<0.000000e+00> : vector<32x16xf32>
    %17 = tpu.matmul %15, %16, %cst_9 {dimension_numbers = #tpu.dot_dimension_numbers<[1], [0], [0], [1], [0, 0, 1, 1], [], []>} : vector<32x768xbf16>, vector<768x16xbf16>, vector<32x16xf32> -> vector<32x16xf32>
    %c0_10 = arith.constant 0 : index
    %c0_11 = arith.constant 0 : index
    %18 = vector.load %arg4[%c0_10, %c0_11] : memref<32x16xf32, #tpu.memory_space<vmem>>, vector<32x16xf32>
    tpu.vector_store %arg4[%c0_10, %c0_11], %17 {strides = array<i32>} : memref<32x16xf32, #tpu.memory_space<vmem>>, vector<32x16xf32>,
    return
  }
}

</mosaic_0001>

<bundles_post_ra>
// kernel: tpu_custom_call.1
= control target key start
LH: loop header
LB: loop body
LE: loop exit
PB: predicated region body
PF: predicated region fallthrough
CT: control target
= control target key end

     0   :  { %9 = vsyncpa [#allocation3], 0  ;;  %s4551_s0 = inlined_call_operand.hbm [shape: f32[32,768], index: 0, kind: input, shape index: {}]   ;;  %s4552_s1 = inlined_call_operand.hbm [shape: bf16[768,768], index: 1, kind: input, shape index: {}]   ;;  %s4553_s2 = inlined_call_operand.hbm [shape: f32[1,768], index: 2, kind: input, shape index: {}]   ;;  %s4554_s3 = inlined_call_operand.vmem [shape: bf16[768,16], index: 3, kind: input, shape index: {}]   ;;  %s4555_s4 = inlined_call_operand.vmem [shape: f32[32,16], index: 4, kind: output, shape index: {}]  }
   0x1   :  { %10 = vsyncpa [#allocation5], 0  ;;  %s4041_s15 = smov [#allocation4]   ;;  %s3971_s19 = scalar_lea.hbm %s4552_s1, 36864 }
   0x2   :  { %s28_s16 = sshll.u32 %s4041_s15, 4  ;;  %p3972_p0 = scmp.ne.s32.totalorder %s4552_s1, %s3971_s19  ;;  %s29_s16 = int_to_ptr.vmem [resolvable:$true] %s28_s16 }
   0x3   :  { %p3975_p1 = scmp.lt.u32.totalorder %s3971_s19, %s4552_s1 }
   0x5   :  { %p3977_p2 = pnand %p3975_p1, %p3972_p0 }
   0x7   :  { %3980 = shalt.err (!%p3977_p2)
}
   0x8   :  { %s3981_s24 = scalar_lea.vmem %s29_s16, 36864  ;;  %p3986_p4 = scmp.lt.s32.totalorder %s29_s16, %s29_s16 }
   0x9   :  { %p3982_p3 = scmp.ne.s32.totalorder %s29_s16, %s3981_s24  ;;  %p3987_p5 = scmp.lt.s32.totalorder %s3981_s24, %s3981_s24 }
   0xb   :  { %p3988_p6 = por %p3987_p5, %p3986_p4 }
   0xd   :  { %p3989_p7 = pnand %p3988_p6, %p3982_p3 }
   0xf   :  { %3992 = shalt.err (!%p3989_p7)
}
  0x10   :  { %s4042_s25 = smov 384   ;;  %s4043_s26 = smov 24  }
  0x11   :  { %34 = dma.hbm_to_vmem [thread:$0]  %s4552_s1, 36864, %s29_s16, [#allocation5], %s4042_s25, %s4042_s25, %s4043_s26  }
  0x12   :  { %s4044_s29 = smov [#allocation2]   ;;  %s3993_s7 = scalar_lea.hbm %s4551_s0, 3072 }
  0x13   :  { %s16_s30 = sshll.u32 %s4044_s29, 4  ;;  %p3994_p8 = scmp.ne.s32.totalorder %s4551_s0, %s3993_s7  ;;  %s17_s30 = int_to_ptr.vmem [resolvable:$true] %s16_s30 }
  0x14   :  { %p3997_p9 = scmp.lt.u32.totalorder %s3993_s7, %s4551_s0 }
  0x16   :  { %p3999_p10 = pnand %p3997_p9, %p3994_p8 }
  0x18   :  { %4002 = shalt.err (!%p3999_p10)
}
  0x19   :  { %s4003_s12 = scalar_lea.vmem %s17_s30, 3072  ;;  %p4008_p12 = scmp.lt.s32.totalorder %s17_s30, %s17_s30 }
  0x1a   :  { %p4004_p11 = scmp.ne.s32.totalorder %s17_s30, %s4003_s12  ;;  %p4009_p13 = scmp.lt.s32.totalorder %s4003_s12, %s4003_s12 }
  0x1c   :  { %p4010_p0 = por %p4009_p13, %p4008_p12 }
  0x1e   :  { %p4011_p1 = pnand %p4010_p0, %p4004_p11 }
  0x20   :  { %4014 = shalt.err (!%p4011_p1)
}
  0x21   :  { %s4045_s1 = smov 768   ;;  %s4046_s13 = smov 48  }
  0x22   :  { %22 = dma.hbm_to_vmem [thread:$0]  %s4551_s0, 3072, %s17_s30, [#allocation3], %s4045_s1, %s4045_s1, %s4046_s13  }
  0x23   :  { %s4047_s16 = smov [#allocation6]   ;;  %s4015_s20 = scalar_lea.hbm %s4553_s2, 96 }
  0x24   :  { %s41_s17 = sshll.u32 %s4047_s16, 4  ;;  %p4016_p2 = scmp.ne.s32.totalorder %s4553_s2, %s4015_s20  ;;  %s42_s17 = int_to_ptr.vmem [resolvable:$true] %s41_s17 }
  0x25   :  { %p4019_p3 = scmp.lt.u32.totalorder %s4015_s20, %s4553_s2 }
  0x27   :  { %p4021_p4 = pnand %p4019_p3, %p4016_p2 }
  0x29   :  { %4024 = shalt.err (!%p4021_p4)
}
  0x2a   :  { %s4025_s25 = scalar_lea.vmem %s42_s17, 96  ;;  %p4030_p6 = scmp.lt.s32.totalorder %s42_s17, %s42_s17 }
  0x2b   :  { %p4026_p5 = scmp.ne.s32.totalorder %s42_s17, %s4025_s25  ;;  %p4031_p7 = scmp.lt.s32.totalorder %s4025_s25, %s4025_s25 }
  0x2d   :  { %p4032_p8 = por %p4031_p7, %p4030_p6 }
  0x2f   :  { %p4033_p9 = pnand %p4032_p8, %p4026_p5 }
  0x31   :  { %4036 = shalt.err (!%p4033_p9)
}
  0x32   :  { %44 = dma.hbm_to_vmem [thread:$0]  %s4553_s2, 96, %s42_s17, [#allocation5]  }
  0x33   :  { %4037 = dma.done.wait [#allocation3], 3072  }
  0x34   :  { %4038 = vsyncadd [#allocation3], 4294964224 }
  0x35   :  { %4039 = dma.done.wait [#allocation5], 36960  }
  0x36   :  { %4040 = vsyncadd [#allocation5], 4294930336  ;;  %v3483_v0 = vld [vmem:[#allocation4 + $0x4] ss:$24 sps:$4 sm:$0xff]   ;;  %v3487_v2 = vld [vmem:[#allocation4] ss:$24 sps:$4 sm:$0xff]  }
  0x37   :  { %v3485_v1 = vld [vmem:[#allocation4 + $0x304] ss:$24 sps:$4 sm:$0xff]   ;;  %1853 = vmatprep.subr.bf16.mxu1 %v3483_v0  ;;  %v3488_v3 = vld [vmem:[#allocation4 + $0x300] ss:$24 sps:$4 sm:$0xff]   ;;  %v3489_v4 = vld [vmem:[#allocation4 + $0x34] ss:$24 sps:$4 sm:$0xff]  }
  0x38   :  { %1906 = vmatprep.subr.bf16.mxu0 %v3485_v1  ;;  %1854 = vmatpush1.bf16.msra.mxu1 %v3487_v2  ;;  %v3491_v5 = vld [vmem:[#allocation4 + $0x334] ss:$24 sps:$4 sm:$0xff]   ;;  %v3493_v6 = vld [vmem:[#allocation4 + $0x30] ss:$24 sps:$4 sm:$0xff]   ;;  %v3495_v8 = vld [vmem:[#allocation4 + $0x64] ss:$24 sps:$4 sm:$0xff]  }
  0x39   :  { %1907 = vmatpush1.bf16.msra.mxu0 %v3488_v3  ;;  %1855 = vmatprep.subr.bf16.mxu1 %v3489_v4  ;;  %v3494_v7 = vld [vmem:[#allocation4 + $0x330] ss:$24 sps:$4 sm:$0xff]   ;;  %v3497_v9 = vld [vmem:[#allocation4 + $0x364] ss:$24 sps:$4 sm:$0xff]   ;;  %v3499_v10 = vld [vmem:[#allocation4 + $0x60] ss:$24 sps:$4 sm:$0xff]  }
  0x3a   :  { %1908 = vmatprep.subr.bf16.mxu0 %v3491_v5  ;;  %v3500_v11 = vld [vmem:[#allocation4 + $0x360] ss:$24 sps:$4 sm:$0xff]   ;;  %v3501_v12 = vld [vmem:[#allocation4 + $0x94] ss:$24 sps:$4 sm:$0xff]   ;;  %v3505_v14 = vld [vmem:[#allocation4 + $0x90] ss:$24 sps:$4 sm:$0xff]  }
  0x3b   :  { %v3503_v13 = vld [vmem:[#allocation4 + $0x394] ss:$24 sps:$4 sm:$0xff]   ;;  %v3506_v15 = vld [vmem:[#allocation4 + $0x390] ss:$24 sps:$4 sm:$0xff]   ;;  %v3507_v16 = vld [vmem:[#allocation4 + $0xc4] ss:$24 sps:$4 sm:$0xff]  }
  0x3c   :  { %1856 = vmatpush1.bf16.msra.mxu1 %v3493_v6  ;;  %v3509_v17 = vld [vmem:[#allocation4 + $0x3c4] ss:$24 sps:$4 sm:$0xff]   ;;  %v3511_v18 = vld [vmem:[#allocation4 + $0xc0] ss:$24 sps:$4 sm:$0xff]   ;;  %v3513_v20 = vld [vmem:[#allocation4 + $0xf4] ss:$24 sps:$4 sm:$0xff]  }
  0x3d   :  { %1909 = vmatpush1.bf16.msra.mxu0 %v3494_v7  ;;  %1857 = vmatprep.subr.bf16.mxu1 %v3495_v8  ;;  %v3512_v19 = vld [vmem:[#allocation4 + $0x3c0] ss:$24 sps:$4 sm:$0xff]   ;;  %v3515_v21 = vld [vmem:[#allocation4 + $0x3f4] ss:$24 sps:$4 sm:$0xff]   ;;  %v3517_v22 = vld [vmem:[#allocation4 + $0xf0] ss:$24 sps:$4 sm:$0xff]  }
  0x3e   :  { %1910 = vmatprep.subr.bf16.mxu0 %v3497_v9  ;;  %v3518_v23 = vld [vmem:[#allocation4 + $0x3f0] ss:$24 sps:$4 sm:$0xff]   ;;  %v3519_v24 = vld [vmem:[#allocation4 + $0x124] ss:$24 sps:$4 sm:$0xff]   ;;  %v3523_v26 = vld [vmem:[#allocation4 + $0x120] ss:$24 sps:$4 sm:$0xff]  }
  0x3f   :  { %v3521_v25 = vld [vmem:[#allocation4 + $0x424] ss:$24 sps:$4 sm:$0xff]   ;;  %v3524_v27 = vld [vmem:[#allocation4 + $0x420] ss:$24 sps:$4 sm:$0xff]   ;;  %v3525_v28 = vld [vmem:[#allocation4 + $0x154] ss:$24 sps:$4 sm:$0xff]  }
  0x40   :  { %1858 = vmatpush1.bf16.msra.mxu1 %v3499_v10  ;;  %v3527_v29 = vld [vmem:[#allocation4 + $0x454] ss:$24 sps:$4 sm:$0xff]   ;;  %v3529_v30 = vld [vmem:[#allocation4 + $0x150] ss:$24 sps:$4 sm:$0xff]   ;;  %v3531_v32 = vld [vmem:[#allocation4 + $0x184] ss:$24 sps:$4 sm:$0xff]  }
  0x41   :  { %1911 = vmatpush1.bf16.msra.mxu0 %v3500_v11  ;;  %1859 = vmatprep.subr.bf16.mxu1 %v3501_v12  ;;  %v3530_v31 = vld [vmem:[#allocation4 + $0x450] ss:$24 sps:$4 sm:$0xff]   ;;  %v3533_v33 = vld [vmem:[#allocation4 + $0x484] ss:$24 sps:$4 sm:$0xff]   ;;  %v3535_v34 = vld [vmem:[#allocation4 + $0x180] ss:$24 sps:$4 sm:$0xff]  }
  0x42   :  { %1912 = vmatprep.subr.bf16.mxu0 %v3503_v13  ;;  %v3536_v35 = vld [vmem:[#allocation4 + $0x480] ss:$24 sps:$4 sm:$0xff]   ;;  %v3537_v36 = vld [vmem:[#allocation4 + $0x1b4] ss:$24 sps:$4 sm:$0xff]   ;;  %v3541_v38 = vld [vmem:[#allocation4 + $0x1b0] ss:$24 sps:$4 sm:$0xff]  }
  0x43   :  { %v3539_v37 = vld [vmem:[#allocation4 + $0x4b4] ss:$24 sps:$4 sm:$0xff]   ;;  %v3542_v39 = vld [vmem:[#allocation4 + $0x4b0] ss:$24 sps:$4 sm:$0xff]   ;;  %v3543_v40 = vld [vmem:[#allocation4 + $0x1e4] ss:$24 sps:$4 sm:$0xff]  }
  0x44   :  { %1860 = vmatpush1.bf16.msra.mxu1 %v3505_v14  ;;  %v3545_v41 = vld [vmem:[#allocation4 + $0x4e4] ss:$24 sps:$4 sm:$0xff]   ;;  %v3547_v42 = vld [vmem:[#allocation4 + $0x1e0] ss:$24 sps:$4 sm:$0xff]   ;;  %v3549_v44 = vld [vmem:[#allocation4 + $0x214] ss:$24 sps:$4 sm:$0xff]  }
  0x45   :  { %1913 = vmatpush1.bf16.msra.mxu0 %v3506_v15  ;;  %1861 = vmatprep.subr.bf16.mxu1 %v3507_v16  ;;  %v3548_v43 = vld [vmem:[#allocation4 + $0x4e0] ss:$24 sps:$4 sm:$0xff]   ;;  %v3551_v45 = vld [vmem:[#allocation4 + $0x514] ss:$24 sps:$4 sm:$0xff]   ;;  %v3553_v46 = vld [vmem:[#allocation4 + $0x210] ss:$24 sps:$4 sm:$0xff]  }
  0x46   :  { %1914 = vmatprep.subr.bf16.mxu0 %v3509_v17  ;;  %v3554_v47 = vld [vmem:[#allocation4 + $0x510] ss:$24 sps:$4 sm:$0xff]   ;;  %v64_v49 = vld [vmem:[#allocation2 + $0x38] sm:$0xff]  ;;  %v3561_v58 = vld [vmem:[#allocation4 + $0x274] ss:$24 sps:$4 sm:$0xff]   ;;  %vm2957_vm0 = vcmask 130048  }
  0x47   :  { %v58_v48 = vld [vmem:[#allocation2 + $0x8] sm:$0xff]  ;;  %v60_v50 = vld [vmem:[#allocation2 + $0x18] sm:$0xff]  ;;  %v57_v6 = vld [vmem:[#allocation2] sm:$0xff] }
  0x48   :  { %1862 = vmatpush1.bf16.msra.mxu1 %v3511_v18  ;;  %v66_v51 = vld [vmem:[#allocation2 + $0x48] sm:$0xff]  ;;  %v3555_v52 = vld [vmem:[#allocation4 + $0x244] ss:$24 sps:$4 sm:$0xff]   ;;  %v4109_v53 = vpack.c.bf16 %v64_v49, %v58_v48  ;;  %v3559_v56 = vld [vmem:[#allocation4 + $0x240] ss:$24 sps:$4 sm:$0xff]  }
  0x49   :  { %1915 = vmatpush1.bf16.msra.mxu0 %v3512_v19  ;;  %1863 = vmatprep.subr.bf16.mxu1 %v3513_v20  ;;  %v4111_v54 = vpack.c.bf16 %v66_v51, %v60_v50  ;;  %v3557_v55 = vld [vmem:[#allocation4 + $0x544] ss:$24 sps:$4 sm:$0xff]   ;;  %v3560_v57 = vld [vmem:[#allocation4 + $0x540] ss:$24 sps:$4 sm:$0xff]   ;;  %v3563_v59 = vld [vmem:[#allocation4 + $0x574] ss:$24 sps:$4 sm:$0xff]  }
  0x4a   :  { %1916 = vmatprep.subr.bf16.mxu0 %v3515_v21  ;;  %1885 = vmatprep.mubr.bf16.mxu1 %v4109_v53  ;;  %v3565_v60 = vld [vmem:[#allocation4 + $0x270] ss:$24 sps:$4 sm:$0xff]   ;;  %v3567_v62 = vld [vmem:[#allocation4 + $0x2a4] ss:$24 sps:$4 sm:$0xff]   ;;  %v3571_v0 = vld [vmem:[#allocation4 + $0x2a0] ss:$24 sps:$4 sm:$0xff]  }
  0x4b   :  { %1938 = vmatprep.mubr.bf16.mxu0 %v4111_v54  ;;  %v3566_v61 = vld [vmem:[#allocation4 + $0x570] ss:$24 sps:$4 sm:$0xff]   ;;  %v3569_v63 = vld [vmem:[#allocation4 + $0x5a4] ss:$24 sps:$4 sm:$0xff]   ;;  %v3572_v1 = vld [vmem:[#allocation4 + $0x5a0] ss:$24 sps:$4 sm:$0xff]  }
  0x4c   :  { %1864 = vmatpush1.bf16.msra.mxu1 %v3517_v22  ;;  %v3573_v2 = vld [vmem:[#allocation4 + $0x2d4] ss:$24 sps:$4 sm:$0xff]   ;;  %v3577_v4 = vld [vmem:[#allocation4 + $0x2d0] ss:$24 sps:$4 sm:$0xff]   ;;  %v3581_v7 = vld [vmem:[#allocation4 + $0x604] ss:$24 sps:$4 sm:$0xff]  }
  0x4d   :  { %1917 = vmatpush1.bf16.msra.mxu0 %v3518_v23  ;;  %1865 = vmatprep.subr.bf16.mxu1 %v3519_v24  ;;  %v3575_v3 = vld [vmem:[#allocation4 + $0x5d4] ss:$24 sps:$4 sm:$0xff]   ;;  %v3578_v5 = vld [vmem:[#allocation4 + $0x5d0] ss:$24 sps:$4 sm:$0xff]   ;;  %v65_v10 = vld [vmem:[#allocation2 + $0x40] sm:$0xff] }
  0x4e   :  { %1918 = vmatprep.subr.bf16.mxu0 %v3521_v25  ;;  %v63_v8 = vld [vmem:[#allocation2 + $0x30] sm:$0xff]  ;;  %v3584_v11 = vld [vmem:[#allocation4 + $0xc] ss:$24 sps:$4 sm:$0xff]   ;;  %v3579_v12 = vld [vmem:[#allocation4 + $0x600] ss:$24 sps:$4 sm:$0xff]  }
  0x4f   :  { %v59_v9 = vld [vmem:[#allocation2 + $0x10] sm:$0xff]  ;;  %v3582_v13 = vld [vmem:[#allocation4 + $0x8] ss:$24 sps:$4 sm:$0xff]   ;;  %v4115_v14 = vpack.c.bf16 %v63_v8, %v57_v6  ;;  %v3593_v20 = vld [vmem:[#allocation4 + $0x664] ss:$24 sps:$4 sm:$0xff]  }
  0x50   :  { %1866 = vmatpush1.bf16.msra.mxu1 %v3523_v26  ;;  %v4117_v15 = vpack.c.bf16 %v65_v10, %v59_v9  ;;  %v3587_v16 = vld [vmem:[#allocation4 + $0x634] ss:$24 sps:$4 sm:$0xff]   ;;  %v3585_v18 = vld [vmem:[#allocation4 + $0x630] ss:$24 sps:$4 sm:$0xff]   ;;  %v3591_v22 = vld [vmem:[#allocation4 + $0x660] ss:$24 sps:$4 sm:$0xff]  }
  0x51   :  { %1919 = vmatpush1.bf16.msra.mxu0 %v3524_v27  ;;  %1867 = vmatprep.subr.bf16.mxu1 %v3525_v28  ;;  %v3590_v17 = vld [vmem:[#allocation4 + $0x3c] ss:$24 sps:$4 sm:$0xff]   ;;  %v3588_v19 = vld [vmem:[#allocation4 + $0x38] ss:$24 sps:$4 sm:$0xff]   ;;  %v3596_v21 = vld [vmem:[#allocation4 + $0x6c] ss:$24 sps:$4 sm:$0xff]  }
  0x52   :  { %1920 = vmatprep.subr.bf16.mxu0 %v3527_v29  ;;  %v3594_v23 = vld [vmem:[#allocation4 + $0x68] ss:$24 sps:$4 sm:$0xff]   ;;  %v3599_v24 = vld [vmem:[#allocation4 + $0x694] ss:$24 sps:$4 sm:$0xff]   ;;  %v3600_v27 = vld [vmem:[#allocation4 + $0x98] ss:$24 sps:$4 sm:$0xff]  }
  0x53   :  { %v3602_v25 = vld [vmem:[#allocation4 + $0x9c] ss:$24 sps:$4 sm:$0xff]   ;;  %v3597_v26 = vld [vmem:[#allocation4 + $0x690] ss:$24 sps:$4 sm:$0xff]   ;;  %v3608_v29 = vld [vmem:[#allocation4 + $0xcc] ss:$24 sps:$4 sm:$0xff]  }
  0x54   :  { %1868 = vmatpush1.bf16.msra.mxu1 %v3529_v30  ;;  %v3605_v28 = vld [vmem:[#allocation4 + $0x6c4] ss:$24 sps:$4 sm:$0xff]   ;;  %v3603_v30 = vld [vmem:[#allocation4 + $0x6c0] ss:$24 sps:$4 sm:$0xff]   ;;  %v75_v50 = vld [vmem:[#allocation2 + $0x90] sm:$0xff] }
  0x55   :  { %1921 = vmatpush1.bf16.msra.mxu0 %v3530_v31  ;;  %1869 = vmatprep.subr.bf16.mxu1 %v3531_v32  ;;  %v3606_v31 = vld [vmem:[#allocation4 + $0xc8] ss:$24 sps:$4 sm:$0xff]   ;;  %v3611_v32 = vld [vmem:[#allocation4 + $0x6f4] ss:$24 sps:$4 sm:$0xff]  }
  0x56   :  { %1922 = vmatprep.subr.bf16.mxu0 %v3533_v33  ;;  %v3614_v33 = vld [vmem:[#allocation4 + $0xfc] ss:$24 sps:$4 sm:$0xff]   ;;  %v3618_v48 = vld [vmem:[#allocation4 + $0x128] ss:$24 sps:$4 sm:$0xff]   ;;  %v3644_v6 = vld [vmem:[#allocation4 + $0x1ec] ss:$24 sps:$4 sm:$0xff]  }
  0x57   :  { %v69_v49 = vld [vmem:[#allocation2 + $0x60] sm:$0xff]  ;;  %v3623_v51 = vld [vmem:[#allocation4 + $0x754] ss:$24 sps:$4 sm:$0xff]  }
  0x58   :  { %1870 = vmatpush1.bf16.msra.mxu1 %v3535_v34  ;;  %v3609_v34 = vld [vmem:[#allocation4 + $0x6f0] ss:$24 sps:$4 sm:$0xff]   ;;  %v3647_v9 = vld [vmem:[#allocation4 + $0x814] ss:$24 sps:$4 sm:$0xff]  }
  0x59   :  { %1923 = vmatpush1.bf16.msra.mxu0 %v3536_v35  ;;  %1871 = vmatprep.subr.bf16.mxu1 %v3537_v36  ;;  %v3612_v35 = vld [vmem:[#allocation4 + $0xf8] ss:$24 sps:$4 sm:$0xff]   ;;  %v3642_v8 = vld [vmem:[#allocation4 + $0x1e8] ss:$24 sps:$4 sm:$0xff]   ;;  %v3650_v10 = vld [vmem:[#allocation4 + $0x21c] ss:$24 sps:$4 sm:$0xff]  }
  0x5a   :  { %1924 = vmatprep.subr.bf16.mxu0 %v3539_v37  ;;  %v72_v36 = vld [vmem:[#allocation2 + $0x78] sm:$0xff]  ;;  %v78_v37 = vld [vmem:[#allocation2 + $0xa8] sm:$0xff] }
  0x5c   :  { %1872 = vmatpush1.bf16.msra.mxu1 %v3541_v38  ;;  %v70_v38 = vld [vmem:[#allocation2 + $0x68] sm:$0xff] }
  0x5d   :  { %1925 = vmatpush1.bf16.msra.mxu0 %v3542_v39  ;;  %1873 = vmatprep.subr.bf16.mxu1 %v3543_v40  ;;  %v76_v39 = vld [vmem:[#allocation2 + $0x98] sm:$0xff]  ;;  %v4121_v40 = vpack.c.bf16 %v78_v37, %v72_v36  ;;  %v3678_v36 = vld [vmem:[#allocation4 + $0x10] ss:$24 sps:$4 sm:$0xff]  }
  0x5e   :  { %1926 = vmatprep.subr.bf16.mxu0 %v3545_v41  ;;  %v4123_v41 = vpack.c.bf16 %v76_v39, %v70_v38  ;;  %v74_v38 = vld [vmem:[#allocation2 + $0x88] sm:$0xff]  ;;  %v80_v39 = vld [vmem:[#allocation2 + $0xb8] sm:$0xff] }
  0x60   :  { %1874 = vmatpush1.bf16.msra.mxu1 %v3547_v42  ;;  %v71_v42 = vld [vmem:[#allocation2 + $0x70] sm:$0xff] }
  0x61   :  { %1927 = vmatpush1.bf16.msra.mxu0 %v3548_v43  ;;  %1875 = vmatprep.subr.bf16.mxu1 %v3549_v44  ;;  %v77_v43 = vld [vmem:[#allocation2 + $0xa0] sm:$0xff] }
  0x62   :  { %1928 = vmatprep.subr.bf16.mxu0 %v3551_v45  ;;  %v3617_v44 = vld [vmem:[#allocation4 + $0x724] ss:$24 sps:$4 sm:$0xff]  }
  0x63   :  { %v3620_v45 = vld [vmem:[#allocation4 + $0x12c] ss:$24 sps:$4 sm:$0xff]  }
  0x64   :  { %1876 = vmatpush1.bf16.msra.mxu1 %v3553_v46  ;;  %v4125_v46 = vpack.c.bf16 %v77_v43, %v71_v42  ;;  %v3683_v42 = vld [vmem:[#allocation4 + $0x33c] ss:$24 sps:$4 sm:$0xff]  }
  0x65   :  { %1929 = vmatpush1.bf16.msra.mxu0 %v3554_v47  ;;  %1877 = vmatprep.subr.bf16.mxu1 %v3555_v52  ;;  %v3615_v47 = vld [vmem:[#allocation4 + $0x720] ss:$24 sps:$4 sm:$0xff]   ;;  %v4130_v52 = vpack.c.bf16 %v75_v50, %v69_v49  ;;  %v3686_v43 = vld [vmem:[#allocation4 + $0x44] ss:$24 sps:$4 sm:$0xff]   ;;  %v79_v49 = vld [vmem:[#allocation2 + $0xb0] sm:$0xff] }
  0x66   :  { %1930 = vmatprep.subr.bf16.mxu0 %v3557_v55  ;;  %v3626_v55 = vld [vmem:[#allocation4 + $0x15c] ss:$24 sps:$4 sm:$0xff]   ;;  %v3689_v50 = vld [vmem:[#allocation4 + $0x36c] ss:$24 sps:$4 sm:$0xff]  }
  0x68   :  { %1878 = vmatpush1.bf16.msra.mxu1 %v3559_v56  ;;  %v62_v56 = vld [vmem:[#allocation2 + $0x28] sm:$0xff] }
  0x69   :  { %1931 = vmatpush1.bf16.msra.mxu0 %v3560_v57  ;;  %1879 = vmatprep.subr.bf16.mxu1 %v3561_v58  ;;  %v3621_v57 = vld [vmem:[#allocation4 + $0x750] ss:$24 sps:$4 sm:$0xff]  }
  0x6a   :  { %1932 = vmatprep.subr.bf16.mxu0 %v3563_v59  ;;  %v3624_v58 = vld [vmem:[#allocation4 + $0x158] ss:$24 sps:$4 sm:$0xff]  }
  0x6b   :  { %v68_v59 = vld [vmem:[#allocation2 + $0x58] sm:$0xff] }
  0x6c   :  { %1880 = vmatpush1.bf16.msra.mxu1 %v3565_v60  ;;  %v3629_v60 = vld [vmem:[#allocation4 + $0x784] ss:$24 sps:$4 sm:$0xff]  }
  0x6d   :  { %1933 = vmatpush1.bf16.msra.mxu0 %v3566_v61  ;;  %1881 = vmatprep.subr.bf16.mxu1 %v3567_v62  ;;  %v4134_v61 = vpack.c.bf16 %v68_v59, %v62_v56  ;;  %v3632_v62 = vld [vmem:[#allocation4 + $0x18c] ss:$24 sps:$4 sm:$0xff]   ;;  %v3687_v56 = vld [vmem:[#allocation4 + $0x368] ss:$24 sps:$4 sm:$0xff]  }
  0x6e   :  { %1934 = vmatprep.subr.bf16.mxu0 %v3569_v63  ;;  %v3627_v63 = vld [vmem:[#allocation4 + $0x780] ss:$24 sps:$4 sm:$0xff]   ;;  %v3698_v59 = vld [vmem:[#allocation4 + $0xa4] ss:$24 sps:$4 sm:$0xff]  }
  0x70   :  { %1882 = vmatpush1.bf16.msra.mxu1 %v3571_v0  ;;  %v3630_v0 = vld [vmem:[#allocation4 + $0x188] ss:$24 sps:$4 sm:$0xff]  }
  0x71   :  { %1935 = vmatpush1.bf16.msra.mxu0 %v3572_v1  ;;  %1883 = vmatprep.subr.bf16.mxu1 %v3573_v2  ;;  %v3635_v1 = vld [vmem:[#allocation4 + $0x7b4] ss:$24 sps:$4 sm:$0xff]  }
  0x72   :  { %1936 = vmatprep.subr.bf16.mxu0 %v3575_v3  ;;  %v3638_v2 = vld [vmem:[#allocation4 + $0x1bc] ss:$24 sps:$4 sm:$0xff]   ;;  %v3633_v3 = vld [vmem:[#allocation4 + $0x7b0] ss:$24 sps:$4 sm:$0xff]  }
  0x74   :  { %1884 = vmatpush1.bf16.msra.mxu1 %v3577_v4  ;;  %v3636_v4 = vld [vmem:[#allocation4 + $0x1b8] ss:$24 sps:$4 sm:$0xff]  }
  0x75   :  { %1937 = vmatpush1.bf16.msra.mxu0 %v3578_v5  ;;  %2012 = vmatprep.subr.bf16.mxu1 %v3584_v11  ;;  %v3641_v5 = vld [vmem:[#allocation4 + $0x7e4] ss:$24 sps:$4 sm:$0xff]   ;;  %v3645_v11 = vld [vmem:[#allocation4 + $0x810] ss:$24 sps:$4 sm:$0xff]  }
  0x76   :  { %1959 = vmatprep.subr.bf16.mxu0 %v3581_v7  ;;  %v3639_v7 = vld [vmem:[#allocation4 + $0x7e0] ss:$24 sps:$4 sm:$0xff]  }
  0x77   :  { %1886 = vmatmul.mubr.bf16.vlgmr.msra.gmra.mrb[0].mxu1 %v4115_v14 }
  0x78   :  { %1939 = vmatmul.mubr.bf16.vlgmr.msra.gmra.mrb[0].mxu0 %v4117_v15  ;;  %2013 = vmatpush1.bf16.msra.mxu1 %v3582_v13  ;;  %v3653_v13 = vld [vmem:[#allocation4 + $0x844] ss:$24 sps:$4 sm:$0xff]  }
  0x79   :  { %1960 = vmatpush1.bf16.msra.mxu0 %v3579_v12  ;;  %2014 = vmatprep.subr.bf16.mxu1 %v3590_v17  ;;  %v3648_v12 = vld [vmem:[#allocation4 + $0x218] ss:$24 sps:$4 sm:$0xff]  }
  0x7a   :  { %1961 = vmatprep.subr.bf16.mxu0 %v3587_v16  ;;  %1948 = vmatprep.mubr.bf16.mxu0 %v4121_v40  ;;  %v3656_v16 = vld [vmem:[#allocation4 + $0x24c] ss:$24 sps:$4 sm:$0xff]   ;;  %v3651_v17 = vld [vmem:[#allocation4 + $0x840] ss:$24 sps:$4 sm:$0xff]  }
  0x7b   :  { %1895 = vmatprep.mubr.bf16.mxu1 %v4123_v41 }
  0x7c   :  { %2015 = vmatpush1.bf16.msra.mxu1 %v3588_v19  ;;  %v3659_v19 = vld [vmem:[#allocation4 + $0x874] ss:$24 sps:$4 sm:$0xff]  }
  0x7d   :  { %1962 = vmatpush1.bf16.msra.mxu0 %v3585_v18  ;;  %2016 = vmatprep.subr.bf16.mxu1 %v3596_v21  ;;  %v3654_v18 = vld [vmem:[#allocation4 + $0x248] ss:$24 sps:$4 sm:$0xff]  }
  0x7e   :  { %1963 = vmatprep.subr.bf16.mxu0 %v3593_v20  ;;  %v3662_v20 = vld [vmem:[#allocation4 + $0x27c] ss:$24 sps:$4 sm:$0xff]   ;;  %v3657_v21 = vld [vmem:[#allocation4 + $0x870] ss:$24 sps:$4 sm:$0xff]  }
  0x7f   :  { %1896 = vmatmul.mubr.bf16.gmra.mrb[4].mxu1 %v4130_v52 }
  0x80   :  { %2017 = vmatpush1.bf16.msra.mxu1 %v3594_v23  ;;  %1949 = vmatmul.mubr.bf16.gmra.mrb[4].mxu0 %v4125_v46  ;;  %v3665_v23 = vld [vmem:[#allocation4 + $0x8a4] ss:$24 sps:$4 sm:$0xff]  }
  0x81   :  { %1964 = vmatpush1.bf16.msra.mxu0 %v3591_v22  ;;  %2018 = vmatprep.subr.bf16.mxu1 %v3602_v25  ;;  %v3660_v22 = vld [vmem:[#allocation4 + $0x278] ss:$24 sps:$4 sm:$0xff]  }
  0x82   :  { %1965 = vmatprep.subr.bf16.mxu0 %v3599_v24  ;;  %2044 = vmatprep.mubr.bf16.mxu1 %v4109_v53  ;;  %v3668_v24 = vld [vmem:[#allocation4 + $0x2ac] ss:$24 sps:$4 sm:$0xff]   ;;  %v3663_v25 = vld [vmem:[#allocation4 + $0x8a0] ss:$24 sps:$4 sm:$0xff]  }
  0x83   :  { %1991 = vmatprep.mubr.bf16.mxu0 %v4134_v61 }
  0x84   :  { %2019 = vmatpush1.bf16.msra.mxu1 %v3600_v27  ;;  %v3671_v27 = vld [vmem:[#allocation4 + $0x8d4] ss:$24 sps:$4 sm:$0xff]  }
  0x85   :  { %1966 = vmatpush1.bf16.msra.mxu0 %v3597_v26  ;;  %2020 = vmatprep.subr.bf16.mxu1 %v3608_v29  ;;  %v3666_v26 = vld [vmem:[#allocation4 + $0x2a8] ss:$24 sps:$4 sm:$0xff]  }
  0x86   :  { %1967 = vmatprep.subr.bf16.mxu0 %v3605_v28  ;;  %v3674_v28 = vld [vmem:[#allocation4 + $0x2dc] ss:$24 sps:$4 sm:$0xff]   ;;  %v3669_v29 = vld [vmem:[#allocation4 + $0x8d0] ss:$24 sps:$4 sm:$0xff]  }
  0x88   :  { %2021 = vmatpush1.bf16.msra.mxu1 %v3606_v31  ;;  %v61_v31 = vld [vmem:[#allocation2 + $0x20] sm:$0xff] }
  0x89   :  { %1968 = vmatpush1.bf16.msra.mxu0 %v3603_v30  ;;  %2022 = vmatprep.subr.bf16.mxu1 %v3614_v33  ;;  %v3672_v30 = vld [vmem:[#allocation4 + $0x2d8] ss:$24 sps:$4 sm:$0xff]   ;;  %v3677_v33 = vld [vmem:[#allocation4 + $0x30c] ss:$24 sps:$4 sm:$0xff]  }
  0x8a   :  { %1969 = vmatprep.subr.bf16.mxu0 %v3611_v32  ;;  %v67_v32 = vld [vmem:[#allocation2 + $0x50] sm:$0xff] }
  0x8b   :  { %v4137_v37 = vpack.c.bf16 %v67_v32, %v61_v31  ;;  %v3744_v31 = vld [vmem:[#allocation4 + $0x220] ss:$24 sps:$4 sm:$0xff]   ;;  %v3749_v32 = vld [vmem:[#allocation4 + $0x54c] ss:$24 sps:$4 sm:$0xff]  }
  0x8c   :  { %2023 = vmatpush1.bf16.msra.mxu1 %v3612_v35  ;;  %v3675_v35 = vld [vmem:[#allocation4 + $0x308] ss:$24 sps:$4 sm:$0xff]  }
  0x8d   :  { %1970 = vmatpush1.bf16.msra.mxu0 %v3609_v34  ;;  %2024 = vmatprep.subr.bf16.mxu1 %v3620_v45  ;;  %v3680_v34 = vld [vmem:[#allocation4 + $0x14] ss:$24 sps:$4 sm:$0xff]   ;;  %v3684_v45 = vld [vmem:[#allocation4 + $0x40] ss:$24 sps:$4 sm:$0xff]  }
  0x8e   :  { %1971 = vmatprep.subr.bf16.mxu0 %v3617_v44  ;;  %v3681_v44 = vld [vmem:[#allocation4 + $0x338] ss:$24 sps:$4 sm:$0xff]  }
  0x90   :  { %2025 = vmatpush1.bf16.msra.mxu1 %v3618_v48  ;;  %v73_v48 = vld [vmem:[#allocation2 + $0x80] sm:$0xff] }
  0x91   :  { %1972 = vmatpush1.bf16.msra.mxu0 %v3615_v47  ;;  %2026 = vmatprep.subr.bf16.mxu1 %v3626_v55  ;;  %v4139_v47 = vpack.c.bf16 %v80_v39, %v74_v38  ;;  %v4145_v55 = vpack.c.bf16 %v79_v49, %v73_v48  ;;  %v3758_v38 = vld [vmem:[#allocation4 + $0x284] ss:$24 sps:$4 sm:$0xff]   ;;  %v3753_v39 = vld [vmem:[#allocation4 + $0x578] ss:$24 sps:$4 sm:$0xff]  }
  0x92   :  { %1973 = vmatprep.subr.bf16.mxu0 %v3623_v51  ;;  %v3692_v51 = vld [vmem:[#allocation4 + $0x74] ss:$24 sps:$4 sm:$0xff]   ;;  %v3762_v48 = vld [vmem:[#allocation4 + $0x2b0] ss:$24 sps:$4 sm:$0xff]  }
  0x93   :  { %v3767_v49 = vld [vmem:[#allocation4 + $0x5dc] ss:$24 sps:$4 sm:$0xff]  }
  0x94   :  { %2027 = vmatpush1.bf16.msra.mxu1 %v3624_v58  ;;  %v3695_v58 = vld [vmem:[#allocation4 + $0x39c] ss:$24 sps:$4 sm:$0xff]  }
  0x95   :  { %1974 = vmatpush1.bf16.msra.mxu0 %v3621_v57  ;;  %2028 = vmatprep.subr.bf16.mxu1 %v3632_v62  ;;  %v3690_v57 = vld [vmem:[#allocation4 + $0x70] ss:$24 sps:$4 sm:$0xff]   ;;  %v3696_v62 = vld [vmem:[#allocation4 + $0xa0] ss:$24 sps:$4 sm:$0xff]  }
  0x96   :  { %1975 = vmatprep.subr.bf16.mxu0 %v3629_v60  ;;  %v3693_v60 = vld [vmem:[#allocation4 + $0x398] ss:$24 sps:$4 sm:$0xff]  }
  0x98   :  { %2029 = vmatpush1.bf16.msra.mxu1 %v3630_v0  ;;  %v3704_v0 = vld [vmem:[#allocation4 + $0xd4] ss:$24 sps:$4 sm:$0xff]  }
  0x99   :  { %1976 = vmatpush1.bf16.msra.mxu0 %v3627_v63  ;;  %2030 = vmatprep.subr.bf16.mxu1 %v3638_v2  ;;  %v3701_v63 = vld [vmem:[#allocation4 + $0x3cc] ss:$24 sps:$4 sm:$0xff]   ;;  %v3702_v2 = vld [vmem:[#allocation4 + $0xd0] ss:$24 sps:$4 sm:$0xff]  }
  0x9a   :  { %1977 = vmatprep.subr.bf16.mxu0 %v3635_v1  ;;  %v3699_v1 = vld [vmem:[#allocation4 + $0x3c8] ss:$24 sps:$4 sm:$0xff]  }
  0x9c   :  { %2031 = vmatpush1.bf16.msra.mxu1 %v3636_v4  ;;  %v3710_v4 = vld [vmem:[#allocation4 + $0x104] ss:$24 sps:$4 sm:$0xff]  }
  0x9d   :  { %1978 = vmatpush1.bf16.msra.mxu0 %v3633_v3  ;;  %2032 = vmatprep.subr.bf16.mxu1 %v3644_v6  ;;  %v3707_v3 = vld [vmem:[#allocation4 + $0x3fc] ss:$24 sps:$4 sm:$0xff]   ;;  %v3708_v6 = vld [vmem:[#allocation4 + $0x100] ss:$24 sps:$4 sm:$0xff]  }
  0x9e   :  { %1979 = vmatprep.subr.bf16.mxu0 %v3641_v5  ;;  %v3705_v5 = vld [vmem:[#allocation4 + $0x3f8] ss:$24 sps:$4 sm:$0xff]  }
  0xa0   :  { %2033 = vmatpush1.bf16.msra.mxu1 %v3642_v8  ;;  %v3716_v8 = vld [vmem:[#allocation4 + $0x134] ss:$24 sps:$4 sm:$0xff]  }
  0xa1   :  { %1980 = vmatpush1.bf16.msra.mxu0 %v3639_v7  ;;  %2034 = vmatprep.subr.bf16.mxu1 %v3650_v10  ;;  %v3713_v7 = vld [vmem:[#allocation4 + $0x42c] ss:$24 sps:$4 sm:$0xff]   ;;  %v3714_v10 = vld [vmem:[#allocation4 + $0x130] ss:$24 sps:$4 sm:$0xff]  }
  0xa2   :  { %1981 = vmatprep.subr.bf16.mxu0 %v3647_v9  ;;  %v3711_v9 = vld [vmem:[#allocation4 + $0x428] ss:$24 sps:$4 sm:$0xff]  }
  0xa4   :  { %2035 = vmatpush1.bf16.msra.mxu1 %v3648_v12  ;;  %v3717_v12 = vld [vmem:[#allocation4 + $0x458] ss:$24 sps:$4 sm:$0xff]  }
  0xa5   :  { %1982 = vmatpush1.bf16.msra.mxu0 %v3645_v11  ;;  %2036 = vmatprep.subr.bf16.mxu1 %v3656_v16  ;;  %v3722_v11 = vld [vmem:[#allocation4 + $0x164] ss:$24 sps:$4 sm:$0xff]  }
  0xa6   :  { %1983 = vmatprep.subr.bf16.mxu0 %v3653_v13  ;;  %v3720_v13 = vld [vmem:[#allocation4 + $0x160] ss:$24 sps:$4 sm:$0xff]   ;;  %v3725_v16 = vld [vmem:[#allocation4 + $0x48c] ss:$24 sps:$4 sm:$0xff]  }
  0xa8   :  { %2037 = vmatpush1.bf16.msra.mxu1 %v3654_v18  ;;  %v3723_v18 = vld [vmem:[#allocation4 + $0x488] ss:$24 sps:$4 sm:$0xff]  }
  0xa9   :  { %1984 = vmatpush1.bf16.msra.mxu0 %v3651_v17  ;;  %2038 = vmatprep.subr.bf16.mxu1 %v3662_v20  ;;  %v3728_v17 = vld [vmem:[#allocation4 + $0x194] ss:$24 sps:$4 sm:$0xff]  }
  0xaa   :  { %1985 = vmatprep.subr.bf16.mxu0 %v3659_v19  ;;  %v3726_v19 = vld [vmem:[#allocation4 + $0x190] ss:$24 sps:$4 sm:$0xff]   ;;  %v3731_v20 = vld [vmem:[#allocation4 + $0x4bc] ss:$24 sps:$4 sm:$0xff]  }
  0xac   :  { %2039 = vmatpush1.bf16.msra.mxu1 %v3660_v22  ;;  %v3729_v22 = vld [vmem:[#allocation4 + $0x4b8] ss:$24 sps:$4 sm:$0xff]  }
  0xad   :  { %1986 = vmatpush1.bf16.msra.mxu0 %v3657_v21  ;;  %2040 = vmatprep.subr.bf16.mxu1 %v3668_v24  ;;  %v3734_v21 = vld [vmem:[#allocation4 + $0x1c4] ss:$24 sps:$4 sm:$0xff]  }
  0xae   :  { %1987 = vmatprep.subr.bf16.mxu0 %v3665_v23  ;;  %v3732_v23 = vld [vmem:[#allocation4 + $0x1c0] ss:$24 sps:$4 sm:$0xff]   ;;  %v3737_v24 = vld [vmem:[#allocation4 + $0x4ec] ss:$24 sps:$4 sm:$0xff]  }
  0xb0   :  { %2041 = vmatpush1.bf16.msra.mxu1 %v3666_v26  ;;  %v3735_v26 = vld [vmem:[#allocation4 + $0x4e8] ss:$24 sps:$4 sm:$0xff]  }
  0xb1   :  { %1988 = vmatpush1.bf16.msra.mxu0 %v3663_v25  ;;  %2042 = vmatprep.subr.bf16.mxu1 %v3674_v28  ;;  %v3740_v25 = vld [vmem:[#allocation4 + $0x1f4] ss:$24 sps:$4 sm:$0xff]  }
  0xb2   :  { %1989 = vmatprep.subr.bf16.mxu0 %v3671_v27  ;;  %v3738_v27 = vld [vmem:[#allocation4 + $0x1f0] ss:$24 sps:$4 sm:$0xff]   ;;  %v3743_v28 = vld [vmem:[#allocation4 + $0x51c] ss:$24 sps:$4 sm:$0xff]  }
  0xb4   :  { %2043 = vmatpush1.bf16.msra.mxu1 %v3672_v30  ;;  %v3741_v30 = vld [vmem:[#allocation4 + $0x518] ss:$24 sps:$4 sm:$0xff]  }
  0xb5   :  { %1990 = vmatpush1.bf16.msra.mxu0 %v3669_v29  ;;  %2065 = vmatprep.subr.bf16.mxu1 %v3677_v33  ;;  %v3746_v29 = vld [vmem:[#allocation4 + $0x224] ss:$24 sps:$4 sm:$0xff]   ;;  %v3752_v33 = vld [vmem:[#allocation4 + $0x254] ss:$24 sps:$4 sm:$0xff]  }
  0xb6   :  { %2171 = vmatprep.subr.bf16.mxu0 %v3680_v34  ;;  %v3747_v34 = vld [vmem:[#allocation4 + $0x548] ss:$24 sps:$4 sm:$0xff]  }
  0xb7   :  { %2045 = vmatmul.mubr.bf16.vlgmr.msra.gmra.mrb[8].mxu1 %v4115_v14 }
  0xb8   :  { %1992 = vmatmul.mubr.bf16.vlgmr.msra.gmra.mrb[0].mxu0 %v4137_v37  ;;  %2066 = vmatpush1.bf16.msra.mxu1 %v3675_v35  ;;  %v3750_v35 = vld [vmem:[#allocation4 + $0x250] ss:$24 sps:$4 sm:$0xff]  }
  0xb9   :  { %2172 = vmatpush1.bf16.msra.mxu0 %v3678_v36  ;;  %2067 = vmatprep.subr.bf16.mxu1 %v3683_v42  ;;  %v3755_v36 = vld [vmem:[#allocation4 + $0x57c] ss:$24 sps:$4 sm:$0xff]   ;;  %v3756_v42 = vld [vmem:[#allocation4 + $0x280] ss:$24 sps:$4 sm:$0xff]  }
  0xba   :  { %2173 = vmatprep.subr.bf16.mxu0 %v3686_v43  ;;  %2001 = vmatprep.mubr.bf16.mxu0 %v4139_v47  ;;  %v3761_v43 = vld [vmem:[#allocation4 + $0x5ac] ss:$24 sps:$4 sm:$0xff]  }
  0xbb   :  { %2054 = vmatprep.mubr.bf16.mxu1 %v4123_v41 }
  0xbc   :  { %2068 = vmatpush1.bf16.msra.mxu1 %v3681_v44  ;;  %v3764_v44 = vld [vmem:[#allocation4 + $0x2b4] ss:$24 sps:$4 sm:$0xff]  }
  0xbd   :  { %2174 = vmatpush1.bf16.msra.mxu0 %v3684_v45  ;;  %2069 = vmatprep.subr.bf16.mxu1 %v3689_v50  ;;  %v3759_v45 = vld [vmem:[#allocation4 + $0x5a8] ss:$24 sps:$4 sm:$0xff]   ;;  %v3770_v50 = vld [vmem:[#allocation4 + $0x2e4] ss:$24 sps:$4 sm:$0xff]  }
  0xbe   :  { %2175 = vmatprep.subr.bf16.mxu0 %v3692_v51  ;;  %v3765_v51 = vld [vmem:[#allocation4 + $0x5d8] ss:$24 sps:$4 sm:$0xff]  }
  0xbf   :  { %2055 = vmatmul.mubr.bf16.gmra.mrb[12].mxu1 %v4130_v52 }
  0xc0   :  { %2002 = vmatmul.mubr.bf16.gmra.mrb[4].mxu0 %v4145_v55  ;;  %2070 = vmatpush1.bf16.msra.mxu1 %v3687_v56  ;;  %v3768_v56 = vld [vmem:[#allocation4 + $0x2e0] ss:$24 sps:$4 sm:$0xff]  }
  0xc1   :  { %2176 = vmatpush1.bf16.msra.mxu0 %v3690_v57  ;;  %2071 = vmatprep.subr.bf16.mxu1 %v3695_v58  ;;  %v3773_v57 = vld [vmem:[#allocation4 + $0x60c] ss:$24 sps:$4 sm:$0xff]  }
  0xc2   :  { %2177 = vmatprep.subr.bf16.mxu0 %v3698_v59  ;;  %2097 = vmatprep.mubr.bf16.mxu1 %v4111_v54  ;;  %v3776_v58 = vld [vmem:[#allocation4 + $0x314] ss:$24 sps:$4 sm:$0xff]   ;;  %v3771_v59 = vld [vmem:[#allocation4 + $0x608] ss:$24 sps:$4 sm:$0xff]  }
  0xc3   :  { %2203 = vmatprep.mubr.bf16.mxu0 %v4109_v53  ;;  %v3719_v53 = vld [vmem:[#allocation4 + $0x45c] ss:$24 sps:$4 sm:$0xff]  }
  0xc4   :  { %2072 = vmatpush1.bf16.msra.mxu1 %v3693_v60  ;;  %v3774_v60 = vld [vmem:[#allocation4 + $0x310] ss:$24 sps:$4 sm:$0xff]  }
  0xc5   :  { %2178 = vmatpush1.bf16.msra.mxu0 %v3696_v62  ;;  %2073 = vmatprep.subr.bf16.mxu1 %v3701_v63  ;;  %v3779_v62 = vld [vmem:[#allocation4 + $0x63c] ss:$24 sps:$4 sm:$0xff]  }
  0xc6   :  { %2179 = vmatprep.subr.bf16.mxu0 %v3704_v0  ;;  %v3782_v63 = vld [vmem:[#allocation4 + $0x344] ss:$24 sps:$4 sm:$0xff]   ;;  %v3777_v0 = vld [vmem:[#allocation4 + $0x638] ss:$24 sps:$4 sm:$0xff]  }
  0xc8   :  { %2074 = vmatpush1.bf16.msra.mxu1 %v3699_v1  ;;  %v3780_v1 = vld [vmem:[#allocation4 + $0x340] ss:$24 sps:$4 sm:$0xff]  }
  0xc9   :  { %2180 = vmatpush1.bf16.msra.mxu0 %v3702_v2  ;;  %2075 = vmatprep.subr.bf16.mxu1 %v3707_v3  ;;  %v3785_v2 = vld [vmem:[#allocation4 + $0x66c] ss:$24 sps:$4 sm:$0xff]  }
  0xca   :  { %2181 = vmatprep.subr.bf16.mxu0 %v3710_v4  ;;  %v3788_v3 = vld [vmem:[#allocation4 + $0x374] ss:$24 sps:$4 sm:$0xff]   ;;  %v3783_v4 = vld [vmem:[#allocation4 + $0x668] ss:$24 sps:$4 sm:$0xff]  }
  0xcc   :  { %2076 = vmatpush1.bf16.msra.mxu1 %v3705_v5  ;;  %v3786_v5 = vld [vmem:[#allocation4 + $0x370] ss:$24 sps:$4 sm:$0xff]  }
  0xcd   :  { %2182 = vmatpush1.bf16.msra.mxu0 %v3708_v6  ;;  %2077 = vmatprep.subr.bf16.mxu1 %v3713_v7  ;;  %v3791_v6 = vld [vmem:[#allocation4 + $0x69c] ss:$24 sps:$4 sm:$0xff]  }
  0xce   :  { %2183 = vmatprep.subr.bf16.mxu0 %v3716_v8  ;;  %v3794_v7 = vld [vmem:[#allocation4 + $0x3a4] ss:$24 sps:$4 sm:$0xff]   ;;  %v3792_v8 = vld [vmem:[#allocation4 + $0x3a0] ss:$24 sps:$4 sm:$0xff]  }
  0xd0   :  { %2078 = vmatpush1.bf16.msra.mxu1 %v3711_v9  ;;  %v3797_v9 = vld [vmem:[#allocation4 + $0x6cc] ss:$24 sps:$4 sm:$0xff]  }
  0xd1   :  { %2184 = vmatpush1.bf16.msra.mxu0 %v3714_v10  ;;  %2079 = vmatprep.subr.bf16.mxu1 %v3719_v53  ;;  %v3800_v10 = vld [vmem:[#allocation4 + $0x3d4] ss:$24 sps:$4 sm:$0xff]   ;;  %v3795_v53 = vld [vmem:[#allocation4 + $0x6c8] ss:$24 sps:$4 sm:$0xff]  }
  0xd2   :  { %2185 = vmatprep.subr.bf16.mxu0 %v3722_v11  ;;  %v3803_v11 = vld [vmem:[#allocation4 + $0x6fc] ss:$24 sps:$4 sm:$0xff]  }
  0xd4   :  { %2080 = vmatpush1.bf16.msra.mxu1 %v3717_v12  ;;  %v3806_v12 = vld [vmem:[#allocation4 + $0x404] ss:$24 sps:$4 sm:$0xff]  }
  0xd5   :  { %2186 = vmatpush1.bf16.msra.mxu0 %v3720_v13  ;;  %2081 = vmatprep.subr.bf16.mxu1 %v3725_v16  ;;  %v3801_v13 = vld [vmem:[#allocation4 + $0x6f8] ss:$24 sps:$4 sm:$0xff]  }
  0xd6   :  { %2187 = vmatprep.subr.bf16.mxu0 %v3728_v17  ;;  %v3804_v16 = vld [vmem:[#allocation4 + $0x400] ss:$24 sps:$4 sm:$0xff]   ;;  %v3812_v17 = vld [vmem:[#allocation4 + $0x434] ss:$24 sps:$4 sm:$0xff]  }
  0xd8   :  { %2082 = vmatpush1.bf16.msra.mxu1 %v3723_v18  ;;  %v3807_v18 = vld [vmem:[#allocation4 + $0x728] ss:$24 sps:$4 sm:$0xff]  }
  0xd9   :  { %2188 = vmatpush1.bf16.msra.mxu0 %v3726_v19  ;;  %2083 = vmatprep.subr.bf16.mxu1 %v3731_v20  ;;  %v3810_v19 = vld [vmem:[#allocation4 + $0x430] ss:$24 sps:$4 sm:$0xff]   ;;  %v3815_v20 = vld [vmem:[#allocation4 + $0x75c] ss:$24 sps:$4 sm:$0xff]  }
  0xda   :  { %2189 = vmatprep.subr.bf16.mxu0 %v3734_v21  ;;  %v3818_v21 = vld [vmem:[#allocation4 + $0x464] ss:$24 sps:$4 sm:$0xff]  }
  0xdc   :  { %2084 = vmatpush1.bf16.msra.mxu1 %v3729_v22  ;;  %v3816_v22 = vld [vmem:[#allocation4 + $0x460] ss:$24 sps:$4 sm:$0xff]  }
  0xdd   :  { %2190 = vmatpush1.bf16.msra.mxu0 %v3732_v23  ;;  %2085 = vmatprep.subr.bf16.mxu1 %v3737_v24  ;;  %v3821_v23 = vld [vmem:[#allocation4 + $0x78c] ss:$24 sps:$4 sm:$0xff]  }
  0xde   :  { %2191 = vmatprep.subr.bf16.mxu0 %v3740_v25  ;;  %v3824_v24 = vld [vmem:[#allocation4 + $0x494] ss:$24 sps:$4 sm:$0xff]   ;;  %v3819_v25 = vld [vmem:[#allocation4 + $0x788] ss:$24 sps:$4 sm:$0xff]  }
  0xe0   :  { %2086 = vmatpush1.bf16.msra.mxu1 %v3735_v26  ;;  %v3822_v26 = vld [vmem:[#allocation4 + $0x490] ss:$24 sps:$4 sm:$0xff]  }
  0xe1   :  { %2192 = vmatpush1.bf16.msra.mxu0 %v3738_v27  ;;  %2087 = vmatprep.subr.bf16.mxu1 %v3743_v28  ;;  %v3827_v27 = vld [vmem:[#allocation4 + $0x7bc] ss:$24 sps:$4 sm:$0xff]  }
  0xe2   :  { %2193 = vmatprep.subr.bf16.mxu0 %v3746_v29  ;;  %v3830_v28 = vld [vmem:[#allocation4 + $0x4c4] ss:$24 sps:$4 sm:$0xff]   ;;  %v3825_v29 = vld [vmem:[#allocation4 + $0x7b8] ss:$24 sps:$4 sm:$0xff]  }
  0xe4   :  { %2088 = vmatpush1.bf16.msra.mxu1 %v3741_v30  ;;  %v3828_v30 = vld [vmem:[#allocation4 + $0x4c0] ss:$24 sps:$4 sm:$0xff]  }
  0xe5   :  { %2194 = vmatpush1.bf16.msra.mxu0 %v3744_v31  ;;  %2089 = vmatprep.subr.bf16.mxu1 %v3749_v32  ;;  %v3833_v31 = vld [vmem:[#allocation4 + $0x7ec] ss:$24 sps:$4 sm:$0xff]  }
  0xe6   :  { %2195 = vmatprep.subr.bf16.mxu0 %v3752_v33  ;;  %v3836_v32 = vld [vmem:[#allocation4 + $0x4f4] ss:$24 sps:$4 sm:$0xff]   ;;  %v3831_v33 = vld [vmem:[#allocation4 + $0x7e8] ss:$24 sps:$4 sm:$0xff]  }
  0xe8   :  { %2090 = vmatpush1.bf16.msra.mxu1 %v3747_v34  ;;  %v3834_v34 = vld [vmem:[#allocation4 + $0x4f0] ss:$24 sps:$4 sm:$0xff]  }
  0xe9   :  { %2196 = vmatpush1.bf16.msra.mxu0 %v3750_v35  ;;  %2091 = vmatprep.subr.bf16.mxu1 %v3755_v36  ;;  %v3839_v35 = vld [vmem:[#allocation4 + $0x81c] ss:$24 sps:$4 sm:$0xff]  }
  0xea   :  { %2197 = vmatprep.subr.bf16.mxu0 %v3758_v38  ;;  %v3842_v36 = vld [vmem:[#allocation4 + $0x524] ss:$24 sps:$4 sm:$0xff]   ;;  %v3837_v38 = vld [vmem:[#allocation4 + $0x818] ss:$24 sps:$4 sm:$0xff]  }
  0xec   :  { %2092 = vmatpush1.bf16.msra.mxu1 %v3753_v39  ;;  %v3840_v39 = vld [vmem:[#allocation4 + $0x520] ss:$24 sps:$4 sm:$0xff]  }
  0xed   :  { %2198 = vmatpush1.bf16.msra.mxu0 %v3756_v42  ;;  %2093 = vmatprep.subr.bf16.mxu1 %v3761_v43  ;;  %v3845_v42 = vld [vmem:[#allocation4 + $0x84c] ss:$24 sps:$4 sm:$0xff]  }
  0xee   :  { %2199 = vmatprep.subr.bf16.mxu0 %v3764_v44  ;;  %v3848_v43 = vld [vmem:[#allocation4 + $0x554] ss:$24 sps:$4 sm:$0xff]   ;;  %v3843_v44 = vld [vmem:[#allocation4 + $0x848] ss:$24 sps:$4 sm:$0xff]  }
  0xf0   :  { %2094 = vmatpush1.bf16.msra.mxu1 %v3759_v45  ;;  %v3846_v45 = vld [vmem:[#allocation4 + $0x550] ss:$24 sps:$4 sm:$0xff]  }
  0xf1   :  { %2200 = vmatpush1.bf16.msra.mxu0 %v3762_v48  ;;  %2095 = vmatprep.subr.bf16.mxu1 %v3767_v49  ;;  %v3851_v48 = vld [vmem:[#allocation4 + $0x87c] ss:$24 sps:$4 sm:$0xff]  }
  0xf2   :  { %2201 = vmatprep.subr.bf16.mxu0 %v3770_v50  ;;  %v3854_v49 = vld [vmem:[#allocation4 + $0x584] ss:$24 sps:$4 sm:$0xff]   ;;  %v3849_v50 = vld [vmem:[#allocation4 + $0x878] ss:$24 sps:$4 sm:$0xff]  }
  0xf4   :  { %2096 = vmatpush1.bf16.msra.mxu1 %v3765_v51  ;;  %v3852_v51 = vld [vmem:[#allocation4 + $0x580] ss:$24 sps:$4 sm:$0xff]  }
  0xf5   :  { %2202 = vmatpush1.bf16.msra.mxu0 %v3768_v56  ;;  %2118 = vmatprep.subr.bf16.mxu1 %v3773_v57  ;;  %v3857_v56 = vld [vmem:[#allocation4 + $0x8ac] ss:$24 sps:$4 sm:$0xff]  }
  0xf6   :  { %2224 = vmatprep.subr.bf16.mxu0 %v3776_v58  ;;  %v3860_v57 = vld [vmem:[#allocation4 + $0x5b4] ss:$24 sps:$4 sm:$0xff]   ;;  %v3855_v58 = vld [vmem:[#allocation4 + $0x8a8] ss:$24 sps:$4 sm:$0xff]  }
  0xf7   :  { %2098 = vmatmul.mubr.bf16.vlgmr.msra.gmra.mrb[8].mxu1 %v4117_v15 }
  0xf8   :  { %2204 = vmatmul.mubr.bf16.vlgmr.msra.gmra.mrb[8].mxu0 %v4115_v14  ;;  %2119 = vmatpush1.bf16.msra.mxu1 %v3771_v59  ;;  %v3789_v14 = vld [vmem:[#allocation4 + $0x698] ss:$24 sps:$4 sm:$0xff]  }
  0xf9   :  { %2225 = vmatpush1.bf16.msra.mxu0 %v3774_v60  ;;  %2120 = vmatprep.subr.bf16.mxu1 %v3779_v62  ;;  %v3858_v59 = vld [vmem:[#allocation4 + $0x5b0] ss:$24 sps:$4 sm:$0xff]   ;;  %v3863_v60 = vld [vmem:[#allocation4 + $0x8dc] ss:$24 sps:$4 sm:$0xff]  }
  0xfa   :  { %2226 = vmatprep.subr.bf16.mxu0 %v3782_v63  ;;  %2107 = vmatprep.mubr.bf16.mxu1 %v4121_v40  ;;  %v3866_v62 = vld [vmem:[#allocation4 + $0x5e4] ss:$24 sps:$4 sm:$0xff]   ;;  %v3861_v63 = vld [vmem:[#allocation4 + $0x8d8] ss:$24 sps:$4 sm:$0xff]  }
  0xfb   :  { %2213 = vmatprep.mubr.bf16.mxu0 %v4123_v41  ;;  %v3798_v41 = vld [vmem:[#allocation4 + $0x3d0] ss:$24 sps:$4 sm:$0xff]  }
  0xfc   :  { %2121 = vmatpush1.bf16.msra.mxu1 %v3777_v0  ;;  %v3864_v0 = vld [vmem:[#allocation4 + $0x5e0] ss:$24 sps:$4 sm:$0xff]  }
  0xfd   :  { %2227 = vmatpush1.bf16.msra.mxu0 %v3780_v1  ;;  %2122 = vmatprep.subr.bf16.mxu1 %v3785_v2  ;;  %v3869_v1 = vld [vmem:[#allocation4 + $0x614] ss:$24 sps:$4 sm:$0xff]   ;;  %v3867_v2 = vld [vmem:[#allocation4 + $0x610] ss:$24 sps:$4 sm:$0xff]  }
  0xfe   :  { %2228 = vmatprep.subr.bf16.mxu0 %v3788_v3  ;;  %v3872_v3 = vld [vmem:[#allocation4 + $0x644] ss:$24 sps:$4 sm:$0xff]  }
  0xff   :  { %2108 = vmatmul.mubr.bf16.gmra.mrb[12].mxu1 %v4125_v46 }
 0x100   :  { %2214 = vmatmul.mubr.bf16.gmra.mrb[12].mxu0 %v4130_v52  ;;  %2123 = vmatpush1.bf16.msra.mxu1 %v3783_v4  ;;  %v3809_v52 = vld [vmem:[#allocation4 + $0x72c] ss:$24 sps:$4 sm:$0xff]   ;;  %v3870_v4 = vld [vmem:[#allocation4 + $0x640] ss:$24 sps:$4 sm:$0xff]  }
 0x101   :  { %2229 = vmatpush1.bf16.msra.mxu0 %v3786_v5  ;;  %2124 = vmatprep.subr.bf16.mxu1 %v3791_v6  ;;  %v3875_v5 = vld [vmem:[#allocation4 + $0x674] ss:$24 sps:$4 sm:$0xff]   ;;  %v3873_v6 = vld [vmem:[#allocation4 + $0x670] ss:$24 sps:$4 sm:$0xff]  }
 0x102   :  { %2230 = vmatprep.subr.bf16.mxu0 %v3794_v7  ;;  %2150 = vmatprep.mubr.bf16.mxu1 %v4134_v61  ;;  %v3878_v7 = vld [vmem:[#allocation4 + $0x6a4] ss:$24 sps:$4 sm:$0xff]  }
 0x103   :  { %2256 = vmatprep.mubr.bf16.mxu0 %v4111_v54  ;;  %v3813_v54 = vld [vmem:[#allocation4 + $0x758] ss:$24 sps:$4 sm:$0xff]  }
 0x104   :  { %2125 = vmatpush1.bf16.msra.mxu1 %v3789_v14  ;;  %v3876_v14 = vld [vmem:[#allocation4 + $0x6a0] ss:$24 sps:$4 sm:$0xff]  }
 0x105   :  { %2231 = vmatpush1.bf16.msra.mxu0 %v3792_v8  ;;  %2126 = vmatprep.subr.bf16.mxu1 %v3797_v9  ;;  %v3879_v8 = vld [vmem:[#allocation4 + $0x6d0] ss:$24 sps:$4 sm:$0xff]   ;;  %v3884_v9 = vld [vmem:[#allocation4 + $0x704] ss:$24 sps:$4 sm:$0xff]  }
 0x106   :  { %2232 = vmatprep.subr.bf16.mxu0 %v3800_v10  ;;  %v3887_v10 = vld [vmem:[#allocation4 + $0x734] ss:$24 sps:$4 sm:$0xff]  }
 0x108   :  { %2127 = vmatpush1.bf16.msra.mxu1 %v3795_v53 }
 0x109   :  { %2233 = vmatpush1.bf16.msra.mxu0 %v3798_v41  ;;  %2128 = vmatprep.subr.bf16.mxu1 %v3803_v11  ;;  %v3885_v11 = vld [vmem:[#allocation4 + $0x730] ss:$24 sps:$4 sm:$0xff]  }
 0x10a   :  { %2234 = vmatprep.subr.bf16.mxu0 %v3806_v12 }
 0x10c   :  { %2129 = vmatpush1.bf16.msra.mxu1 %v3801_v13 }
 0x10d   :  { %2235 = vmatpush1.bf16.msra.mxu0 %v3804_v16  ;;  %2130 = vmatprep.subr.bf16.mxu1 %v3809_v52  ;;  %v3893_v16 = vld [vmem:[#allocation4 + $0x794] ss:$24 sps:$4 sm:$0xff]   ;;  %v3891_v52 = vld [vmem:[#allocation4 + $0x790] ss:$24 sps:$4 sm:$0xff]  }
 0x10e   :  { %2236 = vmatprep.subr.bf16.mxu0 %v3812_v17  ;;  %v3896_v17 = vld [vmem:[#allocation4 + $0x7c4] ss:$24 sps:$4 sm:$0xff]  }
 0x110   :  { %2131 = vmatpush1.bf16.msra.mxu1 %v3807_v18  ;;  %v3894_v18 = vld [vmem:[#allocation4 + $0x7c0] ss:$24 sps:$4 sm:$0xff]  }
 0x111   :  { %2237 = vmatpush1.bf16.msra.mxu0 %v3810_v19  ;;  %2132 = vmatprep.subr.bf16.mxu1 %v3815_v20  ;;  %v3899_v19 = vld [vmem:[#allocation4 + $0x7f4] ss:$24 sps:$4 sm:$0xff]   ;;  %v3897_v20 = vld [vmem:[#allocation4 + $0x7f0] ss:$24 sps:$4 sm:$0xff]  }
 0x112   :  { %2238 = vmatprep.subr.bf16.mxu0 %v3818_v21  ;;  %v3902_v21 = vld [vmem:[#allocation4 + $0x824] ss:$24 sps:$4 sm:$0xff]  }
 0x114   :  { %2133 = vmatpush1.bf16.msra.mxu1 %v3813_v54  ;;  %v3900_v54 = vld [vmem:[#allocation4 + $0x820] ss:$24 sps:$4 sm:$0xff]  }
 0x115   :  { %2239 = vmatpush1.bf16.msra.mxu0 %v3816_v22  ;;  %2134 = vmatprep.subr.bf16.mxu1 %v3821_v23  ;;  %v3905_v22 = vld [vmem:[#allocation4 + $0x854] ss:$24 sps:$4 sm:$0xff]  }
 0x116   :  { %2240 = vmatprep.subr.bf16.mxu0 %v3824_v24 }
 0x118   :  { %2135 = vmatpush1.bf16.msra.mxu1 %v3819_v25 }
 0x119   :  { %2241 = vmatpush1.bf16.msra.mxu0 %v3822_v26  ;;  %2136 = vmatprep.subr.bf16.mxu1 %v3827_v27  ;;  %v3903_v26 = vld [vmem:[#allocation4 + $0x850] ss:$24 sps:$4 sm:$0xff]  }
 0x11a   :  { %2242 = vmatprep.subr.bf16.mxu0 %v3830_v28  ;;  %v3908_v28 = vld [vmem:[#allocation4 + $0x884] ss:$24 sps:$4 sm:$0xff]  }
 0x11c   :  { %2137 = vmatpush1.bf16.msra.mxu1 %v3825_v29  ;;  %v3906_v29 = vld [vmem:[#allocation4 + $0x880] ss:$24 sps:$4 sm:$0xff]  }
 0x11d   :  { %2243 = vmatpush1.bf16.msra.mxu0 %v3828_v30  ;;  %2138 = vmatprep.subr.bf16.mxu1 %v3833_v31  ;;  %v3911_v30 = vld [vmem:[#allocation4 + $0x8b4] ss:$24 sps:$4 sm:$0xff]   ;;  %v3909_v31 = vld [vmem:[#allocation4 + $0x8b0] ss:$24 sps:$4 sm:$0xff]  }
 0x11e   :  { %2244 = vmatprep.subr.bf16.mxu0 %v3836_v32  ;;  %v3914_v32 = vld [vmem:[#allocation4 + $0x8e4] ss:$24 sps:$4 sm:$0xff]  }
 0x120   :  { %2139 = vmatpush1.bf16.msra.mxu1 %v3831_v33  ;;  %v3912_v33 = vld [vmem:[#allocation4 + $0x8e0] ss:$24 sps:$4 sm:$0xff]  }
 0x121   :  { %2245 = vmatpush1.bf16.msra.mxu0 %v3834_v34  ;;  %2140 = vmatprep.subr.bf16.mxu1 %v3839_v35  ;;  %v383_v34 = vlaneseq }
 0x122   :  { %2246 = vmatprep.subr.bf16.mxu0 %v3842_v36 }
 0x123   :  { %v4168_v35 = vshrl.u32 %v383_v34, 7 }
 0x124   :  { %2141 = vmatpush1.bf16.msra.mxu1 %v3837_v38  ;;  %v4172_v38 = vld [vmem:[#allocation6] sm:$0x3f] }
 0x125   :  { %2247 = vmatpush1.bf16.msra.mxu0 %v3840_v39  ;;  %2142 = vmatprep.subr.bf16.mxu1 %v3845_v42  ;;  %v385_v36 = vsub.s32 0, %v4168_v35  ;;  %v389_v39 = vsub.s32 1, %v4168_v35 }
 0x126   :  { %2248 = vmatprep.subr.bf16.mxu0 %v3848_v43 }
 0x127   :  { %v386_v42 = vrot.slane %v4172_v38, %v385_v36  ;;  %v390_v43 = vrot.slane %v4172_v38, %v389_v39 }
 0x128   :  { %2143 = vmatpush1.bf16.msra.mxu1 %v3843_v44 }
 0x129   :  { %2249 = vmatpush1.bf16.msra.mxu0 %v3846_v45  ;;  %2144 = vmatprep.subr.bf16.mxu1 %v3851_v48 }
 0x12a   :  { %2250 = vmatprep.subr.bf16.mxu0 %v3854_v49 }
 0x12c   :  { %2145 = vmatpush1.bf16.msra.mxu1 %v3849_v50 }
 0x12d   :  { %2251 = vmatpush1.bf16.msra.mxu0 %v3852_v51  ;;  %2146 = vmatprep.subr.bf16.mxu1 %v3857_v56 }
 0x12e   :  { %2252 = vmatprep.subr.bf16.mxu0 %v3860_v57 }
 0x130   :  { %2147 = vmatpush1.bf16.msra.mxu1 %v3855_v58 }
 0x131   :  { %2253 = vmatpush1.bf16.msra.mxu0 %v3858_v59  ;;  %2148 = vmatprep.subr.bf16.mxu1 %v3863_v60 }
 0x132   :  { %2254 = vmatprep.subr.bf16.mxu0 %v3866_v62 }
 0x134   :  { %2149 = vmatpush1.bf16.msra.mxu1 %v3861_v63 }
 0x135   :  { %2255 = vmatpush1.bf16.msra.mxu0 %v3864_v0 }
 0x136   :  { %2277 = vmatprep.subr.bf16.mxu0 %v3869_v1 }
 0x137   :  { %2151 = vmatmul.mubr.bf16.vlgmr.msra.gmra.mrb[8].mxu1 %v4137_v37 }
 0x138   :  { %2257 = vmatmul.mubr.bf16.vlgmr.msra.gmra.mrb[8].mxu0 %v4117_v15  ;;  %2160 = vmatprep.mubr.bf16.mxu1 %v4139_v47  ;;  %v3881_v15 = vld [vmem:[#allocation4 + $0x6d4] ss:$24 sps:$4 sm:$0xff]  }
 0x139   :  { %2278 = vmatpush1.bf16.msra.mxu0 %v3867_v2  ;;  %2266 = vmatprep.mubr.bf16.mxu0 %v4121_v40  ;;  %v3882_v40 = vld [vmem:[#allocation4 + $0x700] ss:$24 sps:$4 sm:$0xff]  }
 0x13a   :  { %2279 = vmatprep.subr.bf16.mxu0 %v3872_v3 }
 0x13d   :  { %2280 = vmatpush1.bf16.msra.mxu0 %v3870_v4 }
 0x13e   :  { %2281 = vmatprep.subr.bf16.mxu0 %v3875_v5 }
 0x13f   :  { %2161 = vmatmul.mubr.bf16.gmra.mrb[12].mxu1 %v4145_v55 }
 0x140   :  { %2267 = vmatmul.mubr.bf16.gmra.mrb[12].mxu0 %v4125_v46  ;;  %v3890_v46 = vld [vmem:[#allocation4 + $0x764] ss:$24 sps:$4 sm:$0xff]  }
 0x141   :  { %2282 = vmatpush1.bf16.msra.mxu0 %v3873_v6  ;;  %2309 = vmatprep.mubr.bf16.mxu0 %v4134_v61  ;;  %v3888_v61 = vld [vmem:[#allocation4 + $0x760] ss:$24 sps:$4 sm:$0xff]  }
 0x142   :  { %2283 = vmatprep.subr.bf16.mxu0 %v3878_v7 }
 0x145   :  { %2284 = vmatpush1.bf16.msra.mxu0 %v3876_v14  ;;  %v3915_v14 = vld [vmem:[%s4554_s3 + $0x40] sm:$0xff]  }
 0x146   :  { %2285 = vmatprep.subr.bf16.mxu0 %v3881_v15  ;;  %v3916_v15 = vld [vmem:[%s4554_s3] sm:$0xff]   ;;  %3304 = vmatprep.subr.bf16.mxu1 %v3915_v14 }
 0x147   :  { %3305 = vmatpush3.bf16.msra.mxu1 %v3916_v15 }
 0x149   :  { %2286 = vmatpush1.bf16.msra.mxu0 %v3879_v8  ;;  %v4202_v8 = vld [vmem:[%s4554_s3 + $0x140] sm:$0xff]  }
 0x14a   :  { %2287 = vmatprep.subr.bf16.mxu0 %v3884_v9  ;;  %v1887_v53 = vpop.f32.mrb[0].mxu1  ;;  %v4207_v9 = vld [vmem:[%s4554_s3 + $0x100] sm:$0xff]  }
 0x14b   :  { %v1889_v41 = vpop.f32.mrb[1].mxu1  ;;  %v1888_v44 = vadd.f32 %v1887_v53, %v386_v42  ;;  %v3920_v53 = vld [vmem:[%s4554_s3 + $0x8] sm:$0xff]  }
 0x14c   :  { %v1891_v12 = vpop.f32.mrb[2].mxu1  ;;  %v1890_v45 = vadd.f32 %v1889_v41, %v390_v43  ;;  %v4225_v41 = vld [vmem:[%s4554_s3 + $0x108] sm:$0xff]  }
 0x14d   :  { %2288 = vmatpush1.bf16.msra.mxu0 %v3882_v40  ;;  %v1893_v13 = vpop.f32.mrb[3].mxu1  ;;  %v1892_v48 = vadd.f32 %v1891_v12, %v386_v42  ;;  %v3919_v40 = vld [vmem:[%s4554_s3 + $0x48] sm:$0xff]   ;;  %v4234_v12 = vld [vmem:[%s4554_s3 + $0x150] sm:$0xff]  }
 0x14e   :  { %2289 = vmatprep.subr.bf16.mxu0 %v3887_v10  ;;  %v1894_v50 = vadd.f32 %v1893_v13, %v390_v43  ;;  %v4216_v10 = vld [vmem:[%s4554_s3 + $0x148] sm:$0xff]   ;;  %3306 = vmatprep.subr.bf16.mxu1 %v3919_v40  ;;  %v4243_v13 = vld [vmem:[%s4554_s3 + $0x110] sm:$0xff]  }
 0x14f   :  { %3307 = vmatpush3.bf16.msra.mxu1 %v3920_v53 }
 0x151   :  { %2290 = vmatpush1.bf16.msra.mxu0 %v3885_v11  ;;  %v3923_v11 = vld [vmem:[%s4554_s3 + $0x50] sm:$0xff]  }
 0x152   :  { %2291 = vmatprep.subr.bf16.mxu0 %v3890_v46  ;;  %v1897_v23 = vpop.f32.mrb[4].mxu1  ;;  %v3924_v46 = vld [vmem:[%s4554_s3 + $0x10] sm:$0xff]   ;;  %3308 = vmatprep.subr.bf16.mxu1 %v3923_v11 }
 0x153   :  { %v1899_v24 = vpop.f32.mrb[5].mxu1  ;;  %v1898_v59 = vadd.f32 %v1897_v23, %v386_v42  ;;  %3309 = vmatpush3.bf16.msra.mxu1 %v3924_v46  ;;  %v397_v23 = vsub.s32 3, %v4168_v35 }
 0x154   :  { %v1901_v25 = vpop.f32.mrb[6].mxu1  ;;  %v1900_v60 = vadd.f32 %v1899_v24, %v390_v43 }
 0x155   :  { %2292 = vmatpush1.bf16.msra.mxu0 %v3888_v61  ;;  %v1903_v27 = vpop.f32.mrb[7].mxu1  ;;  %v1902_v62 = vadd.f32 %v1901_v25, %v386_v42  ;;  %v398_v25 = vrot.slane %v4172_v38, %v397_v23 }
 0x156   :  { %2293 = vmatprep.subr.bf16.mxu0 %v3893_v16  ;;  %v1904_v0 = vadd.f32 %v1903_v27, %v390_v43 }
 0x159   :  { %2294 = vmatpush1.bf16.msra.mxu0 %v3891_v52 }
 0x15a   :  { %2295 = vmatprep.subr.bf16.mxu0 %v3896_v17 }
 0x15d   :  { %2296 = vmatpush1.bf16.msra.mxu0 %v3894_v18 }
 0x15e   :  { %2297 = vmatprep.subr.bf16.mxu0 %v3899_v19 }
 0x161   :  { %2298 = vmatpush1.bf16.msra.mxu0 %v3897_v20 }
 0x162   :  { %2299 = vmatprep.subr.bf16.mxu0 %v3902_v21 }
 0x165   :  { %2300 = vmatpush1.bf16.msra.mxu0 %v3900_v54  ;;  %v393_v54 = vsub.s32 2, %v4168_v35 }
 0x166   :  { %2301 = vmatprep.subr.bf16.mxu0 %v3905_v22 }
 0x167   :  { %v394_v22 = vrot.slane %v4172_v38, %v393_v54 }
 0x169   :  { %2302 = vmatpush1.bf16.msra.mxu0 %v3903_v26 }
 0x16a   :  { %2303 = vmatprep.subr.bf16.mxu0 %v3908_v28 }
 0x16d   :  { %2304 = vmatpush1.bf16.msra.mxu0 %v3906_v29  ;;  %v401_v29 = vsub.s32 4, %v4168_v35 }
 0x16e   :  { %2305 = vmatprep.subr.bf16.mxu0 %v3911_v30 }
 0x16f   :  { %v402_v43 = vrot.slane %v4172_v38, %v401_v29 }
 0x171   :  { %2306 = vmatpush1.bf16.msra.mxu0 %v3909_v31 }
 0x172   :  { %2307 = vmatprep.subr.bf16.mxu0 %v3914_v32  ;;  %v405_v32 = vsub.s32 5, %v4168_v35 }
 0x175   :  { %2308 = vmatpush1.bf16.msra.mxu0 %v3912_v33 }
 0x176   :  { %3360 = vmatprep.subr.bf16.mxu0 %v4202_v8 }
 0x178   :  { %2310 = vmatmul.mubr.bf16.vlgmr.msra.gmra.mrb[8].mxu0 %v4137_v37 }
 0x179   :  { %2319 = vmatprep.mubr.bf16.mxu0 %v4139_v47  ;;  %3361 = vmatpush3.bf16.msra.mxu0 %v4207_v9 }
 0x17a   :  { %3362 = vmatprep.subr.bf16.mxu0 %v4216_v10 }
 0x17d   :  { %3363 = vmatpush3.bf16.msra.mxu0 %v4225_v41 }
 0x17e   :  { %3364 = vmatprep.subr.bf16.mxu0 %v4234_v12 }
 0x180   :  { %2320 = vmatmul.mubr.bf16.gmra.mrb[12].mxu0 %v4145_v55 }
 0x181   :  { %3365 = vmatpush3.bf16.msra.mxu0 %v4243_v13 }
 0x18b   :  { %v1993_v37 = vpop.f32.mrb[0].mxu0 }
 0x18c   :  { %v4177_v49 = vadd.f32 %v1993_v37, %v1888_v44  ;;  %v1995_v47 = vpop.f32.mrb[1].mxu0 }
 0x18d   :  { %v4179_v51 = vadd.f32 %v1995_v47, %v1890_v45  ;;  %v1997_v55 = vpop.f32.mrb[2].mxu0  ;;  %v406_v45 = vrot.slane %v4172_v38, %v405_v32 }
 0x18e   :  { %v4181_v56 = vadd.f32 %v1997_v55, %v1892_v48  ;;  %v1999_v57 = vpop.f32.mrb[3].mxu0  ;;  %v2330_v27 = vmul.f32 %v4177_v49, %v4177_v49 }
 0x18f   :  { %v4183_v58 = vadd.f32 %v1999_v57, %v1894_v50  ;;  %v2331_v28 = vmul.f32 %v4179_v51, %v4179_v51 }
 0x190   :  { %v2336_v30 = vmul.f32 %v4181_v56, %v4181_v56 }
 0x191   :  { %v2337_v31 = vmul.f32 %v4183_v58, %v4183_v58  ;;  %v2354_v42 = vadd.f32 %v2331_v28, %v2330_v27 }
 0x193   :  { %v2003_v63 = vpop.f32.mrb[4].mxu0  ;;  %v2361_v44 = vadd.f32 %v2337_v31, %v2336_v30 }
 0x194   :  { %v4185_v1 = vadd.f32 %v2003_v63, %v1898_v59  ;;  %v2005_v2 = vpop.f32.mrb[5].mxu0 }
 0x195   :  { %v4187_v3 = vadd.f32 %v2005_v2, %v1900_v60  ;;  %v2007_v4 = vpop.f32.mrb[6].mxu0 }
 0x196   :  { %v4189_v5 = vadd.f32 %v2007_v4, %v1902_v62  ;;  %v2009_v6 = vpop.f32.mrb[7].mxu0  ;;  %v2342_v47 = vmul.f32 %v4185_v1, %v4185_v1 }
 0x197   :  { %v4191_v7 = vadd.f32 %v2009_v6, %v1904_v0  ;;  %v2343_v50 = vmul.f32 %v4187_v3, %v4187_v3 }
 0x198   :  { %v2348_v63 = vmul.f32 %v4189_v5, %v4189_v5 }
 0x199   :  { %v2349_v0 = vmul.f32 %v4191_v7, %v4191_v7  ;;  %v2368_v46 = vadd.f32 %v2343_v50, %v2342_v47 }
 0x19b   :  { %v2375_v54 = vadd.f32 %v2349_v0, %v2348_v63 }
 0x20a   :  { %v2152_v61 = vpop.f32.mrb[8].mxu1 }
 0x20b   :  { %v2154_v16 = vpop.f32.mrb[9].mxu1  ;;  %v4250_v24 = vadd.f32 %v2152_v61, %v394_v22 }
 0x20c   :  { %v2156_v52 = vpop.f32.mrb[10].mxu1  ;;  %v4267_v34 = vadd.f32 %v2154_v16, %v398_v25 }
 0x20d   :  { %v2158_v17 = vpop.f32.mrb[11].mxu1  ;;  %v4253_v26 = vadd.f32 %v2156_v52, %v394_v22  ;;  %v2332_v33 = vmul.f32 %v4250_v24, %v4250_v24 }
 0x20e   :  { %v4271_v39 = vadd.f32 %v2158_v17, %v398_v25  ;;  %v2333_v35 = vmul.f32 %v4267_v34, %v4267_v34 }
 0x20f   :  { %v2338_v36 = vmul.f32 %v4253_v26, %v4253_v26  ;;  %v2355_v37 = vadd.f32 %v2354_v42, %v2332_v33 }
 0x210   :  { %v2339_v57 = vmul.f32 %v4271_v39, %v4271_v39 }
 0x211   :  { %v2362_v55 = vadd.f32 %v2361_v44, %v2338_v36  ;;  %v2356_v11 = vadd.f32 %v2355_v37, %v2333_v35 }
 0x212   :  { %v2162_v18 = vpop.f32.mrb[12].mxu1 }
 0x213   :  { %v2164_v19 = vpop.f32.mrb[13].mxu1  ;;  %v4277_v48 = vadd.f32 %v2162_v18, %v394_v22  ;;  %v2363_v61 = vadd.f32 %v2362_v55, %v2339_v57 }
 0x214   :  { %v2166_v20 = vpop.f32.mrb[14].mxu1  ;;  %v4293_v2 = vadd.f32 %v2164_v19, %v398_v25 }
 0x215   :  { %v2168_v21 = vpop.f32.mrb[15].mxu1  ;;  %v4285_v60 = vadd.f32 %v2166_v20, %v394_v22  ;;  %v2344_v14 = vmul.f32 %v4277_v48, %v4277_v48 }
 0x216   :  { %v4309_v18 = vadd.f32 %v2168_v21, %v398_v25  ;;  %v2345_v22 = vmul.f32 %v4293_v2, %v4293_v2 }
 0x217   :  { %v2350_v17 = vmul.f32 %v4285_v60, %v4285_v60  ;;  %v2369_v23 = vadd.f32 %v2368_v46, %v2344_v14  ;;  %v3928_v14 = vld [vmem:[%s4554_s3 + $0x18] sm:$0xff]   ;;  %v3932_v46 = vld [vmem:[%s4554_s3 + $0x20] sm:$0xff]  }
 0x218   :  { %v2351_v21 = vmul.f32 %v4309_v18, %v4309_v18 }
 0x219   :  { %v2376_v31 = vadd.f32 %v2375_v54, %v2350_v17  ;;  %v2370_v47 = vadd.f32 %v2369_v23, %v2345_v22  ;;  %v3935_v17 = vld [vmem:[%s4554_s3 + $0x68] sm:$0xff]   ;;  %v3939_v22 = vld [vmem:[%s4554_s3 + $0x70] sm:$0xff]  }
 0x21a   :  { %v4385_v54 = vld [vmem:[%s4554_s3 + $0x128] sm:$0xff]   ;;  %v3940_v23 = vld [vmem:[%s4554_s3 + $0x30] sm:$0xff]  }
 0x21b   :  { %v2377_v57 = vadd.f32 %v2376_v31, %v2351_v21  ;;  %v4415_v31 = vld [vmem:[%s4554_s3 + $0x178] sm:$0xff]  }
 0x21c   :  { %v4421_v21 = vld [vmem:[%s4554_s3 + $0x138] sm:$0xff]  }
 0x24b   :  { %v2311_v59 = vpop.f32.mrb[8].mxu0 }
 0x24c   :  { %v4287_v38 = vadd.f32 %v2311_v59, %v402_v43  ;;  %v2313_v62 = vpop.f32.mrb[9].mxu0 }
 0x24d   :  { %v4295_v4 = vadd.f32 %v2313_v62, %v406_v45  ;;  %v2315_v6 = vpop.f32.mrb[10].mxu0 }
 0x24e   :  { %v2334_v15 = vmul.f32 %v4287_v38, %v4287_v38  ;;  %v4301_v40 = vadd.f32 %v2315_v6, %v402_v43  ;;  %v2317_v53 = vpop.f32.mrb[11].mxu0 }
 0x24f   :  { %v4303_v16 = vadd.f32 %v2317_v53, %v406_v45  ;;  %v2335_v52 = vmul.f32 %v4295_v4, %v4295_v4  ;;  %v4349_v53 = vld [vmem:[%s4554_s3 + $0x118] sm:$0xff]  }
 0x250   :  { %v2340_v19 = vmul.f32 %v4301_v40, %v4301_v40  ;;  %v2357_v20 = vadd.f32 %v2356_v11, %v2334_v15  ;;  %v4344_v15 = vld [vmem:[%s4554_s3 + $0x158] sm:$0xff]   ;;  %v3931_v11 = vld [vmem:[%s4554_s3 + $0x60] sm:$0xff]  }
 0x251   :  { %v2341_v27 = vmul.f32 %v4303_v16, %v4303_v16  ;;  %3366 = vmatprep.subr.bf16.mxu0 %v4344_v15 }
 0x252   :  { %v2358_v28 = vadd.f32 %v2357_v20, %v2335_v52  ;;  %v2364_v29 = vadd.f32 %v2363_v61, %v2340_v19  ;;  %3367 = vmatpush3.bf16.msra.mxu0 %v4349_v53  ;;  %v4362_v61 = vld [vmem:[%s4554_s3 + $0x160] sm:$0xff]   ;;  %v3936_v19 = vld [vmem:[%s4554_s3 + $0x28] sm:$0xff]  }
 0x253   :  { %v2321_v30 = vpop.f32.mrb[12].mxu0  ;;  %v4367_v52 = vld [vmem:[%s4554_s3 + $0x120] sm:$0xff]   ;;  %3368 = vmatprep.subr.bf16.mxu0 %v4362_v61  ;;  %v4380_v20 = vld [vmem:[%s4554_s3 + $0x168] sm:$0xff]  }
 0x254   :  { %v4319_v25 = vadd.f32 %v2321_v30, %v402_v43  ;;  %v2323_v32 = vpop.f32.mrb[13].mxu0  ;;  %2359 = vadd.xlane.f32.xlu0 %v2358_v28  ;;  %v2365_v35 = vadd.f32 %v2364_v29, %v2341_v27  ;;  %v4398_v27 = vld [vmem:[%s4554_s3 + $0x170] sm:$0xff]   ;;  %v3943_v29 = vld [vmem:[%s4554_s3 + $0x78] sm:$0xff]  }
 0x255   :  { %v4321_v33 = vadd.f32 %v2323_v32, %v406_v45  ;;  %v2325_v36 = vpop.f32.mrb[14].mxu0  ;;  %v4403_v28 = vld [vmem:[%s4554_s3 + $0x130] sm:$0xff]   ;;  %v3944_v30 = vld [vmem:[%s4554_s3 + $0x38] sm:$0xff]   ;;  %v3947_v32 = vld [vmem:[%s4554_s3 + $0xc0] sm:$0xff]  }
 0x256   :  { %v2346_v42 = vmul.f32 %v4319_v25, %v4319_v25  ;;  %v4325_v44 = vadd.f32 %v2325_v36, %v402_v43  ;;  %v2327_v37 = vpop.f32.mrb[15].mxu0  ;;  %3369 = vmatpush3.bf16.msra.mxu0 %v4367_v52 }
 0x257   :  { %v4327_v50 = vadd.f32 %v2327_v37, %v406_v45  ;;  %v2347_v55 = vmul.f32 %v4321_v33, %v4321_v33  ;;  %v3927_v45 = vld [vmem:[%s4554_s3 + $0x58] sm:$0xff]   ;;  %3370 = vmatprep.subr.bf16.mxu0 %v4380_v20 }
 0x258   :  { %v2352_v59 = vmul.f32 %v4325_v44, %v4325_v44  ;;  %2366 = vadd.xlane.f32.xlu0 %v2365_v35  ;;  %v2371_v62 = vadd.f32 %v2370_v47, %v2346_v42  ;;  %3310 = vmatprep.subr.bf16.mxu1 %v3927_v45 }
 0x259   :  { %v2353_v63 = vmul.f32 %v4327_v50, %v4327_v50  ;;  %3311 = vmatpush3.bf16.msra.mxu1 %v3928_v14 }
 0x25a   :  { %v2372_v0 = vadd.f32 %v2371_v62, %v2347_v55  ;;  %v2378_v43 = vadd.f32 %v2377_v57, %v2352_v59  ;;  %3312 = vmatprep.subr.bf16.mxu1 %v3931_v11  ;;  %3371 = vmatpush3.bf16.msra.mxu0 %v4385_v54 }
 0x25b   :  { %3372 = vmatprep.subr.bf16.mxu0 %v4398_v27 }
 0x25c   :  { %2373 = vadd.xlane.f32.xlu1 %v2372_v0  ;;  %v2379_v6 = vadd.f32 %v2378_v43, %v2353_v63 }
 0x25d   :  { %3313 = vmatpush3.bf16.msra.mxu1 %v3932_v46 }
 0x25e   :  { %3314 = vmatprep.subr.bf16.mxu1 %v3935_v17  ;;  %3373 = vmatpush3.bf16.msra.mxu0 %v4403_v28 }
 0x25f   :  { %3374 = vmatprep.subr.bf16.mxu0 %v4415_v31 }
 0x260   :  { %2380 = vadd.xlane.f32.xlu1 %v2379_v6 }
 0x261   :  { %3315 = vmatpush3.bf16.msra.mxu1 %v3936_v19 }
 0x262   :  { %3316 = vmatprep.subr.bf16.mxu1 %v3939_v22  ;;  %3375 = vmatpush3.bf16.msra.mxu0 %v4421_v21  ;;  %v3951_v22 = vld [vmem:[%s4554_s3 + $0xd0] sm:$0xff]  }
 0x265   :  { %3317 = vmatpush3.bf16.msra.mxu1 %v3940_v23 }
 0x266   :  { %3318 = vmatprep.subr.bf16.mxu1 %v3943_v29 }
 0x269   :  { %3319 = vmatpush3.bf16.msra.mxu1 %v3944_v30 }
 0x26a   :  { %3332 = vmatprep.subr.bf16.mxu1 %v3947_v32 }
 0x2e1   :  { %v2360_v36 = vpop.xlane.xlu0 %2359 }
 0x2e2   :  { %v2382_v42 = vmax.f32 %v2360_v36, 1e-24 }
 0x2e4   :  { %3963 = vrsqrt.f32 %v2382_v42 }
 0x2e5   :  { %v2367_v37 = vpop.xlane.xlu0 %2366 }
 0x2e6   :  { %v2383_v35 = vmax.f32 %v2367_v37, 1e-24 }
 0x2e8   :  { %3965 = vrsqrt.f32 %v2383_v35 }
 0x2e9   :  { %v2374_v47 = vpop.xlane.xlu1 %2373 }
 0x2ea   :  { %v2384_v55 = vmax.f32 %v2374_v47, 1e-24 }
 0x2ec   :  { %3967 = vrsqrt.f32 %v2384_v55  ;;  %v3957_v55 = vld [vmem:[%s4554_s3 + $0xe8] sm:$0xff]  }
 0x2ed   :  { %v2381_v57 = vpop.xlane.xlu1 %2380 }
 0x2ee   :  { %v2385_v59 = vmax.f32 %v2381_v57, 1e-24  ;;  %v4428_v62 = vpop.eup %3963  ;;  %v3958_v57 = vld [vmem:[%s4554_s3 + $0xa8] sm:$0xff]  }
 0x2ef   :  { %v2391_v0 = vmul.f32 %v4428_v62, %v4179_v51  ;;  %v2395_v43 = vmul.f32 %v4428_v62, %v4295_v4  ;;  %v2390_v6 = vmul.f32 %v4428_v62, %v4177_v49  ;;  %v2394_v45 = vmul.f32 %v4428_v62, %v4287_v38  ;;  %v3948_v49 = vld [vmem:[%s4554_s3 + $0x80] sm:$0xff]  }
 0x2f0   :  { %3969 = vrsqrt.f32 %v2385_v59  ;;  %v3959_v59 = vld [vmem:[%s4554_s3 + $0xf0] sm:$0xff]  }
 0x2f2   :  { %v4430_v63 = vpop.eup %3965 }
 0x2f3   :  { %v2397_v14 = vmul.f32 %v4430_v63, %v4183_v58  ;;  %v2401_v11 = vmul.f32 %v4430_v63, %v4303_v16  ;;  %v2396_v46 = vmul.f32 %v4430_v63, %v4181_v56  ;;  %v2400_v51 = vmul.f32 %v4430_v63, %v4301_v40  ;;  %v3949_v58 = vld [vmem:[%s4554_s3 + $0xc8] sm:$0xff]  }
 0x2f4   :  { %v3950_v56 = vld [vmem:[%s4554_s3 + $0x88] sm:$0xff]   ;;  %v2399_v23 = vmul.f32 %v4430_v63, %v4271_v39  ;;  %v3952_v39 = vld [vmem:[%s4554_s3 + $0x90] sm:$0xff]  }
 0x2f5   :  { %v2415_v17 = vpack.c.bf16 %v2397_v14, %v2391_v0  ;;  %v2419_v4 = vpack.c.bf16 %v2401_v11, %v2395_v43  ;;  %v2414_v19 = vpack.c.bf16 %v2396_v46, %v2390_v6  ;;  %v2418_v38 = vpack.c.bf16 %v2400_v51, %v2394_v45  ;;  %v3960_v0 = vld [vmem:[%s4554_s3 + $0xb0] sm:$0xff]   ;;  %v3961_v43 = vld [vmem:[%s4554_s3 + $0xf8] sm:$0xff]  }
 0x2f6   :  { %v3968_v16 = vpop.eup %3967  ;;  %v3962_v6 = vld [vmem:[%s4554_s3 + $0xb8] sm:$0xff]   ;;  %v2398_v45 = vmul.f32 %v4430_v63, %v4253_v26  ;;  %v2392_v11 = vmul.f32 %v4428_v62, %v4250_v24 }
 0x2f7   :  { %2842 = vmatprep.mubr.bf16.mxu1 %v2415_v17  ;;  %2940 = vmatprep.mubr.bf16.mxu0 %v2419_v4  ;;  %v2403_v29 = vmul.f32 %v3968_v16, %v4187_v3  ;;  %v2402_v32 = vmul.f32 %v3968_v16, %v4185_v1  ;;  %v4467_v42 = vmul.f32 %v3968_v16, %v4319_v25  ;;  %v3953_v1 = vld [vmem:[%s4554_s3 + $0xd8] sm:$0xff]  }
 0x2f8   :  { %2843 = vmatmul.mubr.bf16.vlgmr.msra.gmra.mrb[16].mxu1 %v2414_v19  ;;  %2941 = vmatmul.mubr.bf16.vlgmr.msra.gmra.mrb[16].mxu0 %v2418_v38  ;;  %v2393_v3 = vmul.f32 %v4428_v62, %v4267_v34  ;;  %v3954_v25 = vld [vmem:[%s4554_s3 + $0x98] sm:$0xff]   ;;  %v3955_v34 = vld [vmem:[%s4554_s3 + $0xe0] sm:$0xff]   ;;  %v2405_v46 = vmul.f32 %v3968_v16, %v4293_v2  ;;  %v2416_v51 = vpack.c.bf16 %v2398_v45, %v2392_v11 }
 0x2f9   :  { %3333 = vmatpush3.bf16.msra.mxu1 %v3948_v49  ;;  %v2404_v63 = vmul.f32 %v3968_v16, %v4277_v48  ;;  %v2407_v24 = vmul.f32 %v3968_v16, %v4321_v33 }
 0x2fa   :  { %v3970_v40 = vpop.eup %3969  ;;  %3334 = vmatprep.subr.bf16.mxu1 %v3949_v58 }
 0x2fb   :  { %v2409_v30 = vmul.f32 %v3970_v40, %v4191_v7  ;;  %v2408_v36 = vmul.f32 %v3970_v40, %v4189_v5  ;;  %v4470_v37 = vmul.f32 %v3970_v40, %v4325_v44  ;;  %v2417_v7 = vpack.c.bf16 %v2399_v23, %v2393_v3  ;;  %v3956_v44 = vld [vmem:[%s4554_s3 + $0xa0] sm:$0xff]  }
 0x2fc   :  { %v2411_v14 = vmul.f32 %v3970_v40, %v4309_v18  ;;  %v2410_v26 = vmul.f32 %v3970_v40, %v4285_v60  ;;  %v2413_v18 = vmul.f32 %v3970_v40, %v4327_v50 }
 0x2fd   :  { %3335 = vmatpush3.bf16.msra.mxu1 %v3950_v56  ;;  %v2421_v35 = vpack.c.bf16 %v2409_v30, %v2403_v29  ;;  %v2420_v47 = vpack.c.bf16 %v2408_v36, %v2402_v32  ;;  %v2424_v5 = vpack.c.bf16 %v4470_v37, %v4467_v42 }
 0x2fe   :  { %3336 = vmatprep.subr.bf16.mxu1 %v3951_v22  ;;  %v2423_v17 = vpack.c.bf16 %v2411_v14, %v2405_v46  ;;  %v2422_v2 = vpack.c.bf16 %v2410_v26, %v2404_v63 }
 0x2ff   :  { %2850 = vmatprep.mubr.bf16.mxu1 %v2421_v35 }
 0x300   :  { %2851 = vmatmul.mubr.bf16.gmra.mrb[20].mxu1 %v2420_v47 }
 0x301   :  { %3337 = vmatpush3.bf16.msra.mxu1 %v3952_v39  ;;  %2891 = vmatprep.mubr.bf16.mxu1 %v2417_v7 }
 0x302   :  { %3338 = vmatprep.subr.bf16.mxu1 %v3953_v1 }
 0x305   :  { %3339 = vmatpush3.bf16.msra.mxu1 %v3954_v25 }
 0x306   :  { %3340 = vmatprep.subr.bf16.mxu1 %v3955_v34 }
 0x309   :  { %3341 = vmatpush3.bf16.msra.mxu1 %v3956_v44 }
 0x30a   :  { %3342 = vmatprep.subr.bf16.mxu1 %v3957_v55 }
 0x30d   :  { %3343 = vmatpush3.bf16.msra.mxu1 %v3958_v57 }
 0x30e   :  { %3344 = vmatprep.subr.bf16.mxu1 %v3959_v59 }
 0x311   :  { %3345 = vmatpush3.bf16.msra.mxu1 %v3960_v0 }
 0x312   :  { %3346 = vmatprep.subr.bf16.mxu1 %v3961_v43 }
 0x315   :  { %3347 = vmatpush3.bf16.msra.mxu1 %v3962_v6 }
 0x316   :  { %3388 = vmatprep.subr.bf16.mxu1 %v4202_v8  ;;  %v2425_v8 = vpack.c.bf16 %v2413_v18, %v2407_v24 }
 0x318   :  { %2892 = vmatmul.mubr.bf16.vlgmr.msra.gmra.mrb[24].mxu1 %v2416_v51 }
 0x319   :  { %2899 = vmatprep.mubr.bf16.mxu1 %v2423_v17  ;;  %3396 = vmatpush3.bf16.msra.mxu1 %v4207_v9 }
 0x31a   :  { %3389 = vmatprep.subr.bf16.mxu1 %v4216_v10 }
 0x31d   :  { %3397 = vmatpush3.bf16.msra.mxu1 %v4225_v41 }
 0x31e   :  { %3390 = vmatprep.subr.bf16.mxu1 %v4234_v12 }
 0x320   :  { %2900 = vmatmul.mubr.bf16.gmra.mrb[28].mxu1 %v2422_v2 }
 0x321   :  { %3398 = vmatpush3.bf16.msra.mxu1 %v4243_v13  ;;  %2948 = vmatprep.mubr.bf16.mxu1 %v2425_v8 }
 0x322   :  { %3391 = vmatprep.subr.bf16.mxu1 %v4344_v15 }
 0x325   :  { %3399 = vmatpush3.bf16.msra.mxu1 %v4349_v53 }
 0x326   :  { %3392 = vmatprep.subr.bf16.mxu1 %v4362_v61 }
 0x329   :  { %3400 = vmatpush3.bf16.msra.mxu1 %v4367_v52 }
 0x32a   :  { %3393 = vmatprep.subr.bf16.mxu1 %v4380_v20 }
 0x32d   :  { %3401 = vmatpush3.bf16.msra.mxu1 %v4385_v54 }
 0x32e   :  { %3394 = vmatprep.subr.bf16.mxu1 %v4398_v27 }
 0x331   :  { %3402 = vmatpush3.bf16.msra.mxu1 %v4403_v28 }
 0x332   :  { %3395 = vmatprep.subr.bf16.mxu1 %v4415_v31 }
 0x335   :  { %3403 = vmatpush3.bf16.msra.mxu1 %v4421_v21 }
 0x338   :  { %2949 = vmatmul.mubr.bf16.vlgmr.msra.gmra.mrb[32].mxu1 %v2424_v5 }
 0x3cb   :  { %v3320_v9 = vpop.f32.mrb[16].mxu1  ;;  %v3376_v10 = vpop.f32.mrb[16].mxu0 }
 0x3cc   :  { %v3321_v41 = vpop.f32.mrb[17].mxu1  ;;  %v3377_v12 = vpop.f32.mrb[17].mxu0 }
 0x3cd   :  { %v3322_v13 = vadd.f32 %v3321_v41, %v3320_v9  ;;  %v3378_v48 = vadd.f32 %v3377_v12, %v3376_v10  ;;  %v3323_v60 = vpop.f32.mrb[18].mxu1  ;;  %v3379_v33 = vpop.f32.mrb[18].mxu0 }
 0x3ce   :  { %v3324_v50 = vpop.f32.mrb[19].mxu1  ;;  %v3380_v15 = vpop.f32.mrb[19].mxu0 }
 0x3cf   :  { %v3325_v53 = vadd.f32 %v3324_v50, %v3323_v60  ;;  %v3381_v61 = vadd.f32 %v3380_v15, %v3379_v33 }
 0x3d3   :  { %v3326_v52 = vpop.f32.mrb[20].mxu1 }
 0x3d4   :  { %v3327_v20 = vpop.f32.mrb[21].mxu1 }
 0x3d5   :  { %v3328_v54 = vadd.f32 %v3327_v20, %v3326_v52  ;;  %v3329_v27 = vpop.f32.mrb[22].mxu1 }
 0x3d6   :  { %v3330_v28 = vpop.f32.mrb[23].mxu1 }
 0x3d7   :  { %v3331_v31 = vadd.f32 %v3330_v28, %v3329_v27 }
 0x3eb   :  { %v3348_v21 = vpop.f32.mrb[24].mxu1 }
 0x3ec   :  { %v3349_v62 = vpop.f32.mrb[25].mxu1 }
 0x3ed   :  { %v3350_v4 = vadd.f32 %v3349_v62, %v3348_v21  ;;  %v3351_v19 = vpop.f32.mrb[26].mxu1 }
 0x3ee   :  { %v3352_v49 = vpop.f32.mrb[27].mxu1 }
 0x3ef   :  { %v2894_v38 = vadd.f32 %v3350_v4, %v3322_v13  ;;  %v3353_v58 = vadd.f32 %v3352_v49, %v3351_v19 }
 0x3f1   :  { %v2943_v16 = vadd.f32 %v3378_v48, %v2894_v38  ;;  %v2897_v56 = vadd.f32 %v3353_v58, %v3325_v53 }
 0x3f3   :  { %2958 = vst.msk [vmem:[%s4555_s4] sm:$0xff] %vm2957_vm0, %v2943_v16  ;;  %v2946_v40 = vadd.f32 %v3381_v61, %v2897_v56  ;;  %v3354_v22 = vpop.f32.mrb[28].mxu1 }
 0x3f4   :  { %v3355_v23 = vpop.f32.mrb[29].mxu1 }
 0x3f5   :  { %2959 = vst.msk [vmem:[%s4555_s4 + $0x8] sm:$0xff] %vm2957_vm0, %v2946_v40  ;;  %v3356_v29 = vadd.f32 %v3355_v23, %v3354_v22  ;;  %v3357_v30 = vpop.f32.mrb[30].mxu1 }
 0x3f6   :  { %v3358_v32 = vpop.f32.mrb[31].mxu1 }
 0x3f7   :  { %v2902_v36 = vadd.f32 %v3356_v29, %v3328_v54  ;;  %v3359_v42 = vadd.f32 %v3358_v32, %v3357_v30 }
 0x3f9   :  { %v2905_v37 = vadd.f32 %v3359_v42, %v3331_v31 }
 0x40b   :  { %v3382_v35 = vpop.f32.mrb[32].mxu1 }
 0x40c   :  { %v3383_v47 = vpop.f32.mrb[33].mxu1 }
 0x40d   :  { %v3384_v39 = vadd.f32 %v3383_v47, %v3382_v35  ;;  %v3385_v3 = vpop.f32.mrb[34].mxu1 }
 0x40e   :  { %v3386_v1 = vpop.f32.mrb[35].mxu1 }
 0x40f   :  { %v2951_v5 = vadd.f32 %v3384_v39, %v2902_v36  ;;  %v3387_v7 = vadd.f32 %v3386_v1, %v3385_v3 }
 0x411   :  { %2960 = vst.msk [vmem:[%s4555_s4 + $0x10] sm:$0xff] %vm2957_vm0, %v2951_v5  ;;  %v2954_v25 = vadd.f32 %v3387_v7, %v2905_v37 }
 0x413   :  { %2961 = vst.msk [vmem:[%s4555_s4 + $0x18] sm:$0xff] %vm2957_vm0, %v2954_v25 }
 0x414   :  { %2966 = vsyncpa [#allocation3], 1 }
 0x415   :  { %2967 = vsyncpa [#allocation5], 1 }

// kernel: tpu_custom_call.1
= control target key start
LH: loop header
LB: loop body
LE: loop exit
PB: predicated region body
PF: predicated region fallthrough
CT: control target
= control target key end

     0   :  { %9 = vsyncpa [#allocation3], 0  ;;  %s4551_s0 = inlined_call_operand.hbm [shape: f32[32,768], index: 0, kind: input, shape index: {}]   ;;  %s4552_s1 = inlined_call_operand.hbm [shape: bf16[768,768], index: 1, kind: input, shape index: {}]   ;;  %s4553_s2 = inlined_call_operand.hbm [shape: f32[1,768], index: 2, kind: input, shape index: {}]   ;;  %s4554_s3 = inlined_call_operand.vmem [shape: bf16[768,16], index: 3, kind: input, shape index: {}]   ;;  %s4555_s4 = inlined_call_operand.vmem [shape: f32[32,16], index: 4, kind: output, shape index: {}]  }
   0x1   :  { %10 = vsyncpa [#allocation5], 0  ;;  %s4041_s15 = smov [#allocation4]   ;;  %s3971_s19 = scalar_lea.hbm %s4552_s1, 36864 }
   0x2   :  { %s28_s16 = sshll.u32 %s4041_s15, 4  ;;  %p3972_p0 = scmp.ne.s32.totalorder %s4552_s1, %s3971_s19  ;;  %s29_s16 = int_to_ptr.vmem [resolvable:$true] %s28_s16 }
   0x3   :  { %p3975_p1 = scmp.lt.u32.totalorder %s3971_s19, %s4552_s1 }
   0x5   :  { %p3977_p2 = pnand %p3975_p1, %p3972_p0 }
   0x7   :  { %3980 = shalt.err (!%p3977_p2)
}
   0x8   :  { %s3981_s24 = scalar_lea.vmem %s29_s16, 36864  ;;  %p3986_p4 = scmp.lt.s32.totalorder %s29_s16, %s29_s16 }
   0x9   :  { %p3982_p3 = scmp.ne.s32.totalorder %s29_s16, %s3981_s24  ;;  %p3987_p5 = scmp.lt.s32.totalorder %s3981_s24, %s3981_s24 }
   0xb   :  { %p3988_p6 = por %p3987_p5, %p3986_p4 }
   0xd   :  { %p3989_p7 = pnand %p3988_p6, %p3982_p3 }
   0xf   :  { %3992 = shalt.err (!%p3989_p7)
}
  0x10   :  { %s4042_s25 = smov 384   ;;  %s4043_s26 = smov 24  }
  0x11   :  { %34 = dma.hbm_to_vmem [thread:$0]  %s4552_s1, 36864, %s29_s16, [#allocation5], %s4042_s25, %s4042_s25, %s4043_s26  }
  0x12   :  { %s4044_s29 = smov [#allocation2]   ;;  %s3993_s7 = scalar_lea.hbm %s4551_s0, 3072 }
  0x13   :  { %s16_s30 = sshll.u32 %s4044_s29, 4  ;;  %p3994_p8 = scmp.ne.s32.totalorder %s4551_s0, %s3993_s7  ;;  %s17_s30 = int_to_ptr.vmem [resolvable:$true] %s16_s30 }
  0x14   :  { %p3997_p9 = scmp.lt.u32.totalorder %s3993_s7, %s4551_s0 }
  0x16   :  { %p3999_p10 = pnand %p3997_p9, %p3994_p8 }
  0x18   :  { %4002 = shalt.err (!%p3999_p10)
}
  0x19   :  { %s4003_s12 = scalar_lea.vmem %s17_s30, 3072  ;;  %p4008_p12 = scmp.lt.s32.totalorder %s17_s30, %s17_s30 }
  0x1a   :  { %p4004_p11 = scmp.ne.s32.totalorder %s17_s30, %s4003_s12  ;;  %p4009_p13 = scmp.lt.s32.totalorder %s4003_s12, %s4003_s12 }
  0x1c   :  { %p4010_p0 = por %p4009_p13, %p4008_p12 }
  0x1e   :  { %p4011_p1 = pnand %p4010_p0, %p4004_p11 }
  0x20   :  { %4014 = shalt.err (!%p4011_p1)
}
  0x21   :  { %s4045_s1 = smov 768   ;;  %s4046_s13 = smov 48  }
  0x22   :  { %22 = dma.hbm_to_vmem [thread:$0]  %s4551_s0, 3072, %s17_s30, [#allocation3], %s4045_s1, %s4045_s1, %s4046_s13  }
  0x23   :  { %s4047_s16 = smov [#allocation6]   ;;  %s4015_s20 = scalar_lea.hbm %s4553_s2, 96 }
  0x24   :  { %s41_s17 = sshll.u32 %s4047_s16, 4  ;;  %p4016_p2 = scmp.ne.s32.totalorder %s4553_s2, %s4015_s20  ;;  %s42_s17 = int_to_ptr.vmem [resolvable:$true] %s41_s17 }
  0x25   :  { %p4019_p3 = scmp.lt.u32.totalorder %s4015_s20, %s4553_s2 }
  0x27   :  { %p4021_p4 = pnand %p4019_p3, %p4016_p2 }
  0x29   :  { %4024 = shalt.err (!%p4021_p4)
}
  0x2a   :  { %s4025_s25 = scalar_lea.vmem %s42_s17, 96  ;;  %p4030_p6 = scmp.lt.s32.totalorder %s42_s17, %s42_s17 }
  0x2b   :  { %p4026_p5 = scmp.ne.s32.totalorder %s42_s17, %s4025_s25  ;;  %p4031_p7 = scmp.lt.s32.totalorder %s4025_s25, %s4025_s25 }
  0x2d   :  { %p4032_p8 = por %p4031_p7, %p4030_p6 }
  0x2f   :  { %p4033_p9 = pnand %p4032_p8, %p4026_p5 }
  0x31   :  { %4036 = shalt.err (!%p4033_p9)
}
  0x32   :  { %44 = dma.hbm_to_vmem [thread:$0]  %s4553_s2, 96, %s42_s17, [#allocation5]  }
  0x33   :  { %4037 = dma.done.wait [#allocation3], 3072  }
  0x34   :  { %4038 = vsyncadd [#allocation3], 4294964224 }
  0x35   :  { %4039 = dma.done.wait [#allocation5], 36960  }
  0x36   :  { %4040 = vsyncadd [#allocation5], 4294930336  ;;  %v3483_v0 = vld [vmem:[#allocation4 + $0x4] ss:$24 sps:$4 sm:$0xff]   ;;  %v3487_v2 = vld [vmem:[#allocation4] ss:$24 sps:$4 sm:$0xff]  }
  0x37   :  { %v3485_v1 = vld [vmem:[#allocation4 + $0x304] ss:$24 sps:$4 sm:$0xff]   ;;  %1853 = vmatprep.subr.bf16.mxu1 %v3483_v0  ;;  %v3488_v3 = vld [vmem:[#allocation4 + $0x300] ss:$24 sps:$4 sm:$0xff]   ;;  %v3489_v4 = vld [vmem:[#allocation4 + $0x34] ss:$24 sps:$4 sm:$0xff]  }
  0x38   :  { %1906 = vmatprep.subr.bf16.mxu0 %v3485_v1  ;;  %1854 = vmatpush1.bf16.msra.mxu1 %v3487_v2  ;;  %v3491_v5 = vld [vmem:[#allocation4 + $0x334] ss:$24 sps:$4 sm:$0xff]   ;;  %v3493_v6 = vld [vmem:[#allocation4 + $0x30] ss:$24 sps:$4 sm:$0xff]   ;;  %v3495_v8 = vld [vmem:[#allocation4 + $0x64] ss:$24 sps:$4 sm:$0xff]  }
  0x39   :  { %1907 = vmatpush1.bf16.msra.mxu0 %v3488_v3  ;;  %1855 = vmatprep.subr.bf16.mxu1 %v3489_v4  ;;  %v3494_v7 = vld [vmem:[#allocation4 + $0x330] ss:$24 sps:$4 sm:$0xff]   ;;  %v3497_v9 = vld [vmem:[#allocation4 + $0x364] ss:$24 sps:$4 sm:$0xff]   ;;  %v3499_v10 = vld [vmem:[#allocation4 + $0x60] ss:$24 sps:$4 sm:$0xff]  }
  0x3a   :  { %1908 = vmatprep.subr.bf16.mxu0 %v3491_v5  ;;  %v3500_v11 = vld [vmem:[#allocation4 + $0x360] ss:$24 sps:$4 sm:$0xff]   ;;  %v3501_v12 = vld [vmem:[#allocation4 + $0x94] ss:$24 sps:$4 sm:$0xff]   ;;  %v3505_v14 = vld [vmem:[#allocation4 + $0x90] ss:$24 sps:$4 sm:$0xff]  }
  0x3b   :  { %v3503_v13 = vld [vmem:[#allocation4 + $0x394] ss:$24 sps:$4 sm:$0xff]   ;;  %v3506_v15 = vld [vmem:[#allocation4 + $0x390] ss:$24 sps:$4 sm:$0xff]   ;;  %v3507_v16 = vld [vmem:[#allocation4 + $0xc4] ss:$24 sps:$4 sm:$0xff]  }
  0x3c   :  { %1856 = vmatpush1.bf16.msra.mxu1 %v3493_v6  ;;  %v3509_v17 = vld [vmem:[#allocation4 + $0x3c4] ss:$24 sps:$4 sm:$0xff]   ;;  %v3511_v18 = vld [vmem:[#allocation4 + $0xc0] ss:$24 sps:$4 sm:$0xff]   ;;  %v3513_v20 = vld [vmem:[#allocation4 + $0xf4] ss:$24 sps:$4 sm:$0xff]  }
  0x3d   :  { %1909 = vmatpush1.bf16.msra.mxu0 %v3494_v7  ;;  %1857 = vmatprep.subr.bf16.mxu1 %v3495_v8  ;;  %v3512_v19 = vld [vmem:[#allocation4 + $0x3c0] ss:$24 sps:$4 sm:$0xff]   ;;  %v3515_v21 = vld [vmem:[#allocation4 + $0x3f4] ss:$24 sps:$4 sm:$0xff]   ;;  %v3517_v22 = vld [vmem:[#allocation4 + $0xf0] ss:$24 sps:$4 sm:$0xff]  }
  0x3e   :  { %1910 = vmatprep.subr.bf16.mxu0 %v3497_v9  ;;  %v3518_v23 = vld [vmem:[#allocation4 + $0x3f0] ss:$24 sps:$4 sm:$0xff]   ;;  %v3519_v24 = vld [vmem:[#allocation4 + $0x124] ss:$24 sps:$4 sm:$0xff]   ;;  %v3523_v26 = vld [vmem:[#allocation4 + $0x120] ss:$24 sps:$4 sm:$0xff]  }
  0x3f   :  { %v3521_v25 = vld [vmem:[#allocation4 + $0x424] ss:$24 sps:$4 sm:$0xff]   ;;  %v3524_v27 = vld [vmem:[#allocation4 + $0x420] ss:$24 sps:$4 sm:$0xff]   ;;  %v3525_v28 = vld [vmem:[#allocation4 + $0x154] ss:$24 sps:$4 sm:$0xff]  }
  0x40   :  { %1858 = vmatpush1.bf16.msra.mxu1 %v3499_v10  ;;  %v3527_v29 = vld [vmem:[#allocation4 + $0x454] ss:$24 sps:$4 sm:$0xff]   ;;  %v3529_v30 = vld [vmem:[#allocation4 + $0x150] ss:$24 sps:$4 sm:$0xff]   ;;  %v3531_v32 = vld [vmem:[#allocation4 + $0x184] ss:$24 sps:$4 sm:$0xff]  }
  0x41   :  { %1911 = vmatpush1.bf16.msra.mxu0 %v3500_v11  ;;  %1859 = vmatprep.subr.bf16.mxu1 %v3501_v12  ;;  %v3530_v31 = vld [vmem:[#allocation4 + $0x450] ss:$24 sps:$4 sm:$0xff]   ;;  %v3533_v33 = vld [vmem:[#allocation4 + $0x484] ss:$24 sps:$4 sm:$0xff]   ;;  %v3535_v34 = vld [vmem:[#allocation4 + $0x180] ss:$24 sps:$4 sm:$0xff]  }
  0x42   :  { %1912 = vmatprep.subr.bf16.mxu0 %v3503_v13  ;;  %v3536_v35 = vld [vmem:[#allocation4 + $0x480] ss:$24 sps:$4 sm:$0xff]   ;;  %v3537_v36 = vld [vmem:[#allocation4 + $0x1b4] ss:$24 sps:$4 sm:$0xff]   ;;  %v3541_v38 = vld [vmem:[#allocation4 + $0x1b0] ss:$24 sps:$4 sm:$0xff]  }
  0x43   :  { %v3539_v37 = vld [vmem:[#allocation4 + $0x4b4] ss:$24 sps:$4 sm:$0xff]   ;;  %v3542_v39 = vld [vmem:[#allocation4 + $0x4b0] ss:$24 sps:$4 sm:$0xff]   ;;  %v3543_v40 = vld [vmem:[#allocation4 + $0x1e4] ss:$24 sps:$4 sm:$0xff]  }
  0x44   :  { %1860 = vmatpush1.bf16.msra.mxu1 %v3505_v14  ;;  %v3545_v41 = vld [vmem:[#allocation4 + $0x4e4] ss:$24 sps:$4 sm:$0xff]   ;;  %v3547_v42 = vld [vmem:[#allocation4 + $0x1e0] ss:$24 sps:$4 sm:$0xff]   ;;  %v3549_v44 = vld [vmem:[#allocation4 + $0x214] ss:$24 sps:$4 sm:$0xff]  }
  0x45   :  { %1913 = vmatpush1.bf16.msra.mxu0 %v3506_v15  ;;  %1861 = vmatprep.subr.bf16.mxu1 %v3507_v16  ;;  %v3548_v43 = vld [vmem:[#allocation4 + $0x4e0] ss:$24 sps:$4 sm:$0xff]   ;;  %v3551_v45 = vld [vmem:[#allocation4 + $0x514] ss:$24 sps:$4 sm:$0xff]   ;;  %v3553_v46 = vld [vmem:[#allocation4 + $0x210] ss:$24 sps:$4 sm:$0xff]  }
  0x46   :  { %1914 = vmatprep.subr.bf16.mxu0 %v3509_v17  ;;  %v3554_v47 = vld [vmem:[#allocation4 + $0x510] ss:$24 sps:$4 sm:$0xff]   ;;  %v64_v49 = vld [vmem:[#allocation2 + $0x38] sm:$0xff]  ;;  %v3561_v58 = vld [vmem:[#allocation4 + $0x274] ss:$24 sps:$4 sm:$0xff]   ;;  %vm2957_vm0 = vcmask 130048  }
  0x47   :  { %v58_v48 = vld [vmem:[#allocation2 + $0x8] sm:$0xff]  ;;  %v60_v50 = vld [vmem:[#allocation2 + $0x18] sm:$0xff]  ;;  %v57_v6 = vld [vmem:[#allocation2] sm:$0xff] }
  0x48   :  { %1862 = vmatpush1.bf16.msra.mxu1 %v3511_v18  ;;  %v66_v51 = vld [vmem:[#allocation2 + $0x48] sm:$0xff]  ;;  %v3555_v52 = vld [vmem:[#allocation4 + $0x244] ss:$24 sps:$4 sm:$0xff]   ;;  %v4109_v53 = vpack.c.bf16 %v64_v49, %v58_v48  ;;  %v3559_v56 = vld [vmem:[#allocation4 + $0x240] ss:$24 sps:$4 sm:$0xff]  }
  0x49   :  { %1915 = vmatpush1.bf16.msra.mxu0 %v3512_v19  ;;  %1863 = vmatprep.subr.bf16.mxu1 %v3513_v20  ;;  %v4111_v54 = vpack.c.bf16 %v66_v51, %v60_v50  ;;  %v3557_v55 = vld [vmem:[#allocation4 + $0x544] ss:$24 sps:$4 sm:$0xff]   ;;  %v3560_v57 = vld [vmem:[#allocation4 + $0x540] ss:$24 sps:$4 sm:$0xff]   ;;  %v3563_v59 = vld [vmem:[#allocation4 + $0x574] ss:$24 sps:$4 sm:$0xff]  }
  0x4a   :  { %1916 = vmatprep.subr.bf16.mxu0 %v3515_v21  ;;  %1885 = vmatprep.mubr.bf16.mxu1 %v4109_v53  ;;  %v3565_v60 = vld [vmem:[#allocation4 + $0x270] ss:$24 sps:$4 sm:$0xff]   ;;  %v3567_v62 = vld [vmem:[#allocation4 + $0x2a4] ss:$24 sps:$4 sm:$0xff]   ;;  %v3571_v0 = vld [vmem:[#allocation4 + $0x2a0] ss:$24 sps:$4 sm:$0xff]  }
  0x4b   :  { %1938 = vmatprep.mubr.bf16.mxu0 %v4111_v54  ;;  %v3566_v61 = vld [vmem:[#allocation4 + $0x570] ss:$24 sps:$4 sm:$0xff]   ;;  %v3569_v63 = vld [vmem:[#allocation4 + $0x5a4] ss:$24 sps:$4 sm:$0xff]   ;;  %v3572_v1 = vld [vmem:[#allocation4 + $0x5a0] ss:$24 sps:$4 sm:$0xff]  }
  0x4c   :  { %1864 = vmatpush1.bf16.msra.mxu1 %v3517_v22  ;;  %v3573_v2 = vld [vmem:[#allocation4 + $0x2d4] ss:$24 sps:$4 sm:$0xff]   ;;  %v3577_v4 = vld [vmem:[#allocation4 + $0x2d0] ss:$24 sps:$4 sm:$0xff]   ;;  %v3581_v7 = vld [vmem:[#allocation4 + $0x604] ss:$24 sps:$4 sm:$0xff]  }
  0x4d   :  { %1917 = vmatpush1.bf16.msra.mxu0 %v3518_v23  ;;  %1865 = vmatprep.subr.bf16.mxu1 %v3519_v24  ;;  %v3575_v3 = vld [vmem:[#allocation4 + $0x5d4] ss:$24 sps:$4 sm:$0xff]   ;;  %v3578_v5 = vld [vmem:[#allocation4 + $0x5d0] ss:$24 sps:$4 sm:$0xff]   ;;  %v65_v10 = vld [vmem:[#allocation2 + $0x40] sm:$0xff] }
  0x4e   :  { %1918 = vmatprep.subr.bf16.mxu0 %v3521_v25  ;;  %v63_v8 = vld [vmem:[#allocation2 + $0x30] sm:$0xff]  ;;  %v3584_v11 = vld [vmem:[#allocation4 + $0xc] ss:$24 sps:$4 sm:$0xff]   ;;  %v3579_v12 = vld [vmem:[#allocation4 + $0x600] ss:$24 sps:$4 sm:$0xff]  }
  0x4f   :  { %v59_v9 = vld [vmem:[#allocation2 + $0x10] sm:$0xff]  ;;  %v3582_v13 = vld [vmem:[#allocation4 + $0x8] ss:$24 sps:$4 sm:$0xff]   ;;  %v4115_v14 = vpack.c.bf16 %v63_v8, %v57_v6  ;;  %v3593_v20 = vld [vmem:[#allocation4 + $0x664] ss:$24 sps:$4 sm:$0xff]  }
  0x50   :  { %1866 = vmatpush1.bf16.msra.mxu1 %v3523_v26  ;;  %v4117_v15 = vpack.c.bf16 %v65_v10, %v59_v9  ;;  %v3587_v16 = vld [vmem:[#allocation4 + $0x634] ss:$24 sps:$4 sm:$0xff]   ;;  %v3585_v18 = vld [vmem:[#allocation4 + $0x630] ss:$24 sps:$4 sm:$0xff]   ;;  %v3591_v22 = vld [vmem:[#allocation4 + $0x660] ss:$24 sps:$4 sm:$0xff]  }
  0x51   :  { %1919 = vmatpush1.bf16.msra.mxu0 %v3524_v27  ;;  %1867 = vmatprep.subr.bf16.mxu1 %v3525_v28  ;;  %v3590_v17 = vld [vmem:[#allocation4 + $0x3c] ss:$24 sps:$4 sm:$0xff]   ;;  %v3588_v19 = vld [vmem:[#allocation4 + $0x38] ss:$24 sps:$4 sm:$0xff]   ;;  %v3596_v21 = vld [vmem:[#allocation4 + $0x6c] ss:$24 sps:$4 sm:$0xff]  }
  0x52   :  { %1920 = vmatprep.subr.bf16.mxu0 %v3527_v29  ;;  %v3594_v23 = vld [vmem:[#allocation4 + $0x68] ss:$24 sps:$4 sm:$0xff]   ;;  %v3599_v24 = vld [vmem:[#allocation4 + $0x694] ss:$24 sps:$4 sm:$0xff]   ;;  %v3600_v27 = vld [vmem:[#allocation4 + $0x98] ss:$24 sps:$4 sm:$0xff]  }
  0x53   :  { %v3602_v25 = vld [vmem:[#allocation4 + $0x9c] ss:$24 sps:$4 sm:$0xff]   ;;  %v3597_v26 = vld [vmem:[#allocation4 + $0x690] ss:$24 sps:$4 sm:$0xff]   ;;  %v3608_v29 = vld [vmem:[#allocation4 + $0xcc] ss:$24 sps:$4 sm:$0xff]  }
  0x54   :  { %1868 = vmatpush1.bf16.msra.mxu1 %v3529_v30  ;;  %v3605_v28 = vld [vmem:[#allocation4 + $0x6c4] ss:$24 sps:$4 sm:$0xff]   ;;  %v3603_v30 = vld [vmem:[#allocation4 + $0x6c0] ss:$24 sps:$4 sm:$0xff]   ;;  %v75_v50 = vld [vmem:[#allocation2 + $0x90] sm:$0xff] }
  0x55   :  { %1921 = vmatpush1.bf16.msra.mxu0 %v3530_v31  ;;  %1869 = vmatprep.subr.bf16.mxu1 %v3531_v32  ;;  %v3606_v31 = vld [vmem:[#allocation4 + $0xc8] ss:$24 sps:$4 sm:$0xff]   ;;  %v3611_v32 = vld [vmem:[#allocation4 + $0x6f4] ss:$24 sps:$4 sm:$0xff]  }
  0x56   :  { %1922 = vmatprep.subr.bf16.mxu0 %v3533_v33  ;;  %v3614_v33 = vld [vmem:[#allocation4 + $0xfc] ss:$24 sps:$4 sm:$0xff]   ;;  %v3618_v48 = vld [vmem:[#allocation4 + $0x128] ss:$24 sps:$4 sm:$0xff]   ;;  %v3644_v6 = vld [vmem:[#allocation4 + $0x1ec] ss:$24 sps:$4 sm:$0xff]  }
  0x57   :  { %v69_v49 = vld [vmem:[#allocation2 + $0x60] sm:$0xff]  ;;  %v3623_v51 = vld [vmem:[#allocation4 + $0x754] ss:$24 sps:$4 sm:$0xff]  }
  0x58   :  { %1870 = vmatpush1.bf16.msra.mxu1 %v3535_v34  ;;  %v3609_v34 = vld [vmem:[#allocation4 + $0x6f0] ss:$24 sps:$4 sm:$0xff]   ;;  %v3647_v9 = vld [vmem:[#allocation4 + $0x814] ss:$24 sps:$4 sm:$0xff]  }
  0x59   :  { %1923 = vmatpush1.bf16.msra.mxu0 %v3536_v35  ;;  %1871 = vmatprep.subr.bf16.mxu1 %v3537_v36  ;;  %v3612_v35 = vld [vmem:[#allocation4 + $0xf8] ss:$24 sps:$4 sm:$0xff]   ;;  %v3642_v8 = vld [vmem:[#allocation4 + $0x1e8] ss:$24 sps:$4 sm:$0xff]   ;;  %v3650_v10 = vld [vmem:[#allocation4 + $0x21c] ss:$24 sps:$4 sm:$0xff]  }
  0x5a   :  { %1924 = vmatprep.subr.bf16.mxu0 %v3539_v37  ;;  %v72_v36 = vld [vmem:[#allocation2 + $0x78] sm:$0xff]  ;;  %v78_v37 = vld [vmem:[#allocation2 + $0xa8] sm:$0xff] }
  0x5c   :  { %1872 = vmatpush1.bf16.msra.mxu1 %v3541_v38  ;;  %v70_v38 = vld [vmem:[#allocation2 + $0x68] sm:$0xff] }
  0x5d   :  { %1925 = vmatpush1.bf16.msra.mxu0 %v3542_v39  ;;  %1873 = vmatprep.subr.bf16.mxu1 %v3543_v40  ;;  %v76_v39 = vld [vmem:[#allocation2 + $0x98] sm:$0xff]  ;;  %v4121_v40 = vpack.c.bf16 %v78_v37, %v72_v36  ;;  %v3678_v36 = vld [vmem:[#allocation4 + $0x10] ss:$24 sps:$4 sm:$0xff]  }
  0x5e   :  { %1926 = vmatprep.subr.bf16.mxu0 %v3545_v41  ;;  %v4123_v41 = vpack.c.bf16 %v76_v39, %v70_v38  ;;  %v74_v38 = vld [vmem:[#allocation2 + $0x88] sm:$0xff]  ;;  %v80_v39 = vld [vmem:[#allocation2 + $0xb8] sm:$0xff] }
  0x60   :  { %1874 = vmatpush1.bf16.msra.mxu1 %v3547_v42  ;;  %v71_v42 = vld [vmem:[#allocation2 + $0x70] sm:$0xff] }
  0x61   :  { %1927 = vmatpush1.bf16.msra.mxu0 %v3548_v43  ;;  %1875 = vmatprep.subr.bf16.mxu1 %v3549_v44  ;;  %v77_v43 = vld [vmem:[#allocation2 + $0xa0] sm:$0xff] }
  0x62   :  { %1928 = vmatprep.subr.bf16.mxu0 %v3551_v45  ;;  %v3617_v44 = vld [vmem:[#allocation4 + $0x724] ss:$24 sps:$4 sm:$0xff]  }
  0x63   :  { %v3620_v45 = vld [vmem:[#allocation4 + $0x12c] ss:$24 sps:$4 sm:$0xff]  }
  0x64   :  { %1876 = vmatpush1.bf16.msra.mxu1 %v3553_v46  ;;  %v4125_v46 = vpack.c.bf16 %v77_v43, %v71_v42  ;;  %v3683_v42 = vld [vmem:[#allocation4 + $0x33c] ss:$24 sps:$4 sm:$0xff]  }
  0x65   :  { %1929 = vmatpush1.bf16.msra.mxu0 %v3554_v47  ;;  %1877 = vmatprep.subr.bf16.mxu1 %v3555_v52  ;;  %v3615_v47 = vld [vmem:[#allocation4 + $0x720] ss:$24 sps:$4 sm:$0xff]   ;;  %v4130_v52 = vpack.c.bf16 %v75_v50, %v69_v49  ;;  %v3686_v43 = vld [vmem:[#allocation4 + $0x44] ss:$24 sps:$4 sm:$0xff]   ;;  %v79_v49 = vld [vmem:[#allocation2 + $0xb0] sm:$0xff] }
  0x66   :  { %1930 = vmatprep.subr.bf16.mxu0 %v3557_v55  ;;  %v3626_v55 = vld [vmem:[#allocation4 + $0x15c] ss:$24 sps:$4 sm:$0xff]   ;;  %v3689_v50 = vld [vmem:[#allocation4 + $0x36c] ss:$24 sps:$4 sm:$0xff]  }
  0x68   :  { %1878 = vmatpush1.bf16.msra.mxu1 %v3559_v56  ;;  %v62_v56 = vld [vmem:[#allocation2 + $0x28] sm:$0xff] }
  0x69   :  { %1931 = vmatpush1.bf16.msra.mxu0 %v3560_v57  ;;  %1879 = vmatprep.subr.bf16.mxu1 %v3561_v58  ;;  %v3621_v57 = vld [vmem:[#allocation4 + $0x750] ss:$24 sps:$4 sm:$0xff]  }
  0x6a   :  { %1932 = vmatprep.subr.bf16.mxu0 %v3563_v59  ;;  %v3624_v58 = vld [vmem:[#allocation4 + $0x158] ss:$24 sps:$4 sm:$0xff]  }
  0x6b   :  { %v68_v59 = vld [vmem:[#allocation2 + $0x58] sm:$0xff] }
  0x6c   :  { %1880 = vmatpush1.bf16.msra.mxu1 %v3565_v60  ;;  %v3629_v60 = vld [vmem:[#allocation4 + $0x784] ss:$24 sps:$4 sm:$0xff]  }
  0x6d   :  { %1933 = vmatpush1.bf16.msra.mxu0 %v3566_v61  ;;  %1881 = vmatprep.subr.bf16.mxu1 %v3567_v62  ;;  %v4134_v61 = vpack.c.bf16 %v68_v59, %v62_v56  ;;  %v3632_v62 = vld [vmem:[#allocation4 + $0x18c] ss:$24 sps:$4 sm:$0xff]   ;;  %v3687_v56 = vld [vmem:[#allocation4 + $0x368] ss:$24 sps:$4 sm:$0xff]  }
  0x6e   :  { %1934 = vmatprep.subr.bf16.mxu0 %v3569_v63  ;;  %v3627_v63 = vld [vmem:[#allocation4 + $0x780] ss:$24 sps:$4 sm:$0xff]   ;;  %v3698_v59 = vld [vmem:[#allocation4 + $0xa4] ss:$24 sps:$4 sm:$0xff]  }
  0x70   :  { %1882 = vmatpush1.bf16.msra.mxu1 %v3571_v0  ;;  %v3630_v0 = vld [vmem:[#allocation4 + $0x188] ss:$24 sps:$4 sm:$0xff]  }
  0x71   :  { %1935 = vmatpush1.bf16.msra.mxu0 %v3572_v1  ;;  %1883 = vmatprep.subr.bf16.mxu1 %v3573_v2  ;;  %v3635_v1 = vld [vmem:[#allocation4 + $0x7b4] ss:$24 sps:$4 sm:$0xff]  }
  0x72   :  { %1936 = vmatprep.subr.bf16.mxu0 %v3575_v3  ;;  %v3638_v2 = vld [vmem:[#allocation4 + $0x1bc] ss:$24 sps:$4 sm:$0xff]   ;;  %v3633_v3 = vld [vmem:[#allocation4 + $0x7b0] ss:$24 sps:$4 sm:$0xff]  }
  0x74   :  { %1884 = vmatpush1.bf16.msra.mxu1 %v3577_v4  ;;  %v3636_v4 = vld [vmem:[#allocation4 + $0x1b8] ss:$24 sps:$4 sm:$0xff]  }
  0x75   :  { %1937 = vmatpush1.bf16.msra.mxu0 %v3578_v5  ;;  %2012 = vmatprep.subr.bf16.mxu1 %v3584_v11  ;;  %v3641_v5 = vld [vmem:[#allocation4 + $0x7e4] ss:$24 sps:$4 sm:$0xff]   ;;  %v3645_v11 = vld [vmem:[#allocation4 + $0x810] ss:$24 sps:$4 sm:$0xff]  }
  0x76   :  { %1959 = vmatprep.subr.bf16.mxu0 %v3581_v7  ;;  %v3639_v7 = vld [vmem:[#allocation4 + $0x7e0] ss:$24 sps:$4 sm:$0xff]  }
  0x77   :  { %1886 = vmatmul.mubr.bf16.vlgmr.msra.gmra.mrb[0].mxu1 %v4115_v14 }
  0x78   :  { %1939 = vmatmul.mubr.bf16.vlgmr.msra.gmra.mrb[0].mxu0 %v4117_v15  ;;  %2013 = vmatpush1.bf16.msra.mxu1 %v3582_v13  ;;  %v3653_v13 = vld [vmem:[#allocation4 + $0x844] ss:$24 sps:$4 sm:$0xff]  }
  0x79   :  { %1960 = vmatpush1.bf16.msra.mxu0 %v3579_v12  ;;  %2014 = vmatprep.subr.bf16.mxu1 %v3590_v17  ;;  %v3648_v12 = vld [vmem:[#allocation4 + $0x218] ss:$24 sps:$4 sm:$0xff]  }
  0x7a   :  { %1961 = vmatprep.subr.bf16.mxu0 %v3587_v16  ;;  %1948 = vmatprep.mubr.bf16.mxu0 %v4121_v40  ;;  %v3656_v16 = vld [vmem:[#allocation4 + $0x24c] ss:$24 sps:$4 sm:$0xff]   ;;  %v3651_v17 = vld [vmem:[#allocation4 + $0x840] ss:$24 sps:$4 sm:$0xff]  }
  0x7b   :  { %1895 = vmatprep.mubr.bf16.mxu1 %v4123_v41 }
  0x7c   :  { %2015 = vmatpush1.bf16.msra.mxu1 %v3588_v19  ;;  %v3659_v19 = vld [vmem:[#allocation4 + $0x874] ss:$24 sps:$4 sm:$0xff]  }
  0x7d   :  { %1962 = vmatpush1.bf16.msra.mxu0 %v3585_v18  ;;  %2016 = vmatprep.subr.bf16.mxu1 %v3596_v21  ;;  %v3654_v18 = vld [vmem:[#allocation4 + $0x248] ss:$24 sps:$4 sm:$0xff]  }
  0x7e   :  { %1963 = vmatprep.subr.bf16.mxu0 %v3593_v20  ;;  %v3662_v20 = vld [vmem:[#allocation4 + $0x27c] ss:$24 sps:$4 sm:$0xff]   ;;  %v3657_v21 = vld [vmem:[#allocation4 + $0x870] ss:$24 sps:$4 sm:$0xff]  }
  0x7f   :  { %1896 = vmatmul.mubr.bf16.gmra.mrb[4].mxu1 %v4130_v52 }
  0x80   :  { %2017 = vmatpush1.bf16.msra.mxu1 %v3594_v23  ;;  %1949 = vmatmul.mubr.bf16.gmra.mrb[4].mxu0 %v4125_v46  ;;  %v3665_v23 = vld [vmem:[#allocation4 + $0x8a4] ss:$24 sps:$4 sm:$0xff]  }
  0x81   :  { %1964 = vmatpush1.bf16.msra.mxu0 %v3591_v22  ;;  %2018 = vmatprep.subr.bf16.mxu1 %v3602_v25  ;;  %v3660_v22 = vld [vmem:[#allocation4 + $0x278] ss:$24 sps:$4 sm:$0xff]  }
  0x82   :  { %1965 = vmatprep.subr.bf16.mxu0 %v3599_v24  ;;  %2044 = vmatprep.mubr.bf16.mxu1 %v4109_v53  ;;  %v3668_v24 = vld [vmem:[#allocation4 + $0x2ac] ss:$24 sps:$4 sm:$0xff]   ;;  %v3663_v25 = vld [vmem:[#allocation4 + $0x8a0] ss:$24 sps:$4 sm:$0xff]  }
  0x83   :  { %1991 = vmatprep.mubr.bf16.mxu0 %v4134_v61 }
  0x84   :  { %2019 = vmatpush1.bf16.msra.mxu1 %v3600_v27  ;;  %v3671_v27 = vld [vmem:[#allocation4 + $0x8d4] ss:$24 sps:$4 sm:$0xff]  }
  0x85   :  { %1966 = vmatpush1.bf16.msra.mxu0 %v3597_v26  ;;  %2020 = vmatprep.subr.bf16.mxu1 %v3608_v29  ;;  %v3666_v26 = vld [vmem:[#allocation4 + $0x2a8] ss:$24 sps:$4 sm:$0xff]  }
  0x86   :  { %1967 = vmatprep.subr.bf16.mxu0 %v3605_v28  ;;  %v3674_v28 = vld [vmem:[#allocation4 + $0x2dc] ss:$24 sps:$4 sm:$0xff]   ;;  %v3669_v29 = vld [vmem:[#allocation4 + $0x8d0] ss:$24 sps:$4 sm:$0xff]  }
  0x88   :  { %2021 = vmatpush1.bf16.msra.mxu1 %v3606_v31  ;;  %v61_v31 = vld [vmem:[#allocation2 + $0x20] sm:$0xff] }
  0x89   :  { %1968 = vmatpush1.bf16.msra.mxu0 %v3603_v30  ;;  %2022 = vmatprep.subr.bf16.mxu1 %v3614_v33  ;;  %v3672_v30 = vld [vmem:[#allocation4 + $0x2d8] ss:$24 sps:$4 sm:$0xff]   ;;  %v3677_v33 = vld [vmem:[#allocation4 + $0x30c] ss:$24 sps:$4 sm:$0xff]  }
  0x8a   :  { %1969 = vmatprep.subr.bf16.mxu0 %v3611_v32  ;;  %v67_v32 = vld [vmem:[#allocation2 + $0x50] sm:$0xff] }
  0x8b   :  { %v4137_v37 = vpack.c.bf16 %v67_v32, %v61_v31  ;;  %v3744_v31 = vld [vmem:[#allocation4 + $0x220] ss:$24 sps:$4 sm:$0xff]   ;;  %v3749_v32 = vld [vmem:[#allocation4 + $0x54c] ss:$24 sps:$4 sm:$0xff]  }
  0x8c   :  { %2023 = vmatpush1.bf16.msra.mxu1 %v3612_v35  ;;  %v3675_v35 = vld [vmem:[#allocation4 + $0x308] ss:$24 sps:$4 sm:$0xff]  }
  0x8d   :  { %1970 = vmatpush1.bf16.msra.mxu0 %v3609_v34  ;;  %2024 = vmatprep.subr.bf16.mxu1 %v3620_v45  ;;  %v3680_v34 = vld [vmem:[#allocation4 + $0x14] ss:$24 sps:$4 sm:$0xff]   ;;  %v3684_v45 = vld [vmem:[#allocation4 + $0x40] ss:$24 sps:$4 sm:$0xff]  }
  0x8e   :  { %1971 = vmatprep.subr.bf16.mxu0 %v3617_v44  ;;  %v3681_v44 = vld [vmem:[#allocation4 + $0x338] ss:$24 sps:$4 sm:$0xff]  }
  0x90   :  { %2025 = vmatpush1.bf16.msra.mxu1 %v3618_v48  ;;  %v73_v48 = vld [vmem:[#allocation2 + $0x80] sm:$0xff] }
  0x91   :  { %1972 = vmatpush1.bf16.msra.mxu0 %v3615_v47  ;;  %2026 = vmatprep.subr.bf16.mxu1 %v3626_v55  ;;  %v4139_v47 = vpack.c.bf16 %v80_v39, %v74_v38  ;;  %v4145_v55 = vpack.c.bf16 %v79_v49, %v73_v48  ;;  %v3758_v38 = vld [vmem:[#allocation4 + $0x284] ss:$24 sps:$4 sm:$0xff]   ;;  %v3753_v39 = vld [vmem:[#allocation4 + $0x578] ss:$24 sps:$4 sm:$0xff]  }
  0x92   :  { %1973 = vmatprep.subr.bf16.mxu0 %v3623_v51  ;;  %v3692_v51 = vld [vmem:[#allocation4 + $0x74] ss:$24 sps:$4 sm:$0xff]   ;;  %v3762_v48 = vld [vmem:[#allocation4 + $0x2b0] ss:$24 sps:$4 sm:$0xff]  }
  0x93   :  { %v3767_v49 = vld [vmem:[#allocation4 + $0x5dc] ss:$24 sps:$4 sm:$0xff]  }
  0x94   :  { %2027 = vmatpush1.bf16.msra.mxu1 %v3624_v58  ;;  %v3695_v58 = vld [vmem:[#allocation4 + $0x39c] ss:$24 sps:$4 sm:$0xff]  }
  0x95   :  { %1974 = vmatpush1.bf16.msra.mxu0 %v3621_v57  ;;  %2028 = vmatprep.subr.bf16.mxu1 %v3632_v62  ;;  %v3690_v57 = vld [vmem:[#allocation4 + $0x70] ss:$24 sps:$4 sm:$0xff]   ;;  %v3696_v62 = vld [vmem:[#allocation4 + $0xa0] ss:$24 sps:$4 sm:$0xff]  }
  0x96   :  { %1975 = vmatprep.subr.bf16.mxu0 %v3629_v60  ;;  %v3693_v60 = vld [vmem:[#allocation4 + $0x398] ss:$24 sps:$4 sm:$0xff]  }
  0x98   :  { %2029 = vmatpush1.bf16.msra.mxu1 %v3630_v0  ;;  %v3704_v0 = vld [vmem:[#allocation4 + $0xd4] ss:$24 sps:$4 sm:$0xff]  }
  0x99   :  { %1976 = vmatpush1.bf16.msra.mxu0 %v3627_v63  ;;  %2030 = vmatprep.subr.bf16.mxu1 %v3638_v2  ;;  %v3701_v63 = vld [vmem:[#allocation4 + $0x3cc] ss:$24 sps:$4 sm:$0xff]   ;;  %v3702_v2 = vld [vmem:[#allocation4 + $0xd0] ss:$24 sps:$4 sm:$0xff]  }
  0x9a   :  { %1977 = vmatprep.subr.bf16.mxu0 %v3635_v1  ;;  %v3699_v1 = vld [vmem:[#allocation4 + $0x3c8] ss:$24 sps:$4 sm:$0xff]  }
  0x9c   :  { %2031 = vmatpush1.bf16.msra.mxu1 %v3636_v4  ;;  %v3710_v4 = vld [vmem:[#allocation4 + $0x104] ss:$24 sps:$4 sm:$0xff]  }
  0x9d   :  { %1978 = vmatpush1.bf16.msra.mxu0 %v3633_v3  ;;  %2032 = vmatprep.subr.bf16.mxu1 %v3644_v6  ;;  %v3707_v3 = vld [vmem:[#allocation4 + $0x3fc] ss:$24 sps:$4 sm:$0xff]   ;;  %v3708_v6 = vld [vmem:[#allocation4 + $0x100] ss:$24 sps:$4 sm:$0xff]  }
  0x9e   :  { %1979 = vmatprep.subr.bf16.mxu0 %v3641_v5  ;;  %v3705_v5 = vld [vmem:[#allocation4 + $0x3f8] ss:$24 sps:$4 sm:$0xff]  }
  0xa0   :  { %2033 = vmatpush1.bf16.msra.mxu1 %v3642_v8  ;;  %v3716_v8 = vld [vmem:[#allocation4 + $0x134] ss:$24 sps:$4 sm:$0xff]  }
  0xa1   :  { %1980 = vmatpush1.bf16.msra.mxu0 %v3639_v7  ;;  %2034 = vmatprep.subr.bf16.mxu1 %v3650_v10  ;;  %v3713_v7 = vld [vmem:[#allocation4 + $0x42c] ss:$24 sps:$4 sm:$0xff]   ;;  %v3714_v10 = vld [vmem:[#allocation4 + $0x130] ss:$24 sps:$4 sm:$0xff]  }
  0xa2   :  { %1981 = vmatprep.subr.bf16.mxu0 %v3647_v9  ;;  %v3711_v9 = vld [vmem:[#allocation4 + $0x428] ss:$24 sps:$4 sm:$0xff]  }
  0xa4   :  { %2035 = vmatpush1.bf16.msra.mxu1 %v3648_v12  ;;  %v3717_v12 = vld [vmem:[#allocation4 + $0x458] ss:$24 sps:$4 sm:$0xff]  }
  0xa5   :  { %1982 = vmatpush1.bf16.msra.mxu0 %v3645_v11  ;;  %2036 = vmatprep.subr.bf16.mxu1 %v3656_v16  ;;  %v3722_v11 = vld [vmem:[#allocation4 + $0x164] ss:$24 sps:$4 sm:$0xff]  }
  0xa6   :  { %1983 = vmatprep.subr.bf16.mxu0 %v3653_v13  ;;  %v3720_v13 = vld [vmem:[#allocation4 + $0x160] ss:$24 sps:$4 sm:$0xff]   ;;  %v3725_v16 = vld [vmem:[#allocation4 + $0x48c] ss:$24 sps:$4 sm:$0xff]  }
  0xa8   :  { %2037 = vmatpush1.bf16.msra.mxu1 %v3654_v18  ;;  %v3723_v18 = vld [vmem:[#allocation4 + $0x488] ss:$24 sps:$4 sm:$0xff]  }
  0xa9   :  { %1984 = vmatpush1.bf16.msra.mxu0 %v3651_v17  ;;  %2038 = vmatprep.subr.bf16.mxu1 %v3662_v20  ;;  %v3728_v17 = vld [vmem:[#allocation4 + $0x194] ss:$24 sps:$4 sm:$0xff]  }
  0xaa   :  { %1985 = vmatprep.subr.bf16.mxu0 %v3659_v19  ;;  %v3726_v19 = vld [vmem:[#allocation4 + $0x190] ss:$24 sps:$4 sm:$0xff]   ;;  %v3731_v20 = vld [vmem:[#allocation4 + $0x4bc] ss:$24 sps:$4 sm:$0xff]  }
  0xac   :  { %2039 = vmatpush1.bf16.msra.mxu1 %v3660_v22  ;;  %v3729_v22 = vld [vmem:[#allocation4 + $0x4b8] ss:$24 sps:$4 sm:$0xff]  }
  0xad   :  { %1986 = vmatpush1.bf16.msra.mxu0 %v3657_v21  ;;  %2040 = vmatprep.subr.bf16.mxu1 %v3668_v24  ;;  %v3734_v21 = vld [vmem:[#allocation4 + $0x1c4] ss:$24 sps:$4 sm:$0xff]  }
  0xae   :  { %1987 = vmatprep.subr.bf16.mxu0 %v3665_v23  ;;  %v3732_v23 = vld [vmem:[#allocation4 + $0x1c0] ss:$24 sps:$4 sm:$0xff]   ;;  %v3737_v24 = vld [vmem:[#allocation4 + $0x4ec] ss:$24 sps:$4 sm:$0xff]  }
  0xb0   :  { %2041 = vmatpush1.bf16.msra.mxu1 %v3666_v26  ;;  %v3735_v26 = vld [vmem:[#allocation4 + $0x4e8] ss:$24 sps:$4 sm:$0xff]  }
  0xb1   :  { %1988 = vmatpush1.bf16.msra.mxu0 %v3663_v25  ;;  %2042 = vmatprep.subr.bf16.mxu1 %v3674_v28  ;;  %v3740_v25 = vld [vmem:[#allocation4 + $0x1f4] ss:$24 sps:$4 sm:$0xff]  }
  0xb2   :  { %1989 = vmatprep.subr.bf16.mxu0 %v3671_v27  ;;  %v3738_v27 = vld [vmem:[#allocation4 + $0x1f0] ss:$24 sps:$4 sm:$0xff]   ;;  %v3743_v28 = vld [vmem:[#allocation4 + $0x51c] ss:$24 sps:$4 sm:$0xff]  }
  0xb4   :  { %2043 = vmatpush1.bf16.msra.mxu1 %v3672_v30  ;;  %v3741_v30 = vld [vmem:[#allocation4 + $0x518] ss:$24 sps:$4 sm:$0xff]  }
  0xb5   :  { %1990 = vmatpush1.bf16.msra.mxu0 %v3669_v29  ;;  %2065 = vmatprep.subr.bf16.mxu1 %v3677_v33  ;;  %v3746_v29 = vld [vmem:[#allocation4 + $0x224] ss:$24 sps:$4 sm:$0xff]   ;;  %v3752_v33 = vld [vmem:[#allocation4 + $0x254] ss:$24 sps:$4 sm:$0xff]  }
  0xb6   :  { %2171 = vmatprep.subr.bf16.mxu0 %v3680_v34  ;;  %v3747_v34 = vld [vmem:[#allocation4 + $0x548] ss:$24 sps:$4 sm:$0xff]  }
  0xb7   :  { %2045 = vmatmul.mubr.bf16.vlgmr.msra.gmra.mrb[8].mxu1 %v4115_v14 }
  0xb8   :  { %1992 = vmatmul.mubr.bf16.vlgmr.msra.gmra.mrb[0].mxu0 %v4137_v37  ;;  %2066 = vmatpush1.bf16.msra.mxu1 %v3675_v35  ;;  %v3750_v35 = vld [vmem:[#allocation4 + $0x250] ss:$24 sps:$4 sm:$0xff]  }
  0xb9   :  { %2172 = vmatpush1.bf16.msra.mxu0 %v3678_v36  ;;  %2067 = vmatprep.subr.bf16.mxu1 %v3683_v42  ;;  %v3755_v36 = vld [vmem:[#allocation4 + $0x57c] ss:$24 sps:$4 sm:$0xff]   ;;  %v3756_v42 = vld [vmem:[#allocation4 + $0x280] ss:$24 sps:$4 sm:$0xff]  }
  0xba   :  { %2173 = vmatprep.subr.bf16.mxu0 %v3686_v43  ;;  %2001 = vmatprep.mubr.bf16.mxu0 %v4139_v47  ;;  %v3761_v43 = vld [vmem:[#allocation4 + $0x5ac] ss:$24 sps:$4 sm:$0xff]  }
  0xbb   :  { %2054 = vmatprep.mubr.bf16.mxu1 %v4123_v41 }
  0xbc   :  { %2068 = vmatpush1.bf16.msra.mxu1 %v3681_v44  ;;  %v3764_v44 = vld [vmem:[#allocation4 + $0x2b4] ss:$24 sps:$4 sm:$0xff]  }
  0xbd   :  { %2174 = vmatpush1.bf16.msra.mxu0 %v3684_v45  ;;  %2069 = vmatprep.subr.bf16.mxu1 %v3689_v50  ;;  %v3759_v45 = vld [vmem:[#allocation4 + $0x5a8] ss:$24 sps:$4 sm:$0xff]   ;;  %v3770_v50 = vld [vmem:[#allocation4 + $0x2e4] ss:$24 sps:$4 sm:$0xff]  }
  0xbe   :  { %2175 = vmatprep.subr.bf16.mxu0 %v3692_v51  ;;  %v3765_v51 = vld [vmem:[#allocation4 + $0x5d8] ss:$24 sps:$4 sm:$0xff]  }
  0xbf   :  { %2055 = vmatmul.mubr.bf16.gmra.mrb[12].mxu1 %v4130_v52 }
  0xc0   :  { %2002 = vmatmul.mubr.bf16.gmra.mrb[4].mxu0 %v4145_v55  ;;  %2070 = vmatpush1.bf16.msra.mxu1 %v3687_v56  ;;  %v3768_v56 = vld [vmem:[#allocation4 + $0x2e0] ss:$24 sps:$4 sm:$0xff]  }
  0xc1   :  { %2176 = vmatpush1.bf16.msra.mxu0 %v3690_v57  ;;  %2071 = vmatprep.subr.bf16.mxu1 %v3695_v58  ;;  %v3773_v57 = vld [vmem:[#allocation4 + $0x60c] ss:$24 sps:$4 sm:$0xff]  }
  0xc2   :  { %2177 = vmatprep.subr.bf16.mxu0 %v3698_v59  ;;  %2097 = vmatprep.mubr.bf16.mxu1 %v4111_v54  ;;  %v3776_v58 = vld [vmem:[#allocation4 + $0x314] ss:$24 sps:$4 sm:$0xff]   ;;  %v3771_v59 = vld [vmem:[#allocation4 + $0x608] ss:$24 sps:$4 sm:$0xff]  }
  0xc3   :  { %2203 = vmatprep.mubr.bf16.mxu0 %v4109_v53  ;;  %v3719_v53 = vld [vmem:[#allocation4 + $0x45c] ss:$24 sps:$4 sm:$0xff]  }
  0xc4   :  { %2072 = vmatpush1.bf16.msra.mxu1 %v3693_v60  ;;  %v3774_v60 = vld [vmem:[#allocation4 + $0x310] ss:$24 sps:$4 sm:$0xff]  }
  0xc5   :  { %2178 = vmatpush1.bf16.msra.mxu0 %v3696_v62  ;;  %2073 = vmatprep.subr.bf16.mxu1 %v3701_v63  ;;  %v3779_v62 = vld [vmem:[#allocation4 + $0x63c] ss:$24 sps:$4 sm:$0xff]  }
  0xc6   :  { %2179 = vmatprep.subr.bf16.mxu0 %v3704_v0  ;;  %v3782_v63 = vld [vmem:[#allocation4 + $0x344] ss:$24 sps:$4 sm:$0xff]   ;;  %v3777_v0 = vld [vmem:[#allocation4 + $0x638] ss:$24 sps:$4 sm:$0xff]  }
  0xc8   :  { %2074 = vmatpush1.bf16.msra.mxu1 %v3699_v1  ;;  %v3780_v1 = vld [vmem:[#allocation4 + $0x340] ss:$24 sps:$4 sm:$0xff]  }
  0xc9   :  { %2180 = vmatpush1.bf16.msra.mxu0 %v3702_v2  ;;  %2075 = vmatprep.subr.bf16.mxu1 %v3707_v3  ;;  %v3785_v2 = vld [vmem:[#allocation4 + $0x66c] ss:$24 sps:$4 sm:$0xff]  }
  0xca   :  { %2181 = vmatprep.subr.bf16.mxu0 %v3710_v4  ;;  %v3788_v3 = vld [vmem:[#allocation4 + $0x374] ss:$24 sps:$4 sm:$0xff]   ;;  %v3783_v4 = vld [vmem:[#allocation4 + $0x668] ss:$24 sps:$4 sm:$0xff]  }
  0xcc   :  { %2076 = vmatpush1.bf16.msra.mxu1 %v3705_v5  ;;  %v3786_v5 = vld [vmem:[#allocation4 + $0x370] ss:$24 sps:$4 sm:$0xff]  }
  0xcd   :  { %2182 = vmatpush1.bf16.msra.mxu0 %v3708_v6  ;;  %2077 = vmatprep.subr.bf16.mxu1 %v3713_v7  ;;  %v3791_v6 = vld [vmem:[#allocation4 + $0x69c] ss:$24 sps:$4 sm:$0xff]  }
  0xce   :  { %2183 = vmatprep.subr.bf16.mxu0 %v3716_v8  ;;  %v3794_v7 = vld [vmem:[#allocation4 + $0x3a4] ss:$24 sps:$4 sm:$0xff]   ;;  %v3792_v8 = vld [vmem:[#allocation4 + $0x3a0] ss:$24 sps:$4 sm:$0xff]  }
  0xd0   :  { %2078 = vmatpush1.bf16.msra.mxu1 %v3711_v9  ;;  %v3797_v9 = vld [vmem:[#allocation4 + $0x6cc] ss:$24 sps:$4 sm:$0xff]  }
  0xd1   :  { %2184 = vmatpush1.bf16.msra.mxu0 %v3714_v10  ;;  %2079 = vmatprep.subr.bf16.mxu1 %v3719_v53  ;;  %v3800_v10 = vld [vmem:[#allocation4 + $0x3d4] ss:$24 sps:$4 sm:$0xff]   ;;  %v3795_v53 = vld [vmem:[#allocation4 + $0x6c8] ss:$24 sps:$4 sm:$0xff]  }
  0xd2   :  { %2185 = vmatprep.subr.bf16.mxu0 %v3722_v11  ;;  %v3803_v11 = vld [vmem:[#allocation4 + $0x6fc] ss:$24 sps:$4 sm:$0xff]  }
  0xd4   :  { %2080 = vmatpush1.bf16.msra.mxu1 %v3717_v12  ;;  %v3806_v12 = vld [vmem:[#allocation4 + $0x404] ss:$24 sps:$4 sm:$0xff]  }
  0xd5   :  { %2186 = vmatpush1.bf16.msra.mxu0 %v3720_v13  ;;  %2081 = vmatprep.subr.bf16.mxu1 %v3725_v16  ;;  %v3801_v13 = vld [vmem:[#allocation4 + $0x6f8] ss:$24 sps:$4 sm:$0xff]  }
  0xd6   :  { %2187 = vmatprep.subr.bf16.mxu0 %v3728_v17  ;;  %v3804_v16 = vld [vmem:[#allocation4 + $0x400] ss:$24 sps:$4 sm:$0xff]   ;;  %v3812_v17 = vld [vmem:[#allocation4 + $0x434] ss:$24 sps:$4 sm:$0xff]  }
  0xd8   :  { %2082 = vmatpush1.bf16.msra.mxu1 %v3723_v18  ;;  %v3807_v18 = vld [vmem:[#allocation4 + $0x728] ss:$24 sps:$4 sm:$0xff]  }
  0xd9   :  { %2188 = vmatpush1.bf16.msra.mxu0 %v3726_v19  ;;  %2083 = vmatprep.subr.bf16.mxu1 %v3731_v20  ;;  %v3810_v19 = vld [vmem:[#allocation4 + $0x430] ss:$24 sps:$4 sm:$0xff]   ;;  %v3815_v20 = vld [vmem:[#allocation4 + $0x75c] ss:$24 sps:$4 sm:$0xff]  }
  0xda   :  { %2189 = vmatprep.subr.bf16.mxu0 %v3734_v21  ;;  %v3818_v21 = vld [vmem:[#allocation4 + $0x464] ss:$24 sps:$4 sm:$0xff]  }
  0xdc   :  { %2084 = vmatpush1.bf16.msra.mxu1 %v3729_v22  ;;  %v3816_v22 = vld [vmem:[#allocation4 + $0x460] ss:$24 sps:$4 sm:$0xff]  }
  0xdd   :  { %2190 = vmatpush1.bf16.msra.mxu0 %v3732_v23  ;;  %2085 = vmatprep.subr.bf16.mxu1 %v3737_v24  ;;  %v3821_v23 = vld [vmem:[#allocation4 + $0x78c] ss:$24 sps:$4 sm:$0xff]  }
  0xde   :  { %2191 = vmatprep.subr.bf16.mxu0 %v3740_v25  ;;  %v3824_v24 = vld [vmem:[#allocation4 + $0x494] ss:$24 sps:$4 sm:$0xff]   ;;  %v3819_v25 = vld [vmem:[#allocation4 + $0x788] ss:$24 sps:$4 sm:$0xff]  }
  0xe0   :  { %2086 = vmatpush1.bf16.msra.mxu1 %v3735_v26  ;;  %v3822_v26 = vld [vmem:[#allocation4 + $0x490] ss:$24 sps:$4 sm:$0xff]  }
  0xe1   :  { %2192 = vmatpush1.bf16.msra.mxu0 %v3738_v27  ;;  %2087 = vmatprep.subr.bf16.mxu1 %v3743_v28  ;;  %v3827_v27 = vld [vmem:[#allocation4 + $0x7bc] ss:$24 sps:$4 sm:$0xff]  }
  0xe2   :  { %2193 = vmatprep.subr.bf16.mxu0 %v3746_v29  ;;  %v3830_v28 = vld [vmem:[#allocation4 + $0x4c4] ss:$24 sps:$4 sm:$0xff]   ;;  %v3825_v29 = vld [vmem:[#allocation4 + $0x7b8] ss:$24 sps:$4 sm:$0xff]  }
  0xe4   :  { %2088 = vmatpush1.bf16.msra.mxu1 %v3741_v30  ;;  %v3828_v30 = vld [vmem:[#allocation4 + $0x4c0] ss:$24 sps:$4 sm:$0xff]  }
  0xe5   :  { %2194 = vmatpush1.bf16.msra.mxu0 %v3744_v31  ;;  %2089 = vmatprep.subr.bf16.mxu1 %v3749_v32  ;;  %v3833_v31 = vld [vmem:[#allocation4 + $0x7ec] ss:$24 sps:$4 sm:$0xff]  }
  0xe6   :  { %2195 = vmatprep.subr.bf16.mxu0 %v3752_v33  ;;  %v3836_v32 = vld [vmem:[#allocation4 + $0x4f4] ss:$24 sps:$4 sm:$0xff]   ;;  %v3831_v33 = vld [vmem:[#allocation4 + $0x7e8] ss:$24 sps:$4 sm:$0xff]  }
  0xe8   :  { %2090 = vmatpush1.bf16.msra.mxu1 %v3747_v34  ;;  %v3834_v34 = vld [vmem:[#allocation4 + $0x4f0] ss:$24 sps:$4 sm:$0xff]  }
  0xe9   :  { %2196 = vmatpush1.bf16.msra.mxu0 %v3750_v35  ;;  %2091 = vmatprep.subr.bf16.mxu1 %v3755_v36  ;;  %v3839_v35 = vld [vmem:[#allocation4 + $0x81c] ss:$24 sps:$4 sm:$0xff]  }
  0xea   :  { %2197 = vmatprep.subr.bf16.mxu0 %v3758_v38  ;;  %v3842_v36 = vld [vmem:[#allocation4 + $0x524] ss:$24 sps:$4 sm:$0xff]   ;;  %v3837_v38 = vld [vmem:[#allocation4 + $0x818] ss:$24 sps:$4 sm:$0xff]  }
  0xec   :  { %2092 = vmatpush1.bf16.msra.mxu1 %v3753_v39  ;;  %v3840_v39 = vld [vmem:[#allocation4 + $0x520] ss:$24 sps:$4 sm:$0xff]  }
  0xed   :  { %2198 = vmatpush1.bf16.msra.mxu0 %v3756_v42  ;;  %2093 = vmatprep.subr.bf16.mxu1 %v3761_v43  ;;  %v3845_v42 = vld [vmem:[#allocation4 + $0x84c] ss:$24 sps:$4 sm:$0xff]  }
  0xee   :  { %2199 = vmatprep.subr.bf16.mxu0 %v3764_v44  ;;  %v3848_v43 = vld [vmem:[#allocation4 + $0x554] ss:$24 sps:$4 sm:$0xff]   ;;  %v3843_v44 = vld [vmem:[#allocation4 + $0x848] ss:$24 sps:$4 sm:$0xff]  }
  0xf0   :  { %2094 = vmatpush1.bf16.msra.mxu1 %v3759_v45  ;;  %v3846_v45 = vld [vmem:[#allocation4 + $0x550] ss:$24 sps:$4 sm:$0xff]  }
  0xf1   :  { %2200 = vmatpush1.bf16.msra.mxu0 %v3762_v48  ;;  %2095 = vmatprep.subr.bf16.mxu1 %v3767_v49  ;;  %v3851_v48 = vld [vmem:[#allocation4 + $0x87c] ss:$24 sps:$4 sm:$0xff]  }
  0xf2   :  { %2201 = vmatprep.subr.bf16.mxu0 %v3770_v50  ;;  %v3854_v49 = vld [vmem:[#allocation4 + $0x584] ss:$24 sps:$4 sm:$0xff]   ;;  %v3849_v50 = vld [vmem:[#allocation4 + $0x878] ss:$24 sps:$4 sm:$0xff]  }
  0xf4   :  { %2096 = vmatpush1.bf16.msra.mxu1 %v3765_v51  ;;  %v3852_v51 = vld [vmem:[#allocation4 + $0x580] ss:$24 sps:$4 sm:$0xff]  }
  0xf5   :  { %2202 = vmatpush1.bf16.msra.mxu0 %v3768_v56  ;;  %2118 = vmatprep.subr.bf16.mxu1 %v3773_v57  ;;  %v3857_v56 = vld [vmem:[#allocation4 + $0x8ac] ss:$24 sps:$4 sm:$0xff]  }
  0xf6   :  { %2224 = vmatprep.subr.bf16.mxu0 %v3776_v58  ;;  %v3860_v57 = vld [vmem:[#allocation4 + $0x5b4] ss:$24 sps:$4 sm:$0xff]   ;;  %v3855_v58 = vld [vmem:[#allocation4 + $0x8a8] ss:$24 sps:$4 sm:$0xff]  }
  0xf7   :  { %2098 = vmatmul.mubr.bf16.vlgmr.msra.gmra.mrb[8].mxu1 %v4117_v15 }
  0xf8   :  { %2204 = vmatmul.mubr.bf16.vlgmr.msra.gmra.mrb[8].mxu0 %v4115_v14  ;;  %2119 = vmatpush1.bf16.msra.mxu1 %v3771_v59  ;;  %v3789_v14 = vld [vmem:[#allocation4 + $0x698] ss:$24 sps:$4 sm:$0xff]  }
  0xf9   :  { %2225 = vmatpush1.bf16.msra.mxu0 %v3774_v60  ;;  %2120 = vmatprep.subr.bf16.mxu1 %v3779_v62  ;;  %v3858_v59 = vld [vmem:[#allocation4 + $0x5b0] ss:$24 sps:$4 sm:$0xff]   ;;  %v3863_v60 = vld [vmem:[#allocation4 + $0x8dc] ss:$24 sps:$4 sm:$0xff]  }
  0xfa   :  { %2226 = vmatprep.subr.bf16.mxu0 %v3782_v63  ;;  %2107 = vmatprep.mubr.bf16.mxu1 %v4121_v40  ;;  %v3866_v62 = vld [vmem:[#allocation4 + $0x5e4] ss:$24 sps:$4 sm:$0xff]   ;;  %v3861_v63 = vld [vmem:[#allocation4 + $0x8d8] ss:$24 sps:$4 sm:$0xff]  }
  0xfb   :  { %2213 = vmatprep.mubr.bf16.mxu0 %v4123_v41  ;;  %v3798_v41 = vld [vmem:[#allocation4 + $0x3d0] ss:$24 sps:$4 sm:$0xff]  }
  0xfc   :  { %2121 = vmatpush1.bf16.msra.mxu1 %v3777_v0  ;;  %v3864_v0 = vld [vmem:[#allocation4 + $0x5e0] ss:$24 sps:$4 sm:$0xff]  }
  0xfd   :  { %2227 = vmatpush1.bf16.msra.mxu0 %v3780_v1  ;;  %2122 = vmatprep.subr.bf16.mxu1 %v3785_v2  ;;  %v3869_v1 = vld [vmem:[#allocation4 + $0x614] ss:$24 sps:$4 sm:$0xff]   ;;  %v3867_v2 = vld [vmem:[#allocation4 + $0x610] ss:$24 sps:$4 sm:$0xff]  }
  0xfe   :  { %2228 = vmatprep.subr.bf16.mxu0 %v3788_v3  ;;  %v3872_v3 = vld [vmem:[#allocation4 + $0x644] ss:$24 sps:$4 sm:$0xff]  }
  0xff   :  { %2108 = vmatmul.mubr.bf16.gmra.mrb[12].mxu1 %v4125_v46 }
 0x100   :  { %2214 = vmatmul.mubr.bf16.gmra.mrb[12].mxu0 %v4130_v52  ;;  %2123 = vmatpush1.bf16.msra.mxu1 %v3783_v4  ;;  %v3809_v52 = vld [vmem:[#allocation4 + $0x72c] ss:$24 sps:$4 sm:$0xff]   ;;  %v3870_v4 = vld [vmem:[#allocation4 + $0x640] ss:$24 sps:$4 sm:$0xff]  }
 0x101   :  { %2229 = vmatpush1.bf16.msra.mxu0 %v3786_v5  ;;  %2124 = vmatprep.subr.bf16.mxu1 %v3791_v6  ;;  %v3875_v5 = vld [vmem:[#allocation4 + $0x674] ss:$24 sps:$4 sm:$0xff]   ;;  %v3873_v6 = vld [vmem:[#allocation4 + $0x670] ss:$24 sps:$4 sm:$0xff]  }
 0x102   :  { %2230 = vmatprep.subr.bf16.mxu0 %v3794_v7  ;;  %2150 = vmatprep.mubr.bf16.mxu1 %v4134_v61  ;;  %v3878_v7 = vld [vmem:[#allocation4 + $0x6a4] ss:$24 sps:$4 sm:$0xff]  }
 0x103   :  { %2256 = vmatprep.mubr.bf16.mxu0 %v4111_v54  ;;  %v3813_v54 = vld [vmem:[#allocation4 + $0x758] ss:$24 sps:$4 sm:$0xff]  }
 0x104   :  { %2125 = vmatpush1.bf16.msra.mxu1 %v3789_v14  ;;  %v3876_v14 = vld [vmem:[#allocation4 + $0x6a0] ss:$24 sps:$4 sm:$0xff]  }
 0x105   :  { %2231 = vmatpush1.bf16.msra.mxu0 %v3792_v8  ;;  %2126 = vmatprep.subr.bf16.mxu1 %v3797_v9  ;;  %v3879_v8 = vld [vmem:[#allocation4 + $0x6d0] ss:$24 sps:$4 sm:$0xff]   ;;  %v3884_v9 = vld [vmem:[#allocation4 + $0x704] ss:$24 sps:$4 sm:$0xff]  }
 0x106   :  { %2232 = vmatprep.subr.bf16.mxu0 %v3800_v10  ;;  %v3887_v10 = vld [vmem:[#allocation4 + $0x734] ss:$24 sps:$4 sm:$0xff]  }
 0x108   :  { %2127 = vmatpush1.bf16.msra.mxu1 %v3795_v53 }
 0x109   :  { %2233 = vmatpush1.bf16.msra.mxu0 %v3798_v41  ;;  %2128 = vmatprep.subr.bf16.mxu1 %v3803_v11  ;;  %v3885_v11 = vld [vmem:[#allocation4 + $0x730] ss:$24 sps:$4 sm:$0xff]  }
 0x10a   :  { %2234 = vmatprep.subr.bf16.mxu0 %v3806_v12 }
 0x10c   :  { %2129 = vmatpush1.bf16.msra.mxu1 %v3801_v13 }
 0x10d   :  { %2235 = vmatpush1.bf16.msra.mxu0 %v3804_v16  ;;  %2130 = vmatprep.subr.bf16.mxu1 %v3809_v52  ;;  %v3893_v16 = vld [vmem:[#allocation4 + $0x794] ss:$24 sps:$4 sm:$0xff]   ;;  %v3891_v52 = vld [vmem:[#allocation4 + $0x790] ss:$24 sps:$4 sm:$0xff]  }
 0x10e   :  { %2236 = vmatprep.subr.bf16.mxu0 %v3812_v17  ;;  %v3896_v17 = vld [vmem:[#allocation4 + $0x7c4] ss:$24 sps:$4 sm:$0xff]  }
 0x110   :  { %2131 = vmatpush1.bf16.msra.mxu1 %v3807_v18  ;;  %v3894_v18 = vld [vmem:[#allocation4 + $0x7c0] ss:$24 sps:$4 sm:$0xff]  }
 0x111   :  { %2237 = vmatpush1.bf16.msra.mxu0 %v3810_v19  ;;  %2132 = vmatprep.subr.bf16.mxu1 %v3815_v20  ;;  %v3899_v19 = vld [vmem:[#allocation4 + $0x7f4] ss:$24 sps:$4 sm:$0xff]   ;;  %v3897_v20 = vld [vmem:[#allocation4 + $0x7f0] ss:$24 sps:$4 sm:$0xff]  }
 0x112   :  { %2238 = vmatprep.subr.bf16.mxu0 %v3818_v21  ;;  %v3902_v21 = vld [vmem:[#allocation4 + $0x824] ss:$24 sps:$4 sm:$0xff]  }
 0x114   :  { %2133 = vmatpush1.bf16.msra.mxu1 %v3813_v54  ;;  %v3900_v54 = vld [vmem:[#allocation4 + $0x820] ss:$24 sps:$4 sm:$0xff]  }
 0x115   :  { %2239 = vmatpush1.bf16.msra.mxu0 %v3816_v22  ;;  %2134 = vmatprep.subr.bf16.mxu1 %v3821_v23  ;;  %v3905_v22 = vld [vmem:[#allocation4 + $0x854] ss:$24 sps:$4 sm:$0xff]  }
 0x116   :  { %2240 = vmatprep.subr.bf16.mxu0 %v3824_v24 }
 0x118   :  { %2135 = vmatpush1.bf16.msra.mxu1 %v3819_v25 }
 0x119   :  { %2241 = vmatpush1.bf16.msra.mxu0 %v3822_v26  ;;  %2136 = vmatprep.subr.bf16.mxu1 %v3827_v27  ;;  %v3903_v26 = vld [vmem:[#allocation4 + $0x850] ss:$24 sps:$4 sm:$0xff]  }
 0x11a   :  { %2242 = vmatprep.subr.bf16.mxu0 %v3830_v28  ;;  %v3908_v28 = vld [vmem:[#allocation4 + $0x884] ss:$24 sps:$4 sm:$0xff]  }
 0x11c   :  { %2137 = vmatpush1.bf16.msra.mxu1 %v3825_v29  ;;  %v3906_v29 = vld [vmem:[#allocation4 + $0x880] ss:$24 sps:$4 sm:$0xff]  }
 0x11d   :  { %2243 = vmatpush1.bf16.msra.mxu0 %v3828_v30  ;;  %2138 = vmatprep.subr.bf16.mxu1 %v3833_v31  ;;  %v3911_v30 = vld [vmem:[#allocation4 + $0x8b4] ss:$24 sps:$4 sm:$0xff]   ;;  %v3909_v31 = vld [vmem:[#allocation4 + $0x8b0] ss:$24 sps:$4 sm:$0xff]  }
 0x11e   :  { %2244 = vmatprep.subr.bf16.mxu0 %v3836_v32  ;;  %v3914_v32 = vld [vmem:[#allocation4 + $0x8e4] ss:$24 sps:$4 sm:$0xff]  }
 0x120   :  { %2139 = vmatpush1.bf16.msra.mxu1 %v3831_v33  ;;  %v3912_v33 = vld [vmem:[#allocation4 + $0x8e0] ss:$24 sps:$4 sm:$0xff]  }
 0x121   :  { %2245 = vmatpush1.bf16.msra.mxu0 %v3834_v34  ;;  %2140 = vmatprep.subr.bf16.mxu1 %v3839_v35  ;;  %v383_v34 = vlaneseq }
 0x122   :  { %2246 = vmatprep.subr.bf16.mxu0 %v3842_v36 }
 0x123   :  { %v4168_v35 = vshrl.u32 %v383_v34, 7 }
 0x124   :  { %2141 = vmatpush1.bf16.msra.mxu1 %v3837_v38  ;;  %v4172_v38 = vld [vmem:[#allocation6] sm:$0x3f] }
 0x125   :  { %2247 = vmatpush1.bf16.msra.mxu0 %v3840_v39  ;;  %2142 = vmatprep.subr.bf16.mxu1 %v3845_v42  ;;  %v385_v36 = vsub.s32 0, %v4168_v35  ;;  %v389_v39 = vsub.s32 1, %v4168_v35 }
 0x126   :  { %2248 = vmatprep.subr.bf16.mxu0 %v3848_v43 }
 0x127   :  { %v386_v42 = vrot.slane %v4172_v38, %v385_v36  ;;  %v390_v43 = vrot.slane %v4172_v38, %v389_v39 }
 0x128   :  { %2143 = vmatpush1.bf16.msra.mxu1 %v3843_v44 }
 0x129   :  { %2249 = vmatpush1.bf16.msra.mxu0 %v3846_v45  ;;  %2144 = vmatprep.subr.bf16.mxu1 %v3851_v48 }
 0x12a   :  { %2250 = vmatprep.subr.bf16.mxu0 %v3854_v49 }
 0x12c   :  { %2145 = vmatpush1.bf16.msra.mxu1 %v3849_v50 }
 0x12d   :  { %2251 = vmatpush1.bf16.msra.mxu0 %v3852_v51  ;;  %2146 = vmatprep.subr.bf16.mxu1 %v3857_v56 }
 0x12e   :  { %2252 = vmatprep.subr.bf16.mxu0 %v3860_v57 }
 0x130   :  { %2147 = vmatpush1.bf16.msra.mxu1 %v3855_v58 }
 0x131   :  { %2253 = vmatpush1.bf16.msra.mxu0 %v3858_v59  ;;  %2148 = vmatprep.subr.bf16.mxu1 %v3863_v60 }
 0x132   :  { %2254 = vmatprep.subr.bf16.mxu0 %v3866_v62 }
 0x134   :  { %2149 = vmatpush1.bf16.msra.mxu1 %v3861_v63 }
 0x135   :  { %2255 = vmatpush1.bf16.msra.mxu0 %v3864_v0 }
 0x136   :  { %2277 = vmatprep.subr.bf16.mxu0 %v3869_v1 }
 0x137   :  { %2151 = vmatmul.mubr.bf16.vlgmr.msra.gmra.mrb[8].mxu1 %v4137_v37 }
 0x138   :  { %2257 = vmatmul.mubr.bf16.vlgmr.msra.gmra.mrb[8].mxu0 %v4117_v15  ;;  %2160 = vmatprep.mubr.bf16.mxu1 %v4139_v47  ;;  %v3881_v15 = vld [vmem:[#allocation4 + $0x6d4] ss:$24 sps:$4 sm:$0xff]  }
 0x139   :  { %2278 = vmatpush1.bf16.msra.mxu0 %v3867_v2  ;;  %2266 = vmatprep.mubr.bf16.mxu0 %v4121_v40  ;;  %v3882_v40 = vld [vmem:[#allocation4 + $0x700] ss:$24 sps:$4 sm:$0xff]  }
 0x13a   :  { %2279 = vmatprep.subr.bf16.mxu0 %v3872_v3 }
 0x13d   :  { %2280 = vmatpush1.bf16.msra.mxu0 %v3870_v4 }
 0x13e   :  { %2281 = vmatprep.subr.bf16.mxu0 %v3875_v5 }
 0x13f   :  { %2161 = vmatmul.mubr.bf16.gmra.mrb[12].mxu1 %v4145_v55 }
 0x140   :  { %2267 = vmatmul.mubr.bf16.gmra.mrb[12].mxu0 %v4125_v46  ;;  %v3890_v46 = vld [vmem:[#allocation4 + $0x764] ss:$24 sps:$4 sm:$0xff]  }
 0x141   :  { %2282 = vmatpush1.bf16.msra.mxu0 %v3873_v6  ;;  %2309 = vmatprep.mubr.bf16.mxu0 %v4134_v61  ;;  %v3888_v61 = vld [vmem:[#allocation4 + $0x760] ss:$24 sps:$4 sm:$0xff]  }
 0x142   :  { %2283 = vmatprep.subr.bf16.mxu0 %v3878_v7 }
 0x145   :  { %2284 = vmatpush1.bf16.msra.mxu0 %v3876_v14  ;;  %v3915_v14 = vld [vmem:[%s4554_s3 + $0x40] sm:$0xff]  }
 0x146   :  { %2285 = vmatprep.subr.bf16.mxu0 %v3881_v15  ;;  %v3916_v15 = vld [vmem:[%s4554_s3] sm:$0xff]   ;;  %3304 = vmatprep.subr.bf16.mxu1 %v3915_v14 }
 0x147   :  { %3305 = vmatpush3.bf16.msra.mxu1 %v3916_v15 }
 0x149   :  { %2286 = vmatpush1.bf16.msra.mxu0 %v3879_v8  ;;  %v4202_v8 = vld [vmem:[%s4554_s3 + $0x140] sm:$0xff]  }
 0x14a   :  { %2287 = vmatprep.subr.bf16.mxu0 %v3884_v9  ;;  %v1887_v53 = vpop.f32.mrb[0].mxu1  ;;  %v4207_v9 = vld [vmem:[%s4554_s3 + $0x100] sm:$0xff]  }
 0x14b   :  { %v1889_v41 = vpop.f32.mrb[1].mxu1  ;;  %v1888_v44 = vadd.f32 %v1887_v53, %v386_v42  ;;  %v3920_v53 = vld [vmem:[%s4554_s3 + $0x8] sm:$0xff]  }
 0x14c   :  { %v1891_v12 = vpop.f32.mrb[2].mxu1  ;;  %v1890_v45 = vadd.f32 %v1889_v41, %v390_v43  ;;  %v4225_v41 = vld [vmem:[%s4554_s3 + $0x108] sm:$0xff]  }
 0x14d   :  { %2288 = vmatpush1.bf16.msra.mxu0 %v3882_v40  ;;  %v1893_v13 = vpop.f32.mrb[3].mxu1  ;;  %v1892_v48 = vadd.f32 %v1891_v12, %v386_v42  ;;  %v3919_v40 = vld [vmem:[%s4554_s3 + $0x48] sm:$0xff]   ;;  %v4234_v12 = vld [vmem:[%s4554_s3 + $0x150] sm:$0xff]  }
 0x14e   :  { %2289 = vmatprep.subr.bf16.mxu0 %v3887_v10  ;;  %v1894_v50 = vadd.f32 %v1893_v13, %v390_v43  ;;  %v4216_v10 = vld [vmem:[%s4554_s3 + $0x148] sm:$0xff]   ;;  %3306 = vmatprep.subr.bf16.mxu1 %v3919_v40  ;;  %v4243_v13 = vld [vmem:[%s4554_s3 + $0x110] sm:$0xff]  }
 0x14f   :  { %3307 = vmatpush3.bf16.msra.mxu1 %v3920_v53 }
 0x151   :  { %2290 = vmatpush1.bf16.msra.mxu0 %v3885_v11  ;;  %v3923_v11 = vld [vmem:[%s4554_s3 + $0x50] sm:$0xff]  }
 0x152   :  { %2291 = vmatprep.subr.bf16.mxu0 %v3890_v46  ;;  %v1897_v23 = vpop.f32.mrb[4].mxu1  ;;  %v3924_v46 = vld [vmem:[%s4554_s3 + $0x10] sm:$0xff]   ;;  %3308 = vmatprep.subr.bf16.mxu1 %v3923_v11 }
 0x153   :  { %v1899_v24 = vpop.f32.mrb[5].mxu1  ;;  %v1898_v59 = vadd.f32 %v1897_v23, %v386_v42  ;;  %3309 = vmatpush3.bf16.msra.mxu1 %v3924_v46  ;;  %v397_v23 = vsub.s32 3, %v4168_v35 }
 0x154   :  { %v1901_v25 = vpop.f32.mrb[6].mxu1  ;;  %v1900_v60 = vadd.f32 %v1899_v24, %v390_v43 }
 0x155   :  { %2292 = vmatpush1.bf16.msra.mxu0 %v3888_v61  ;;  %v1903_v27 = vpop.f32.mrb[7].mxu1  ;;  %v1902_v62 = vadd.f32 %v1901_v25, %v386_v42  ;;  %v398_v25 = vrot.slane %v4172_v38, %v397_v23 }
 0x156   :  { %2293 = vmatprep.subr.bf16.mxu0 %v3893_v16  ;;  %v1904_v0 = vadd.f32 %v1903_v27, %v390_v43 }
 0x159   :  { %2294 = vmatpush1.bf16.msra.mxu0 %v3891_v52 }
 0x15a   :  { %2295 = vmatprep.subr.bf16.mxu0 %v3896_v17 }
 0x15d   :  { %2296 = vmatpush1.bf16.msra.mxu0 %v3894_v18 }
 0x15e   :  { %2297 = vmatprep.subr.bf16.mxu0 %v3899_v19 }
 0x161   :  { %2298 = vmatpush1.bf16.msra.mxu0 %v3897_v20 }
 0x162   :  { %2299 = vmatprep.subr.bf16.mxu0 %v3902_v21 }
 0x165   :  { %2300 = vmatpush1.bf16.msra.mxu0 %v3900_v54  ;;  %v393_v54 = vsub.s32 2, %v4168_v35 }
 0x166   :  { %2301 = vmatprep.subr.bf16.mxu0 %v3905_v22 }
 0x167   :  { %v394_v22 = vrot.slane %v4172_v38, %v393_v54 }
 0x169   :  { %2302 = vmatpush1.bf16.msra.mxu0 %v3903_v26 }
 0x16a   :  { %2303 = vmatprep.subr.bf16.mxu0 %v3908_v28 }
 0x16d   :  { %2304 = vmatpush1.bf16.msra.mxu0 %v3906_v29  ;;  %v401_v29 = vsub.s32 4, %v4168_v35 }
 0x16e   :  { %2305 = vmatprep.subr.bf16.mxu0 %v3911_v30 }
 0x16f   :  { %v402_v43 = vrot.slane %v4172_v38, %v401_v29 }
 0x171   :  { %2306 = vmatpush1.bf16.msra.mxu0 %v3909_v31 }
 0x172   :  { %2307 = vmatprep.subr.bf16.mxu0 %v3914_v32  ;;  %v405_v32 = vsub.s32 5, %v4168_v35 }
 0x175   :  { %2308 = vmatpush1.bf16.msra.mxu0 %v3912_v33 }
 0x176   :  { %3360 = vmatprep.subr.bf16.mxu0 %v4202_v8 }
 0x178   :  { %2310 = vmatmul.mubr.bf16.vlgmr.msra.gmra.mrb[8].mxu0 %v4137_v37 }
 0x179   :  { %2319 = vmatprep.mubr.bf16.mxu0 %v4139_v47  ;;  %3361 = vmatpush3.bf16.msra.mxu0 %v4207_v9 }
 0x17a   :  { %3362 = vmatprep.subr.bf16.mxu0 %v4216_v10 }
 0x17d   :  { %3363 = vmatpush3.bf16.msra.mxu0 %v4225_v41 }
 0x17e   :  { %3364 = vmatprep.subr.bf16.mxu0 %v4234_v12 }
 0x180   :  { %2320 = vmatmul.mubr.bf16.gmra.mrb[12].mxu0 %v4145_v55 }
 0x181   :  { %3365 = vmatpush3.bf16.msra.mxu0 %v4243_v13 }
 0x18b   :  { %v1993_v37 = vpop.f32.mrb[0].mxu0 }
 0x18c   :  { %v4177_v49 = vadd.f32 %v1993_v37, %v1888_v44  ;;  %v1995_v47 = vpop.f32.mrb[1].mxu0 }
 0x18d   :  { %v4179_v51 = vadd.f32 %v1995_v47, %v1890_v45  ;;  %v1997_v55 = vpop.f32.mrb[2].mxu0  ;;  %v406_v45 = vrot.slane %v4172_v38, %v405_v32 }
 0x18e   :  { %v4181_v56 = vadd.f32 %v1997_v55, %v1892_v48  ;;  %v1999_v57 = vpop.f32.mrb[3].mxu0  ;;  %v2330_v27 = vmul.f32 %v4177_v49, %v4177_v49 }
 0x18f   :  { %v4183_v58 = vadd.f32 %v1999_v57, %v1894_v50  ;;  %v2331_v28 = vmul.f32 %v4179_v51, %v4179_v51 }
 0x190   :  { %v2336_v30 = vmul.f32 %v4181_v56, %v4181_v56 }
 0x191   :  { %v2337_v31 = vmul.f32 %v4183_v58, %v4183_v58  ;;  %v2354_v42 = vadd.f32 %v2331_v28, %v2330_v27 }
 0x193   :  { %v2003_v63 = vpop.f32.mrb[4].mxu0  ;;  %v2361_v44 = vadd.f32 %v2337_v31, %v2336_v30 }
 0x194   :  { %v4185_v1 = vadd.f32 %v2003_v63, %v1898_v59  ;;  %v2005_v2 = vpop.f32.mrb[5].mxu0 }
 0x195   :  { %v4187_v3 = vadd.f32 %v2005_v2, %v1900_v60  ;;  %v2007_v4 = vpop.f32.mrb[6].mxu0 }
 0x196   :  { %v4189_v5 = vadd.f32 %v2007_v4, %v1902_v62  ;;  %v2009_v6 = vpop.f32.mrb[7].mxu0  ;;  %v2342_v47 = vmul.f32 %v4185_v1, %v4185_v1 }
 0x197   :  { %v4191_v7 = vadd.f32 %v2009_v6, %v1904_v0  ;;  %v2343_v50 = vmul.f32 %v4187_v3, %v4187_v3 }
 0x198   :  { %v2348_v63 = vmul.f32 %v4189_v5, %v4189_v5 }
 0x199   :  { %v2349_v0 = vmul.f32 %v4191_v7, %v4191_v7  ;;  %v2368_v46 = vadd.f32 %v2343_v50, %v2342_v47 }
 0x19b   :  { %v2375_v54 = vadd.f32 %v2349_v0, %v2348_v63 }
 0x20a   :  { %v2152_v61 = vpop.f32.mrb[8].mxu1 }
 0x20b   :  { %v2154_v16 = vpop.f32.mrb[9].mxu1  ;;  %v4250_v24 = vadd.f32 %v2152_v61, %v394_v22 }
 0x20c   :  { %v2156_v52 = vpop.f32.mrb[10].mxu1  ;;  %v4267_v34 = vadd.f32 %v2154_v16, %v398_v25 }
 0x20d   :  { %v2158_v17 = vpop.f32.mrb[11].mxu1  ;;  %v4253_v26 = vadd.f32 %v2156_v52, %v394_v22  ;;  %v2332_v33 = vmul.f32 %v4250_v24, %v4250_v24 }
 0x20e   :  { %v4271_v39 = vadd.f32 %v2158_v17, %v398_v25  ;;  %v2333_v35 = vmul.f32 %v4267_v34, %v4267_v34 }
 0x20f   :  { %v2338_v36 = vmul.f32 %v4253_v26, %v4253_v26  ;;  %v2355_v37 = vadd.f32 %v2354_v42, %v2332_v33 }
 0x210   :  { %v2339_v57 = vmul.f32 %v4271_v39, %v4271_v39 }
 0x211   :  { %v2362_v55 = vadd.f32 %v2361_v44, %v2338_v36  ;;  %v2356_v11 = vadd.f32 %v2355_v37, %v2333_v35 }
 0x212   :  { %v2162_v18 = vpop.f32.mrb[12].mxu1 }
 0x213   :  { %v2164_v19 = vpop.f32.mrb[13].mxu1  ;;  %v4277_v48 = vadd.f32 %v2162_v18, %v394_v22  ;;  %v2363_v61 = vadd.f32 %v2362_v55, %v2339_v57 }
 0x214   :  { %v2166_v20 = vpop.f32.mrb[14].mxu1  ;;  %v4293_v2 = vadd.f32 %v2164_v19, %v398_v25 }
 0x215   :  { %v2168_v21 = vpop.f32.mrb[15].mxu1  ;;  %v4285_v60 = vadd.f32 %v2166_v20, %v394_v22  ;;  %v2344_v14 = vmul.f32 %v4277_v48, %v4277_v48 }
 0x216   :  { %v4309_v18 = vadd.f32 %v2168_v21, %v398_v25  ;;  %v2345_v22 = vmul.f32 %v4293_v2, %v4293_v2 }
 0x217   :  { %v2350_v17 = vmul.f32 %v4285_v60, %v4285_v60  ;;  %v2369_v23 = vadd.f32 %v2368_v46, %v2344_v14  ;;  %v3928_v14 = vld [vmem:[%s4554_s3 + $0x18] sm:$0xff]   ;;  %v3932_v46 = vld [vmem:[%s4554_s3 + $0x20] sm:$0xff]  }
 0x218   :  { %v2351_v21 = vmul.f32 %v4309_v18, %v4309_v18 }
 0x219   :  { %v2376_v31 = vadd.f32 %v2375_v54, %v2350_v17  ;;  %v2370_v47 = vadd.f32 %v2369_v23, %v2345_v22  ;;  %v3935_v17 = vld [vmem:[%s4554_s3 + $0x68] sm:$0xff]   ;;  %v3939_v22 = vld [vmem:[%s4554_s3 + $0x70] sm:$0xff]  }
 0x21a   :  { %v4385_v54 = vld [vmem:[%s4554_s3 + $0x128] sm:$0xff]   ;;  %v3940_v23 = vld [vmem:[%s4554_s3 + $0x30] sm:$0xff]  }
 0x21b   :  { %v2377_v57 = vadd.f32 %v2376_v31, %v2351_v21  ;;  %v4415_v31 = vld [vmem:[%s4554_s3 + $0x178] sm:$0xff]  }
 0x21c   :  { %v4421_v21 = vld [vmem:[%s4554_s3 + $0x138] sm:$0xff]  }
 0x24b   :  { %v2311_v59 = vpop.f32.mrb[8].mxu0 }
 0x24c   :  { %v4287_v38 = vadd.f32 %v2311_v59, %v402_v43  ;;  %v2313_v62 = vpop.f32.mrb[9].mxu0 }
 0x24d   :  { %v4295_v4 = vadd.f32 %v2313_v62, %v406_v45  ;;  %v2315_v6 = vpop.f32.mrb[10].mxu0 }
 0x24e   :  { %v2334_v15 = vmul.f32 %v4287_v38, %v4287_v38  ;;  %v4301_v40 = vadd.f32 %v2315_v6, %v402_v43  ;;  %v2317_v53 = vpop.f32.mrb[11].mxu0 }
 0x24f   :  { %v4303_v16 = vadd.f32 %v2317_v53, %v406_v45  ;;  %v2335_v52 = vmul.f32 %v4295_v4, %v4295_v4  ;;  %v4349_v53 = vld [vmem:[%s4554_s3 + $0x118] sm:$0xff]  }
 0x250   :  { %v2340_v19 = vmul.f32 %v4301_v40, %v4301_v40  ;;  %v2357_v20 = vadd.f32 %v2356_v11, %v2334_v15  ;;  %v4344_v15 = vld [vmem:[%s4554_s3 + $0x158] sm:$0xff]   ;;  %v3931_v11 = vld [vmem:[%s4554_s3 + $0x60] sm:$0xff]  }
 0x251   :  { %v2341_v27 = vmul.f32 %v4303_v16, %v4303_v16  ;;  %3366 = vmatprep.subr.bf16.mxu0 %v4344_v15 }
 0x252   :  { %v2358_v28 = vadd.f32 %v2357_v20, %v2335_v52  ;;  %v2364_v29 = vadd.f32 %v2363_v61, %v2340_v19  ;;  %3367 = vmatpush3.bf16.msra.mxu0 %v4349_v53  ;;  %v4362_v61 = vld [vmem:[%s4554_s3 + $0x160] sm:$0xff]   ;;  %v3936_v19 = vld [vmem:[%s4554_s3 + $0x28] sm:$0xff]  }
 0x253   :  { %v2321_v30 = vpop.f32.mrb[12].mxu0  ;;  %v4367_v52 = vld [vmem:[%s4554_s3 + $0x120] sm:$0xff]   ;;  %3368 = vmatprep.subr.bf16.mxu0 %v4362_v61  ;;  %v4380_v20 = vld [vmem:[%s4554_s3 + $0x168] sm:$0xff]  }
 0x254   :  { %v4319_v25 = vadd.f32 %v2321_v30, %v402_v43  ;;  %v2323_v32 = vpop.f32.mrb[13].mxu0  ;;  %2359 = vadd.xlane.f32.xlu0 %v2358_v28  ;;  %v2365_v35 = vadd.f32 %v2364_v29, %v2341_v27  ;;  %v4398_v27 = vld [vmem:[%s4554_s3 + $0x170] sm:$0xff]   ;;  %v3943_v29 = vld [vmem:[%s4554_s3 + $0x78] sm:$0xff]  }
 0x255   :  { %v4321_v33 = vadd.f32 %v2323_v32, %v406_v45  ;;  %v2325_v36 = vpop.f32.mrb[14].mxu0  ;;  %v4403_v28 = vld [vmem:[%s4554_s3 + $0x130] sm:$0xff]   ;;  %v3944_v30 = vld [vmem:[%s4554_s3 + $0x38] sm:$0xff]   ;;  %v3947_v32 = vld [vmem:[%s4554_s3 + $0xc0] sm:$0xff]  }
 0x256   :  { %v2346_v42 = vmul.f32 %v4319_v25, %v4319_v25  ;;  %v4325_v44 = vadd.f32 %v2325_v36, %v402_v43  ;;  %v2327_v37 = vpop.f32.mrb[15].mxu0  ;;  %3369 = vmatpush3.bf16.msra.mxu0 %v4367_v52 }
 0x257   :  { %v4327_v50 = vadd.f32 %v2327_v37, %v406_v45  ;;  %v2347_v55 = vmul.f32 %v4321_v33, %v4321_v33  ;;  %v3927_v45 = vld [vmem:[%s4554_s3 + $0x58] sm:$0xff]   ;;  %3370 = vmatprep.subr.bf16.mxu0 %v4380_v20 }
 0x258   :  { %v2352_v59 = vmul.f32 %v4325_v44, %v4325_v44  ;;  %2366 = vadd.xlane.f32.xlu0 %v2365_v35  ;;  %v2371_v62 = vadd.f32 %v2370_v47, %v2346_v42  ;;  %3310 = vmatprep.subr.bf16.mxu1 %v3927_v45 }
 0x259   :  { %v2353_v63 = vmul.f32 %v4327_v50, %v4327_v50  ;;  %3311 = vmatpush3.bf16.msra.mxu1 %v3928_v14 }
 0x25a   :  { %v2372_v0 = vadd.f32 %v2371_v62, %v2347_v55  ;;  %v2378_v43 = vadd.f32 %v2377_v57, %v2352_v59  ;;  %3312 = vmatprep.subr.bf16.mxu1 %v3931_v11  ;;  %3371 = vmatpush3.bf16.msra.mxu0 %v4385_v54 }
 0x25b   :  { %3372 = vmatprep.subr.bf16.mxu0 %v4398_v27 }
 0x25c   :  { %2373 = vadd.xlane.f32.xlu1 %v2372_v0  ;;  %v2379_v6 = vadd.f32 %v2378_v43, %v2353_v63 }
 0x25d   :  { %3313 = vmatpush3.bf16.msra.mxu1 %v3932_v46 }
 0x25e   :  { %3314 = vmatprep.subr.bf16.mxu1 %v3935_v17  ;;  %3373 = vmatpush3.bf16.msra.mxu0 %v4403_v28 }
 0x25f   :  { %3374 = vmatprep.subr.bf16.mxu0 %v4415_v31 }
 0x260   :  { %2380 = vadd.xlane.f32.xlu1 %v2379_v6 }
 0x261   :  { %3315 = vmatpush3.bf16.msra.mxu1 %v3936_v19 }
 0x262   :  { %3316 = vmatprep.subr.bf16.mxu1 %v3939_v22  ;;  %3375 = vmatpush3.bf16.msra.mxu0 %v4421_v21  ;;  %v3951_v22 = vld [vmem:[%s4554_s3 + $0xd0] sm:$0xff]  }
 0x265   :  { %3317 = vmatpush3.bf16.msra.mxu1 %v3940_v23 }
 0x266   :  { %3318 = vmatprep.subr.bf16.mxu1 %v3943_v29 }
 0x269   :  { %3319 = vmatpush3.bf16.msra.mxu1 %v3944_v30 }
 0x26a   :  { %3332 = vmatprep.subr.bf16.mxu1 %v3947_v32 }
 0x2e1   :  { %v2360_v36 = vpop.xlane.xlu0 %2359 }
 0x2e2   :  { %v2382_v42 = vmax.f32 %v2360_v36, 1e-24 }
 0x2e4   :  { %3963 = vrsqrt.f32 %v2382_v42 }
 0x2e5   :  { %v2367_v37 = vpop.xlane.xlu0 %2366 }
 0x2e6   :  { %v2383_v35 = vmax.f32 %v2367_v37, 1e-24 }
 0x2e8   :  { %3965 = vrsqrt.f32 %v2383_v35 }
 0x2e9   :  { %v2374_v47 = vpop.xlane.xlu1 %2373 }
 0x2ea   :  { %v2384_v55 = vmax.f32 %v2374_v47, 1e-24 }
 0x2ec   :  { %3967 = vrsqrt.f32 %v2384_v55  ;;  %v3957_v55 = vld [vmem:[%s4554_s3 + $0xe8] sm:$0xff]  }
 0x2ed   :  { %v2381_v57 = vpop.xlane.xlu1 %2380 }
 0x2ee   :  { %v2385_v59 = vmax.f32 %v2381_v57, 1e-24  ;;  %v4428_v62 = vpop.eup %3963  ;;  %v3958_v57 = vld [vmem:[%s4554_s3 + $0xa8] sm:$0xff]  }
 0x2ef   :  { %v2391_v0 = vmul.f32 %v4428_v62, %v4179_v51  ;;  %v2395_v43 = vmul.f32 %v4428_v62, %v4295_v4  ;;  %v2390_v6 = vmul.f32 %v4428_v62, %v4177_v49  ;;  %v2394_v45 = vmul.f32 %v4428_v62, %v4287_v38  ;;  %v3948_v49 = vld [vmem:[%s4554_s3 + $0x80] sm:$0xff]  }
 0x2f0   :  { %3969 = vrsqrt.f32 %v2385_v59  ;;  %v3959_v59 = vld [vmem:[%s4554_s3 + $0xf0] sm:$0xff]  }
 0x2f2   :  { %v4430_v63 = vpop.eup %3965 }
 0x2f3   :  { %v2397_v14 = vmul.f32 %v4430_v63, %v4183_v58  ;;  %v2401_v11 = vmul.f32 %v4430_v63, %v4303_v16  ;;  %v2396_v46 = vmul.f32 %v4430_v63, %v4181_v56  ;;  %v2400_v51 = vmul.f32 %v4430_v63, %v4301_v40  ;;  %v3949_v58 = vld [vmem:[%s4554_s3 + $0xc8] sm:$0xff]  }
 0x2f4   :  { %v3950_v56 = vld [vmem:[%s4554_s3 + $0x88] sm:$0xff]   ;;  %v2399_v23 = vmul.f32 %v4430_v63, %v4271_v39  ;;  %v3952_v39 = vld [vmem:[%s4554_s3 + $0x90] sm:$0xff]  }
 0x2f5   :  { %v2415_v17 = vpack.c.bf16 %v2397_v14, %v2391_v0  ;;  %v2419_v4 = vpack.c.bf16 %v2401_v11, %v2395_v43  ;;  %v2414_v19 = vpack.c.bf16 %v2396_v46, %v2390_v6  ;;  %v2418_v38 = vpack.c.bf16 %v2400_v51, %v2394_v45  ;;  %v3960_v0 = vld [vmem:[%s4554_s3 + $0xb0] sm:$0xff]   ;;  %v3961_v43 = vld [vmem:[%s4554_s3 + $0xf8] sm:$0xff]  }
 0x2f6   :  { %v3968_v16 = vpop.eup %3967  ;;  %v3962_v6 = vld [vmem:[%s4554_s3 + $0xb8] sm:$0xff]   ;;  %v2398_v45 = vmul.f32 %v4430_v63, %v4253_v26  ;;  %v2392_v11 = vmul.f32 %v4428_v62, %v4250_v24 }
 0x2f7   :  { %2842 = vmatprep.mubr.bf16.mxu1 %v2415_v17  ;;  %2940 = vmatprep.mubr.bf16.mxu0 %v2419_v4  ;;  %v2403_v29 = vmul.f32 %v3968_v16, %v4187_v3  ;;  %v2402_v32 = vmul.f32 %v3968_v16, %v4185_v1  ;;  %v4467_v42 = vmul.f32 %v3968_v16, %v4319_v25  ;;  %v3953_v1 = vld [vmem:[%s4554_s3 + $0xd8] sm:$0xff]  }
 0x2f8   :  { %2843 = vmatmul.mubr.bf16.vlgmr.msra.gmra.mrb[16].mxu1 %v2414_v19  ;;  %2941 = vmatmul.mubr.bf16.vlgmr.msra.gmra.mrb[16].mxu0 %v2418_v38  ;;  %v2393_v3 = vmul.f32 %v4428_v62, %v4267_v34  ;;  %v3954_v25 = vld [vmem:[%s4554_s3 + $0x98] sm:$0xff]   ;;  %v3955_v34 = vld [vmem:[%s4554_s3 + $0xe0] sm:$0xff]   ;;  %v2405_v46 = vmul.f32 %v3968_v16, %v4293_v2  ;;  %v2416_v51 = vpack.c.bf16 %v2398_v45, %v2392_v11 }
 0x2f9   :  { %3333 = vmatpush3.bf16.msra.mxu1 %v3948_v49  ;;  %v2404_v63 = vmul.f32 %v3968_v16, %v4277_v48  ;;  %v2407_v24 = vmul.f32 %v3968_v16, %v4321_v33 }
 0x2fa   :  { %v3970_v40 = vpop.eup %3969  ;;  %3334 = vmatprep.subr.bf16.mxu1 %v3949_v58 }
 0x2fb   :  { %v2409_v30 = vmul.f32 %v3970_v40, %v4191_v7  ;;  %v2408_v36 = vmul.f32 %v3970_v40, %v4189_v5  ;;  %v4470_v37 = vmul.f32 %v3970_v40, %v4325_v44  ;;  %v2417_v7 = vpack.c.bf16 %v2399_v23, %v2393_v3  ;;  %v3956_v44 = vld [vmem:[%s4554_s3 + $0xa0] sm:$0xff]  }
 0x2fc   :  { %v2411_v14 = vmul.f32 %v3970_v40, %v4309_v18  ;;  %v2410_v26 = vmul.f32 %v3970_v40, %v4285_v60  ;;  %v2413_v18 = vmul.f32 %v3970_v40, %v4327_v50 }
 0x2fd   :  { %3335 = vmatpush3.bf16.msra.mxu1 %v3950_v56  ;;  %v2421_v35 = vpack.c.bf16 %v2409_v30, %v2403_v29  ;;  %v2420_v47 = vpack.c.bf16 %v2408_v36, %v2402_v32  ;;  %v2424_v5 = vpack.c.bf16 %v4470_v37, %v4467_v42 }
 0x2fe   :  { %3336 = vmatprep.subr.bf16.mxu1 %v3951_v22  ;;  %v2423_v17 = vpack.c.bf16 %v2411_v14, %v2405_v46  ;;  %v2422_v2 = vpack.c.bf16 %v2410_v26, %v2404_v63 }
 0x2ff   :  { %2850 = vmatprep.mubr.bf16.mxu1 %v2421_v35 }
 0x300   :  { %2851 = vmatmul.mubr.bf16.gmra.mrb[20].mxu1 %v2420_v47 }
 0x301   :  { %3337 = vmatpush3.bf16.msra.mxu1 %v3952_v39  ;;  %2891 = vmatprep.mubr.bf16.mxu1 %v2417_v7 }
 0x302   :  { %3338 = vmatprep.subr.bf16.mxu1 %v3953_v1 }
 0x305   :  { %3339 = vmatpush3.bf16.msra.mxu1 %v3954_v25 }
 0x306   :  { %3340 = vmatprep.subr.bf16.mxu1 %v3955_v34 }
 0x309   :  { %3341 = vmatpush3.bf16.msra.mxu1 %v3956_v44 }
 0x30a   :  { %3342 = vmatprep.subr.bf16.mxu1 %v3957_v55 }
 0x30d   :  { %3343 = vmatpush3.bf16.msra.mxu1 %v3958_v57 }
 0x30e   :  { %3344 = vmatprep.subr.bf16.mxu1 %v3959_v59 }
 0x311   :  { %3345 = vmatpush3.bf16.msra.mxu1 %v3960_v0 }
 0x312   :  { %3346 = vmatprep.subr.bf16.mxu1 %v3961_v43 }
 0x315   :  { %3347 = vmatpush3.bf16.msra.mxu1 %v3962_v6 }
 0x316   :  { %3388 = vmatprep.subr.bf16.mxu1 %v4202_v8  ;;  %v2425_v8 = vpack.c.bf16 %v2413_v18, %v2407_v24 }
 0x318   :  { %2892 = vmatmul.mubr.bf16.vlgmr.msra.gmra.mrb[24].mxu1 %v2416_v51 }
 0x319   :  { %2899 = vmatprep.mubr.bf16.mxu1 %v2423_v17  ;;  %3396 = vmatpush3.bf16.msra.mxu1 %v4207_v9 }
 0x31a   :  { %3389 = vmatprep.subr.bf16.mxu1 %v4216_v10 }
 0x31d   :  { %3397 = vmatpush3.bf16.msra.mxu1 %v4225_v41 }
 0x31e   :  { %3390 = vmatprep.subr.bf16.mxu1 %v4234_v12 }
 0x320   :  { %2900 = vmatmul.mubr.bf16.gmra.mrb[28].mxu1 %v2422_v2 }
 0x321   :  { %3398 = vmatpush3.bf16.msra.mxu1 %v4243_v13  ;;  %2948 = vmatprep.mubr.bf16.mxu1 %v2425_v8 }
 0x322   :  { %3391 = vmatprep.subr.bf16.mxu1 %v4344_v15 }
 0x325   :  { %3399 = vmatpush3.bf16.msra.mxu1 %v4349_v53 }
 0x326   :  { %3392 = vmatprep.subr.bf16.mxu1 %v4362_v61 }
 0x329   :  { %3400 = vmatpush3.bf16.msra.mxu1 %v4367_v52 }
 0x32a   :  { %3393 = vmatprep.subr.bf16.mxu1 %v4380_v20 }
 0x32d   :  { %3401 = vmatpush3.bf16.msra.mxu1 %v4385_v54 }
 0x32e   :  { %3394 = vmatprep.subr.bf16.mxu1 %v4398_v27 }
 0x331   :  { %3402 = vmatpush3.bf16.msra.mxu1 %v4403_v28 }
 0x332   :  { %3395 = vmatprep.subr.bf16.mxu1 %v4415_v31 }
 0x335   :  { %3403 = vmatpush3.bf16.msra.mxu1 %v4421_v21 }
 0x338   :  { %2949 = vmatmul.mubr.bf16.vlgmr.msra.gmra.mrb[32].mxu1 %v2424_v5 }
 0x3cb   :  { %v3320_v9 = vpop.f32.mrb[16].mxu1  ;;  %v3376_v10 = vpop.f32.mrb[16].mxu0 }
 0x3cc   :  { %v3321_v41 = vpop.f32.mrb[17].mxu1  ;;  %v3377_v12 = vpop.f32.mrb[17].mxu0 }
 0x3cd   :  { %v3322_v13 = vadd.f32 %v3321_v41, %v3320_v9  ;;  %v3378_v48 = vadd.f32 %v3377_v12, %v3376_v10  ;;  %v3323_v60 = vpop.f32.mrb[18].mxu1  ;;  %v3379_v33 = vpop.f32.mrb[18].mxu0 }
 0x3ce   :  { %v3324_v50 = vpop.f32.mrb[19].mxu1  ;;  %v3380_v15 = vpop.f32.mrb[19].mxu0 }
 0x3cf   :  { %v3325_v53 = vadd.f32 %v3324_v50, %v3323_v60  ;;  %v3381_v61 = vadd.f32 %v3380_v15, %v3379_v33 }
 0x3d3   :  { %v3326_v52 = vpop.f32.mrb[20].mxu1 }
 0x3d4   :  { %v3327_v20 = vpop.f32.mrb[21].mxu1 }
 0x3d5   :  { %v3328_v54 = vadd.f32 %v3327_v20, %v3326_v52  ;;  %v3329_v27 = vpop.f32.mrb[22].mxu1 }
 0x3d6   :  { %v3330_v28 = vpop.f32.mrb[23].mxu1 }
 0x3d7   :  { %v3331_v31 = vadd.f32 %v3330_v28, %v3329_v27 }
 0x3eb   :  { %v3348_v21 = vpop.f32.mrb[24].mxu1 }
 0x3ec   :  { %v3349_v62 = vpop.f32.mrb[25].mxu1 }
 0x3ed   :  { %v3350_v4 = vadd.f32 %v3349_v62, %v3348_v21  ;;  %v3351_v19 = vpop.f32.mrb[26].mxu1 }
 0x3ee   :  { %v3352_v49 = vpop.f32.mrb[27].mxu1 }
 0x3ef   :  { %v2894_v38 = vadd.f32 %v3350_v4, %v3322_v13  ;;  %v3353_v58 = vadd.f32 %v3352_v49, %v3351_v19 }
 0x3f1   :  { %v2943_v16 = vadd.f32 %v3378_v48, %v2894_v38  ;;  %v2897_v56 = vadd.f32 %v3353_v58, %v3325_v53 }
 0x3f3   :  { %2958 = vst.msk [vmem:[%s4555_s4] sm:$0xff] %vm2957_vm0, %v2943_v16  ;;  %v2946_v40 = vadd.f32 %v3381_v61, %v2897_v56  ;;  %v3354_v22 = vpop.f32.mrb[28].mxu1 }
 0x3f4   :  { %v3355_v23 = vpop.f32.mrb[29].mxu1 }
 0x3f5   :  { %2959 = vst.msk [vmem:[%s4555_s4 + $0x8] sm:$0xff] %vm2957_vm0, %v2946_v40  ;;  %v3356_v29 = vadd.f32 %v3355_v23, %v3354_v22  ;;  %v3357_v30 = vpop.f32.mrb[30].mxu1 }
 0x3f6   :  { %v3358_v32 = vpop.f32.mrb[31].mxu1 }
 0x3f7   :  { %v2902_v36 = vadd.f32 %v3356_v29, %v3328_v54  ;;  %v3359_v42 = vadd.f32 %v3358_v32, %v3357_v30 }
 0x3f9   :  { %v2905_v37 = vadd.f32 %v3359_v42, %v3331_v31 }
 0x40b   :  { %v3382_v35 = vpop.f32.mrb[32].mxu1 }
 0x40c   :  { %v3383_v47 = vpop.f32.mrb[33].mxu1 }
 0x40d   :  { %v3384_v39 = vadd.f32 %v3383_v47, %v3382_v35  ;;  %v3385_v3 = vpop.f32.mrb[34].mxu1 }
 0x40e   :  { %v3386_v1 = vpop.f32.mrb[35].mxu1 }
 0x40f   :  { %v2951_v5 = vadd.f32 %v3384_v39, %v2902_v36  ;;  %v3387_v7 = vadd.f32 %v3386_v1, %v3385_v3 }
 0x411   :  { %2960 = vst.msk [vmem:[%s4555_s4 + $0x10] sm:$0xff] %vm2957_vm0, %v2951_v5  ;;  %v2954_v25 = vadd.f32 %v3387_v7, %v2905_v37 }
 0x413   :  { %2961 = vst.msk [vmem:[%s4555_s4 + $0x18] sm:$0xff] %vm2957_vm0, %v2954_v25 }
 0x414   :  { %2966 = vsyncpa [#allocation3], 1 }
 0x415   :  { %2967 = vsyncpa [#allocation5], 1 }

</bundles_post_ra>
